<compile_context>
chip_gen: v5e
topology: v5e:2x2
jax: 0.10.0
libtpu: 0.0.40
codegen_flags: <defaults>
</compile_context>

<pallas_src>
import numpy as np
import jax
import jax.numpy as jnp
from jax import lax
from jax.experimental import pallas as pl
from jax.experimental.pallas import tpu as pltpu

_BN_EPS = 1e-5


# ---------------------------------------------------------------------------
# Host-side (numpy) construction of the folded operator matrices.
# ---------------------------------------------------------------------------
def _up2_matrix(n):
    """(2n, n) bilinear 2x upsample matrix, PyTorch align_corners=False."""
    u = np.zeros((2 * n, n), np.float32)
    for o in range(2 * n):
        src = max((o + 0.5) / 2.0 - 0.5, 0.0)
        f = int(np.floor(src))
        frac = src - f
        i0 = min(f, n - 1)
        i1 = min(f + 1, n - 1)
        u[o, i0] += 1.0 - frac
        u[o, i1] += frac
    return u


def _shift_matrix(n, dx):
    """(n, n) right-mult matrix: out[w] = in[w + dx - 1], zero outside."""
    s = np.zeros((n, n), np.float32)
    for w in range(n):
        u = w + dx - 1
        if 0 <= u < n:
            s[u, w] = 1.0
    return s


def _build_up_mats(h0, n_layers):
    """Per-batch H-direction 2x upsample matrices (NO batch kron)."""
    ups, h = [], h0
    for _ in range(1, n_layers):
        ups.append(_up2_matrix(h))      # (2h, h)
        h *= 2
    return ups, _up2_matrix(h)          # head upsample (2h, h)


def _build_branch_lane_maps(branch, w0):
    """Lane maps per branch: W-upsample + dx taps + channel mixing.

    Returns G_cat[l] = [G_dy0 | G_dy1 | G_dy2]  (Cin*W_in, 3*Cout*W_out),
    per-layer folded BN scale/bias (repeated over W), the head lane map and
    the head bias.
    """
    g_cat, scales, biases = [], [], []
    kw_prev = None
    for layer_idx, (w, sc, bi) in enumerate(branch["convs"]):
        w = np.asarray(w, np.float32)                            # (3,3,Cin,Cout)
        wl = w0 * (2 ** layer_idx)
        g_dys = []
        for dy in range(3):
            m = np.zeros((w.shape[2] * wl, w.shape[3] * wl), np.float32)
            for dx in range(3):
                m += np.kron(w[dy, dx], _shift_matrix(wl, dx))
            if kw_prev is not None:
                m = kw_prev @ m                                  # fold prev W-upsample
            g_dys.append(m)
        g_cat.append(np.concatenate(g_dys, axis=1))              # (cw_in, 3*cw_out)
        scales.append(np.repeat(np.asarray(sc, np.float32), wl))
        biases.append(np.repeat(np.asarray(bi, np.float32), wl))
        kw_prev = np.kron(np.eye(w.shape[3], dtype=np.float32),
                          _up2_matrix(wl).T)
    out_sz = w0 * (2 ** len(branch["convs"]))
    head = np.kron(np.asarray(branch["w5"], np.float32),
                   np.eye(out_sz, dtype=np.float32))             # (C4*S, S)
    g_head = kw_prev @ head                                      # (C4*S/2, S)
    b5 = np.asarray(branch["b5"], np.float32).reshape(1, 1)
    return g_cat, scales, biases, g_head, b5


# ---------------------------------------------------------------------------
# Pallas forward builder.
# ---------------------------------------------------------------------------
def build_corner_predictor_forward(params, batch, inplanes, feat_sz,
                                   use_bf16=True):
    B, H0, W0 = batch, feat_sz, feat_sz
    n_layers = len(params["tl"]["convs"])
    assert n_layers == 4, "Corner_Predictor has 4 conv+BN+ReLU+up stages"
    S = feat_sz * (2 ** n_layers)                 # output_sz
    cdt = jnp.bfloat16 if use_bf16 else jnp.float32

    # --- lane maps (per branch, stacked on a leading branch axis) -----------
    tl = _build_branch_lane_maps(params["tl"], W0)
    br = _build_branch_lane_maps(params["br"], W0)
    g_cat = [np.stack([tl[0][l], br[0][l]], 0) for l in range(n_layers)]
    scales = [np.stack([tl[1][l], br[1][l]], 0)[:, None, :] for l in range(n_layers)]
    biases = [np.stack([tl[2][l], br[2][l]], 0)[:, None, :] for l in range(n_layers)]
    g_head = np.stack([tl[3], br[3]], 0)
    b5 = np.stack([tl[4], br[4]], 0)

    # --- row maps (shared by both branches, per-batch sized — no kron) ------
    up_mats, up_head = _build_up_mats(H0, n_layers)

    # --- soft-argmax reduction constants ------------------------------------
    iota = np.arange(S, dtype=np.float32)
    sel2 = np.zeros((2 * B, B * S), np.float32)   # rows 0..B-1: ones; B..2B-1: iota_y
    for b in range(B):
        sel2[b, b * S:(b + 1) * S] = 1.0
        sel2[B + b, b * S:(b + 1) * S] = iota
    redw = np.stack([np.ones(S, np.float32), iota], axis=1)      # (S, 2): [1 | iota_x]

    # static per-layer shapes
    H_IN = [H0] + [H0 * 2 ** (l - 1) for l in range(1, n_layers)]
    CW_OUT = [g_cat[l].shape[-1] // 3 for l in range(n_layers)]
    H_HEAD = H0 * 2 ** (n_layers - 1)

    # -------------------------------------------------------------------------
    def kernel(x_ref, u1_ref, u2_ref, u3_ref, uh_ref, sel_ref, rw_ref,
               g0_ref, g1_ref, g2_ref, g3_ref, gh_ref,
               s0_ref, s1_ref, s2_ref, s3_ref,
               c0_ref, c1_ref, c2_ref, c3_ref,
               b5_ref, o_ref):
        g_refs = (g0_ref, g1_ref, g2_ref, g3_ref)
        s_refs = (s0_ref, s1_ref, s2_ref, s3_ref)
        c_refs = (c0_ref, c1_ref, c2_ref, c3_ref)
        up_refs = (None, u1_ref, u2_ref, u3_ref)

        def dy_combine(u, cw):
            # u: (h_out, 3*cw) f32 for ONE batch item.  The three dy taps are
            # +/-1 sublane shifts with zero fill at the (per-batch) edges.
            d0 = u[:, 0:cw]
            d1 = u[:, cw:2 * cw]
            d2 = u[:, 2 * cw:3 * cw]
            zrow = jnp.zeros((1, cw), jnp.float32)
            down = jnp.concatenate([zrow, d0[:-1, :]], axis=0)   # row o <- d0[o-1]
            up = jnp.concatenate([d2[1:, :], zrow], axis=0)      # row o <- d2[o+1]
            return down + d1 + up

        h = x_ref[...].astype(cdt)                    # (B*H0, Cin*W0)

        for l in range(n_layers):
            h_in = H_IN[l]
            cw = CW_OUT[l]
            g = g_refs[l][0]                          # (cw_in, 3*cw), bf16
            # one fat lane-map matmul covering all 3 dy taps
            t = jnp.dot(h, g, preferred_element_type=jnp.float32)   # (B*h_in, 3*cw)
            blocks = []
            if l == 0:
                for b in range(B):
                    blocks.append(dy_combine(t[b * h_in:(b + 1) * h_in, :], cw))
            else:
                upm = up_refs[l][...]                 # (2*h_in, h_in), bf16
                tb = t.astype(cdt)
                for b in range(B):
                    u = jnp.dot(upm, tb[b * h_in:(b + 1) * h_in, :],
                                preferred_element_type=jnp.float32)
                    blocks.append(dy_combine(u, cw))
            acc = jnp.concatenate(blocks, axis=0)     # (B*h_out, cw)
            # folded BN (eval) + ReLU in f32
            h = jnp.maximum(acc * s_refs[l][0] + c_refs[l][0], 0.0).astype(cdt)

        # ---- head: 2x upsample (rows via uh, lanes folded into gh) + 1x1 ----
        hh = H_HEAD
        th = jnp.dot(h, gh_ref[0], preferred_element_type=jnp.float32)   # (B*hh, S)
        thb = th.astype(cdt)
        uph = uh_ref[...]                                                # (S, hh)
        score_blocks = [
            jnp.dot(uph, thb[b * hh:(b + 1) * hh, :],
                    preferred_element_type=jnp.float32)
            for b in range(B)
        ]
        score = jnp.concatenate(score_blocks, axis=0) + b5_ref[0]        # (B*S, S)

        # ---- soft-argmax (f32, vectorized over batch) -----------------------
        mx_rows = []
        for b in range(B):
            sb = score[b * S:(b + 1) * S, :]
            m_b = jnp.max(jnp.max(sb, axis=1, keepdims=True),
                          axis=0, keepdims=True)                         # (1,1)
            mx_rows.append(jnp.broadcast_to(m_b, (S, 1)))
        mx = jnp.concatenate(mx_rows, axis=0)                            # (B*S, 1)
        e = jnp.exp(score - mx)                                          # (B*S, S)

        # per-row [sum, x-weighted sum] in one matmul, then per-batch block
        # sums (and y-weighted sums) in one small matmul.
        rsw = jnp.dot(e, rw_ref[...], preferred_element_type=jnp.float32)      # (B*S, 2)
        stats = jnp.dot(sel_ref[...], rsw, preferred_element_type=jnp.float32)  # (2B, 2)
        z = stats[0:B, 0:1]
        ex = stats[0:B, 1:2] / z
        ey = stats[B:2 * B, 0:1] / z
        o_ref[0] = jnp.concatenate([ex, ey], axis=1)                     # (B, 2)

    # -------------------------------------------------------------------------
    def shared_spec(arr):
        shp = tuple(int(d) for d in arr.shape)
        nd = len(shp)
        return pl.BlockSpec(shp, lambda i, _nd=nd: (0,) * _nd)

    def branch_spec(arr):
        shp = tuple(int(d) for d in arr.shape)
        nd = len(shp)
        return pl.BlockSpec((1,) + shp[1:],
                            lambda i, _nd=nd: (i,) + (0,) * (_nd - 1))

    up_c = [jnp.asarray(u, cdt) for u in up_mats]
    uph_c = jnp.asarray(up_head, cdt)
    sel_c = jnp.asarray(sel2, jnp.float32)
    redw_c = jnp.asarray(redw, jnp.float32)
    g_c = [jnp.asarray(g, cdt) for g in g_cat]
    gh_c = jnp.asarray(g_head, cdt)
    s_c = [jnp.asarray(s, jnp.float32) for s in scales]
    c_c = [jnp.asarray(c, jnp.float32) for c in biases]
    b5_c = jnp.asarray(b5, jnp.float32)

    x_spec = pl.BlockSpec((B * H0, inplanes * W0), lambda i: (0, 0))
    in_specs = ([x_spec]
                + [shared_spec(u) for u in up_c]
                + [shared_spec(uph_c), shared_spec(sel_c), shared_spec(redw_c)]
                + [branch_spec(g) for g in g_c]
                + [branch_spec(gh_c)]
                + [branch_spec(s) for s in s_c]
                + [branch_spec(c) for c in c_c]
                + [branch_spec(b5_c)])

    call = pl.pallas_call(
        kernel,
        out_shape=jax.ShapeDtypeStruct((2, B, 2), jnp.float32),
        grid=(2,),
        in_specs=in_specs,
        out_specs=pl.BlockSpec((1, B, 2), lambda i: (i, 0, 0)),
        compiler_params=pltpu.CompilerParams(
            dimension_semantics=("parallel",),
            vmem_limit_bytes=32 * 1024 * 1024),
    )

    consts = [*up_c, uph_c, sel_c, redw_c, *g_c, gh_c, *s_c, *c_c, b5_c]

    @jax.jit
    def forward(x_nchw):
        # rows = batch-major spatial rows, lanes = channels x width.
        x2d = jnp.transpose(x_nchw.astype(jnp.float32), (0, 2, 1, 3)).reshape(
            B * H0, inplanes * W0).astype(cdt)
        raw = call(x2d, *consts)                      # (2, B, 2) = (branch, b, (x,y))
        return jnp.transpose(raw, (1, 0, 2)).reshape(B, 4)

    return forward


# ---------------------------------------------------------------------------
# Deterministic synthetic parameters (BN folded, eval mode).
# ---------------------------------------------------------------------------
def _init_conv_bn(key, cin, cout):
    k1, k2, k3, k4, k5, k6 = jax.random.split(key, 6)
    w = 0.1 * jax.random.normal(k1, (3, 3, cin, cout), jnp.float32)
    conv_b = 0.1 * jax.random.normal(k2, (cout,), jnp.float32)
    gamma = 1.0 + 0.1 * jax.random.normal(k3, (cout,), jnp.float32)
    beta = 0.1 * jax.random.normal(k4, (cout,), jnp.float32)
    mean = 0.1 * jax.random.normal(k5, (cout,), jnp.float32)
    var = 1.0 + 0.1 * jnp.abs(jax.random.normal(k6, (cout,), jnp.float32))
    scale = gamma / jnp.sqrt(var + _BN_EPS)
    bias = beta + (conv_b - mean) * scale
    return (w, scale, bias)


def _init_branch(key, inplanes, channel):
    ks = jax.random.split(key, 6)
    chans = [inplanes, channel, channel // 2, channel // 4, channel // 8]
    convs = [_init_conv_bn(ks[i], chans[i], chans[i + 1]) for i in range(4)]
    w5 = 0.1 * jax.random.normal(ks[4], (channel // 8, 1), jnp.float32)
    b5 = 0.1 * jax.random.normal(ks[5], (1,), jnp.float32)
    return {"convs": convs, "w5": w5, "b5": b5}


def init_corner_predictor(key, inplanes, channel):
    k_tl, k_br = jax.random.split(key)
    return {"tl": _init_branch(k_tl, inplanes, channel),
            "br": _init_branch(k_br, inplanes, channel)}


# ---------------------------------------------------------------------------
# Pure-JAX reference (for the numerical self-check).
# ---------------------------------------------------------------------------
def reference_forward(x_nchw, params):
    x = x_nchw.astype(jnp.float32)

    def up2(h):
        _, _, hh, ww = h.shape
        uh = jnp.asarray(_up2_matrix(hh))
        uw = jnp.asarray(_up2_matrix(ww))
        h = jnp.einsum('oh,bchw->bcow', uh, h)
        return jnp.einsum('pw,bcow->bcop', uw, h)

    def branch(h, p):
        for (w, sc, bi) in p["convs"]:
            h = lax.conv_general_dilated(
                h, jnp.asarray(w), (1, 1), ((1, 1), (1, 1)),
                dimension_numbers=('NCHW', 'HWIO', 'NCHW'))
            h = jnp.maximum(h * sc[None, :, None, None] + bi[None, :, None, None], 0.0)
            h = up2(h)
        return jnp.einsum('bchw,c->bhw', h, p["w5"][:, 0]) + p["b5"][0]

    def soft_argmax(score):
        bsz, s, _ = score.shape
        prob = jax.nn.softmax(score.reshape(bsz, s * s), axis=1)
        idx = jnp.arange(s, dtype=jnp.float32)
        cx = jnp.tile(idx, s)
        cy = jnp.repeat(idx, s)
        return jnp.sum(cx * prob, axis=1), jnp.sum(cy * prob, axis=1)

    xt, yt = soft_argmax(branch(x, params["tl"]))
    xb, yb = soft_argmax(branch(x, params["br"]))
    return jnp.stack([xt, yt, xb, yb], axis=1)


if __name__ == "__main__":
    key = jax.random.PRNGKey(0)
    k_x, k_p = jax.random.split(key)

    batch, inplanes, channel, feat_sz = 2, 4, 16, 8        # output_sz = 8*16 = 128
    x = jax.random.normal(k_x, (batch, inplanes, feat_sz, feat_sz), jnp.float32)
    params = init_corner_predictor(k_p, inplanes, channel)

    ref = jax.block_until_ready(reference_forward(x, params))

    # Structural validation at f32 operand precision (tight tolerance).
    fwd_f32 = build_corner_predictor_forward(params, batch, inplanes, feat_sz,
                                             use_bf16=False)
    out_f32 = jax.block_until_ready(fwd_f32(x))
    assert out_f32.shape == (batch, 4)
    err_f32 = float(jnp.max(jnp.abs(out_f32 - ref)))
    assert err_f32 < 2e-2, f"f32 kernel/reference mismatch: {err_f32}"

    # Performance build: bf16 MXU operands (f32 accumulate).  Expected-value
    # coordinates on a 128-px map are allowed <= 1 px of quantization drift.
    forward = build_corner_predictor_forward(params, batch, inplanes, feat_sz,
                                             use_bf16=True)
    out = jax.block_until_ready(forward(x))
    assert out.shape == (batch, 4)
    assert bool(jnp.all(jnp.isfinite(out)))
    err_bf16 = float(jnp.max(jnp.abs(out - ref)))
    assert err_bf16 < 1.0, f"bf16 kernel/reference mismatch: {err_bf16}"

    print("KERNEL_OK")
</pallas_src>

<mosaic_0001>
module attributes {stable_mosaic.version = 11 : i64} {
  func.func @kernel(%arg0: i32, %arg1: memref<16x32xf32, #tpu.memory_space<vmem>>, %arg2: memref<16x8xf32, #tpu.memory_space<vmem>>, %arg3: memref<32x16xf32, #tpu.memory_space<vmem>>, %arg4: memref<64x32xf32, #tpu.memory_space<vmem>>, %arg5: memref<128x64xf32, #tpu.memory_space<vmem>>, %arg6: memref<4x256xf32, #tpu.memory_space<vmem>>, %arg7: memref<128x2xf32, #tpu.memory_space<vmem>>, %arg8: memref<1x32x384xf32, #tpu.memory_space<vmem>>, %arg9: memref<1x128x384xf32, #tpu.memory_space<vmem>>, %arg10: memref<1x128x384xf32, #tpu.memory_space<vmem>>, %arg11: memref<1x128x384xf32, #tpu.memory_space<vmem>>, %arg12: memref<1x128x128xf32, #tpu.memory_space<vmem>>, %arg13: memref<1x1x128xf32, #tpu.memory_space<vmem>>, %arg14: memref<1x1x128xf32, #tpu.memory_space<vmem>>, %arg15: memref<1x1x128xf32, #tpu.memory_space<vmem>>, %arg16: memref<1x1x128xf32, #tpu.memory_space<vmem>>, %arg17: memref<1x1x128xf32, #tpu.memory_space<vmem>>, %arg18: memref<1x1x128xf32, #tpu.memory_space<vmem>>, %arg19: memref<1x1x128xf32, #tpu.memory_space<vmem>>, %arg20: memref<1x1x128xf32, #tpu.memory_space<vmem>>, %arg21: memref<1x1x1xf32, #tpu.memory_space<vmem>>, %arg22: memref<1x2x2xf32, #tpu.memory_space<vmem>>) attributes {dimension_semantics = [#tpu.dimension_semantics<parallel>], iteration_bounds = array<i64: 2>, scalar_prefetch = 0 : i64, scratch_operands = 0 : i64, tpu.core_type = #tpu.core_type<tc>, window_params = [{pipeline_mode = #tpu.pipeline_mode<synchronous>, transform_indices = @transform_0, window_bounds = array<i64: 16, 32>}, {pipeline_mode = #tpu.pipeline_mode<synchronous>, transform_indices = @transform_1, window_bounds = array<i64: 16, 8>}, {pipeline_mode = #tpu.pipeline_mode<synchronous>, transform_indices = @transform_2, window_bounds = array<i64: 32, 16>}, {pipeline_mode = #tpu.pipeline_mode<synchronous>, transform_indices = @transform_3, window_bounds = array<i64: 64, 32>}, {pipeline_mode = #tpu.pipeline_mode<synchronous>, transform_indices = @transform_4, window_bounds = array<i64: 128, 64>}, {pipeline_mode = #tpu.pipeline_mode<synchronous>, transform_indices = @transform_5, window_bounds = array<i64: 4, 256>}, {pipeline_mode = #tpu.pipeline_mode<synchronous>, transform_indices = @transform_6, window_bounds = array<i64: 128, 2>}, {transform_indices = @transform_7, window_bounds = array<i64: 1, 32, 384>}, {transform_indices = @transform_8, window_bounds = array<i64: 1, 128, 384>}, {transform_indices = @transform_9, window_bounds = array<i64: 1, 128, 384>}, {transform_indices = @transform_10, window_bounds = array<i64: 1, 128, 384>}, {transform_indices = @transform_11, window_bounds = array<i64: 1, 128, 128>}, {transform_indices = @transform_12, window_bounds = array<i64: 1, 1, 128>}, {transform_indices = @transform_13, window_bounds = array<i64: 1, 1, 128>}, {transform_indices = @transform_14, window_bounds = array<i64: 1, 1, 128>}, {transform_indices = @transform_15, window_bounds = array<i64: 1, 1, 128>}, {transform_indices = @transform_16, window_bounds = array<i64: 1, 1, 128>}, {transform_indices = @transform_17, window_bounds = array<i64: 1, 1, 128>}, {transform_indices = @transform_18, window_bounds = array<i64: 1, 1, 128>}, {transform_indices = @transform_19, window_bounds = array<i64: 1, 1, 128>}, {transform_indices = @transform_20, window_bounds = array<i64: 1, 1, 1>}, {transform_indices = @transform_21, window_bounds = array<i64: 1, 2, 2>}]} {
    %c0 = arith.constant 0 : index
    %c0_0 = arith.constant 0 : index
    %0 = vector.load %arg1[%c0, %c0_0] : memref<16x32xf32, #tpu.memory_space<vmem>>, vector<16x32xf32>
    %c0_1 = arith.constant 0 : index
    %c0_2 = arith.constant 0 : index
    %c0_3 = arith.constant 0 : index
    %1 = vector.load %arg8[%c0_1, %c0_2, %c0_3] : memref<1x32x384xf32, #tpu.memory_space<vmem>>, vector<1x32x384xf32>
    %2 = vector.shape_cast %1 : vector<1x32x384xf32> to vector<32x384xf32>
    %cst = arith.constant dense<0.000000e+00> : vector<16x384xf32>
    %3 = tpu.matmul %0, %2, %cst {dimension_numbers = #tpu.dot_dimension_numbers<[1], [0], [0], [1], [0, 0, 1, 1], [], []>} : vector<16x32xf32>, vector<32x384xf32>, vector<16x384xf32> -> vector<16x384xf32>
    %4 = vector.extract_strided_slice %3 {offsets = [0, 0], sizes = [8, 384], strides = [1, 1]} : vector<16x384xf32> to vector<8x384xf32>
    %5 = vector.extract_strided_slice %4 {offsets = [0, 0], sizes = [8, 128], strides = [1, 1]} : vector<8x384xf32> to vector<8x128xf32>
    %6 = vector.extract_strided_slice %4 {offsets = [0, 128], sizes = [8, 128], strides = [1, 1]} : vector<8x384xf32> to vector<8x128xf32>
    %7 = vector.extract_strided_slice %4 {offsets = [0, 256], sizes = [8, 128], strides = [1, 1]} : vector<8x384xf32> to vector<8x128xf32>
    %cst_4 = arith.constant 0.000000e+00 : f32
    %8 = vector.broadcast %cst_4 : f32 to vector<1x128xf32>
    %9 = vector.extract_strided_slice %5 {offsets = [0, 0], sizes = [7, 128], strides = [1, 1]} : vector<8x128xf32> to vector<7x128xf32>
    %10 = tpu.concatenate %8, %9 in 0 : vector<1x128xf32>, vector<7x128xf32> -> vector<8x128xf32>
    %11 = vector.extract_strided_slice %7 {offsets = [1, 0], sizes = [7, 128], strides = [1, 1]} : vector<8x128xf32> to vector<7x128xf32>
    %12 = tpu.concatenate %11, %8 in 0 : vector<7x128xf32>, vector<1x128xf32> -> vector<8x128xf32>
    %13 = arith.addf %10, %6 : vector<8x128xf32>
    %14 = arith.addf %13, %12 : vector<8x128xf32>
    %15 = vector.extract_strided_slice %3 {offsets = [8, 0], sizes = [8, 384], strides = [1, 1]} : vector<16x384xf32> to vector<8x384xf32>
    %16 = vector.extract_strided_slice %15 {offsets = [0, 0], sizes = [8, 128], strides = [1, 1]} : vector<8x384xf32> to vector<8x128xf32>
    %17 = vector.extract_strided_slice %15 {offsets = [0, 128], sizes = [8, 128], strides = [1, 1]} : vector<8x384xf32> to vector<8x128xf32>
    %18 = vector.extract_strided_slice %15 {offsets = [0, 256], sizes = [8, 128], strides = [1, 1]} : vector<8x384xf32> to vector<8x128xf32>
    %cst_5 = arith.constant 0.000000e+00 : f32
    %19 = vector.broadcast %cst_5 : f32 to vector<1x128xf32>
    %20 = vector.extract_strided_slice %16 {offsets = [0, 0], sizes = [7, 128], strides = [1, 1]} : vector<8x128xf32> to vector<7x128xf32>
    %21 = tpu.concatenate %19, %20 in 0 : vector<1x128xf32>, vector<7x128xf32> -> vector<8x128xf32>
    %22 = vector.extract_strided_slice %18 {offsets = [1, 0], sizes = [7, 128], strides = [1, 1]} : vector<8x128xf32> to vector<7x128xf32>
    %23 = tpu.concatenate %22, %19 in 0 : vector<7x128xf32>, vector<1x128xf32> -> vector<8x128xf32>
    %24 = arith.addf %21, %17 : vector<8x128xf32>
    %25 = arith.addf %24, %23 : vector<8x128xf32>
    %26 = tpu.concatenate %14, %25 in 0 : vector<8x128xf32>, vector<8x128xf32> -> vector<16x128xf32>
    %c0_6 = arith.constant 0 : index
    %c0_7 = arith.constant 0 : index
    %c0_8 = arith.constant 0 : index
    %27 = vector.load %arg13[%c0_6, %c0_7, %c0_8] : memref<1x1x128xf32, #tpu.memory_space<vmem>>, vector<1x1x128xf32>
    %28 = vector.shape_cast %27 : vector<1x1x128xf32> to vector<1x128xf32>
    %29 = vector.broadcast %28 : vector<1x128xf32> to vector<16x128xf32>
    %30 = arith.mulf %26, %29 : vector<16x128xf32>
    %c0_9 = arith.constant 0 : index
    %c0_10 = arith.constant 0 : index
    %c0_11 = arith.constant 0 : index
    %31 = vector.load %arg17[%c0_9, %c0_10, %c0_11] : memref<1x1x128xf32, #tpu.memory_space<vmem>>, vector<1x1x128xf32>
    %32 = vector.shape_cast %31 : vector<1x1x128xf32> to vector<1x128xf32>
    %33 = vector.broadcast %32 : vector<1x128xf32> to vector<16x128xf32>
    %34 = arith.addf %30, %33 : vector<16x128xf32>
    %cst_12 = arith.constant 0.000000e+00 : f32
    %35 = vector.broadcast %cst_12 : f32 to vector<16x128xf32>
    %36 = arith.maximumf %34, %35 : vector<16x128xf32>
    %c0_13 = arith.constant 0 : index
    %c0_14 = arith.constant 0 : index
    %c0_15 = arith.constant 0 : index
    %37 = vector.load %arg9[%c0_13, %c0_14, %c0_15] : memref<1x128x384xf32, #tpu.memory_space<vmem>>, vector<1x128x384xf32>
    %38 = vector.shape_cast %37 : vector<1x128x384xf32> to vector<128x384xf32>
    %cst_16 = arith.constant dense<0.000000e+00> : vector<16x384xf32>
    %39 = tpu.matmul %36, %38, %cst_16 {dimension_numbers = #tpu.dot_dimension_numbers<[1], [0], [0], [1], [0, 0, 1, 1], [], []>} : vector<16x128xf32>, vector<128x384xf32>, vector<16x384xf32> -> vector<16x384xf32>
    %c0_17 = arith.constant 0 : index
    %c0_18 = arith.constant 0 : index
    %40 = vector.load %arg2[%c0_17, %c0_18] : memref<16x8xf32, #tpu.memory_space<vmem>>, vector<16x8xf32>
    %41 = vector.extract_strided_slice %39 {offsets = [0, 0], sizes = [8, 384], strides = [1, 1]} : vector<16x384xf32> to vector<8x384xf32>
    %cst_19 = arith.constant dense<0.000000e+00> : vector<16x384xf32>
    %42 = tpu.matmul %40, %41, %cst_19 {dimension_numbers = #tpu.dot_dimension_numbers<[1], [0], [0], [1], [0, 0, 1, 1], [], []>} : vector<16x8xf32>, vector<8x384xf32>, vector<16x384xf32> -> vector<16x384xf32>
    %43 = vector.extract_strided_slice %42 {offsets = [0, 0], sizes = [16, 128], strides = [1, 1]} : vector<16x384xf32> to vector<16x128xf32>
    %44 = vector.extract_strided_slice %42 {offsets = [0, 128], sizes = [16, 128], strides = [1, 1]} : vector<16x384xf32> to vector<16x128xf32>
    %45 = vector.extract_strided_slice %42 {offsets = [0, 256], sizes = [16, 128], strides = [1, 1]} : vector<16x384xf32> to vector<16x128xf32>
    %cst_20 = arith.constant 0.000000e+00 : f32
    %46 = vector.broadcast %cst_20 : f32 to vector<1x128xf32>
    %47 = vector.extract_strided_slice %43 {offsets = [0, 0], sizes = [15, 128], strides = [1, 1]} : vector<16x128xf32> to vector<15x128xf32>
    %48 = tpu.concatenate %46, %47 in 0 : vector<1x128xf32>, vector<15x128xf32> -> vector<16x128xf32>
    %49 = vector.extract_strided_slice %45 {offsets = [1, 0], sizes = [15, 128], strides = [1, 1]} : vector<16x128xf32> to vector<15x128xf32>
    %50 = tpu.concatenate %49, %46 in 0 : vector<15x128xf32>, vector<1x128xf32> -> vector<16x128xf32>
    %51 = arith.addf %48, %44 : vector<16x128xf32>
    %52 = arith.addf %51, %50 : vector<16x128xf32>
    %53 = vector.extract_strided_slice %39 {offsets = [8, 0], sizes = [8, 384], strides = [1, 1]} : vector<16x384xf32> to vector<8x384xf32>
    %cst_21 = arith.constant dense<0.000000e+00> : vector<16x384xf32>
    %54 = tpu.matmul %40, %53, %cst_21 {dimension_numbers = #tpu.dot_dimension_numbers<[1], [0], [0], [1], [0, 0, 1, 1], [], []>} : vector<16x8xf32>, vector<8x384xf32>, vector<16x384xf32> -> vector<16x384xf32>
    %55 = vector.extract_strided_slice %54 {offsets = [0, 0], sizes = [16, 128], strides = [1, 1]} : vector<16x384xf32> to vector<16x128xf32>
    %56 = vector.extract_strided_slice %54 {offsets = [0, 128], sizes = [16, 128], strides = [1, 1]} : vector<16x384xf32> to vector<16x128xf32>
    %57 = vector.extract_strided_slice %54 {offsets = [0, 256], sizes = [16, 128], strides = [1, 1]} : vector<16x384xf32> to vector<16x128xf32>
    %cst_22 = arith.constant 0.000000e+00 : f32
    %58 = vector.broadcast %cst_22 : f32 to vector<1x128xf32>
    %59 = vector.extract_strided_slice %55 {offsets = [0, 0], sizes = [15, 128], strides = [1, 1]} : vector<16x128xf32> to vector<15x128xf32>
    %60 = tpu.concatenate %58, %59 in 0 : vector<1x128xf32>, vector<15x128xf32> -> vector<16x128xf32>
    %61 = vector.extract_strided_slice %57 {offsets = [1, 0], sizes = [15, 128], strides = [1, 1]} : vector<16x128xf32> to vector<15x128xf32>
    %62 = tpu.concatenate %61, %58 in 0 : vector<15x128xf32>, vector<1x128xf32> -> vector<16x128xf32>
    %63 = arith.addf %60, %56 : vector<16x128xf32>
    %64 = arith.addf %63, %62 : vector<16x128xf32>
    %65 = tpu.concatenate %52, %64 in 0 : vector<16x128xf32>, vector<16x128xf32> -> vector<32x128xf32>
    %c0_23 = arith.constant 0 : index
    %c0_24 = arith.constant 0 : index
    %c0_25 = arith.constant 0 : index
    %66 = vector.load %arg14[%c0_23, %c0_24, %c0_25] : memref<1x1x128xf32, #tpu.memory_space<vmem>>, vector<1x1x128xf32>
    %67 = vector.shape_cast %66 : vector<1x1x128xf32> to vector<1x128xf32>
    %68 = vector.broadcast %67 : vector<1x128xf32> to vector<32x128xf32>
    %69 = arith.mulf %65, %68 : vector<32x128xf32>
    %c0_26 = arith.constant 0 : index
    %c0_27 = arith.constant 0 : index
    %c0_28 = arith.constant 0 : index
    %70 = vector.load %arg18[%c0_26, %c0_27, %c0_28] : memref<1x1x128xf32, #tpu.memory_space<vmem>>, vector<1x1x128xf32>
    %71 = vector.shape_cast %70 : vector<1x1x128xf32> to vector<1x128xf32>
    %72 = vector.broadcast %71 : vector<1x128xf32> to vector<32x128xf32>
    %73 = arith.addf %69, %72 : vector<32x128xf32>
    %cst_29 = arith.constant 0.000000e+00 : f32
    %74 = vector.broadcast %cst_29 : f32 to vector<32x128xf32>
    %75 = arith.maximumf %73, %74 : vector<32x128xf32>
    %c0_30 = arith.constant 0 : index
    %c0_31 = arith.constant 0 : index
    %c0_32 = arith.constant 0 : index
    %76 = vector.load %arg10[%c0_30, %c0_31, %c0_32] : memref<1x128x384xf32, #tpu.memory_space<vmem>>, vector<1x128x384xf32>
    %77 = vector.shape_cast %76 : vector<1x128x384xf32> to vector<128x384xf32>
    %cst_33 = arith.constant dense<0.000000e+00> : vector<32x384xf32>
    %78 = tpu.matmul %75, %77, %cst_33 {dimension_numbers = #tpu.dot_dimension_numbers<[1], [0], [0], [1], [0, 0, 1, 1], [], []>} : vector<32x128xf32>, vector<128x384xf32>, vector<32x384xf32> -> vector<32x384xf32>
    %c0_34 = arith.constant 0 : index
    %c0_35 = arith.constant 0 : index
    %79 = vector.load %arg3[%c0_34, %c0_35] : memref<32x16xf32, #tpu.memory_space<vmem>>, vector<32x16xf32>
    %80 = vector.extract_strided_slice %78 {offsets = [0, 0], sizes = [16, 384], strides = [1, 1]} : vector<32x384xf32> to vector<16x384xf32>
    %cst_36 = arith.constant dense<0.000000e+00> : vector<32x384xf32>
    %81 = tpu.matmul %79, %80, %cst_36 {dimension_numbers = #tpu.dot_dimension_numbers<[1], [0], [0], [1], [0, 0, 1, 1], [], []>} : vector<32x16xf32>, vector<16x384xf32>, vector<32x384xf32> -> vector<32x384xf32>
    %82 = vector.extract_strided_slice %81 {offsets = [0, 0], sizes = [32, 128], strides = [1, 1]} : vector<32x384xf32> to vector<32x128xf32>
    %83 = vector.extract_strided_slice %81 {offsets = [0, 128], sizes = [32, 128], strides = [1, 1]} : vector<32x384xf32> to vector<32x128xf32>
    %84 = vector.extract_strided_slice %81 {offsets = [0, 256], sizes = [32, 128], strides = [1, 1]} : vector<32x384xf32> to vector<32x128xf32>
    %cst_37 = arith.constant 0.000000e+00 : f32
    %85 = vector.broadcast %cst_37 : f32 to vector<1x128xf32>
    %86 = vector.extract_strided_slice %82 {offsets = [0, 0], sizes = [31, 128], strides = [1, 1]} : vector<32x128xf32> to vector<31x128xf32>
    %87 = tpu.concatenate %85, %86 in 0 : vector<1x128xf32>, vector<31x128xf32> -> vector<32x128xf32>
    %88 = vector.extract_strided_slice %84 {offsets = [1, 0], sizes = [31, 128], strides = [1, 1]} : vector<32x128xf32> to vector<31x128xf32>
    %89 = tpu.concatenate %88, %85 in 0 : vector<31x128xf32>, vector<1x128xf32> -> vector<32x128xf32>
    %90 = arith.addf %87, %83 : vector<32x128xf32>
    %91 = arith.addf %90, %89 : vector<32x128xf32>
    %92 = vector.extract_strided_slice %78 {offsets = [16, 0], sizes = [16, 384], strides = [1, 1]} : vector<32x384xf32> to vector<16x384xf32>
    %cst_38 = arith.constant dense<0.000000e+00> : vector<32x384xf32>
    %93 = tpu.matmul %79, %92, %cst_38 {dimension_numbers = #tpu.dot_dimension_numbers<[1], [0], [0], [1], [0, 0, 1, 1], [], []>} : vector<32x16xf32>, vector<16x384xf32>, vector<32x384xf32> -> vector<32x384xf32>
    %94 = vector.extract_strided_slice %93 {offsets = [0, 0], sizes = [32, 128], strides = [1, 1]} : vector<32x384xf32> to vector<32x128xf32>
    %95 = vector.extract_strided_slice %93 {offsets = [0, 128], sizes = [32, 128], strides = [1, 1]} : vector<32x384xf32> to vector<32x128xf32>
    %96 = vector.extract_strided_slice %93 {offsets = [0, 256], sizes = [32, 128], strides = [1, 1]} : vector<32x384xf32> to vector<32x128xf32>
    %cst_39 = arith.constant 0.000000e+00 : f32
    %97 = vector.broadcast %cst_39 : f32 to vector<1x128xf32>
    %98 = vector.extract_strided_slice %94 {offsets = [0, 0], sizes = [31, 128], strides = [1, 1]} : vector<32x128xf32> to vector<31x128xf32>
    %99 = tpu.concatenate %97, %98 in 0 : vector<1x128xf32>, vector<31x128xf32> -> vector<32x128xf32>
    %100 = vector.extract_strided_slice %96 {offsets = [1, 0], sizes = [31, 128], strides = [1, 1]} : vector<32x128xf32> to vector<31x128xf32>
    %101 = tpu.concatenate %100, %97 in 0 : vector<31x128xf32>, vector<1x128xf32> -> vector<32x128xf32>
    %102 = arith.addf %99, %95 : vector<32x128xf32>
    %103 = arith.addf %102, %101 : vector<32x128xf32>
    %104 = tpu.concatenate %91, %103 in 0 : vector<32x128xf32>, vector<32x128xf32> -> vector<64x128xf32>
    %c0_40 = arith.constant 0 : index
    %c0_41 = arith.constant 0 : index
    %c0_42 = arith.constant 0 : index
    %105 = vector.load %arg15[%c0_40, %c0_41, %c0_42] : memref<1x1x128xf32, #tpu.memory_space<vmem>>, vector<1x1x128xf32>
    %106 = vector.shape_cast %105 : vector<1x1x128xf32> to vector<1x128xf32>
    %107 = vector.broadcast %106 : vector<1x128xf32> to vector<64x128xf32>
    %108 = arith.mulf %104, %107 : vector<64x128xf32>
    %c0_43 = arith.constant 0 : index
    %c0_44 = arith.constant 0 : index
    %c0_45 = arith.constant 0 : index
    %109 = vector.load %arg19[%c0_43, %c0_44, %c0_45] : memref<1x1x128xf32, #tpu.memory_space<vmem>>, vector<1x1x128xf32>
    %110 = vector.shape_cast %109 : vector<1x1x128xf32> to vector<1x128xf32>
    %111 = vector.broadcast %110 : vector<1x128xf32> to vector<64x128xf32>
    %112 = arith.addf %108, %111 : vector<64x128xf32>
    %cst_46 = arith.constant 0.000000e+00 : f32
    %113 = vector.broadcast %cst_46 : f32 to vector<64x128xf32>
    %114 = arith.maximumf %112, %113 : vector<64x128xf32>
    %c0_47 = arith.constant 0 : index
    %c0_48 = arith.constant 0 : index
    %c0_49 = arith.constant 0 : index
    %115 = vector.load %arg11[%c0_47, %c0_48, %c0_49] : memref<1x128x384xf32, #tpu.memory_space<vmem>>, vector<1x128x384xf32>
    %116 = vector.shape_cast %115 : vector<1x128x384xf32> to vector<128x384xf32>
    %cst_50 = arith.constant dense<0.000000e+00> : vector<64x384xf32>
    %117 = tpu.matmul %114, %116, %cst_50 {dimension_numbers = #tpu.dot_dimension_numbers<[1], [0], [0], [1], [0, 0, 1, 1], [], []>} : vector<64x128xf32>, vector<128x384xf32>, vector<64x384xf32> -> vector<64x384xf32>
    %c0_51 = arith.constant 0 : index
    %c0_52 = arith.constant 0 : index
    %118 = vector.load %arg4[%c0_51, %c0_52] : memref<64x32xf32, #tpu.memory_space<vmem>>, vector<64x32xf32>
    %119 = vector.extract_strided_slice %117 {offsets = [0, 0], sizes = [32, 384], strides = [1, 1]} : vector<64x384xf32> to vector<32x384xf32>
    %cst_53 = arith.constant dense<0.000000e+00> : vector<64x384xf32>
    %120 = tpu.matmul %118, %119, %cst_53 {dimension_numbers = #tpu.dot_dimension_numbers<[1], [0], [0], [1], [0, 0, 1, 1], [], []>} : vector<64x32xf32>, vector<32x384xf32>, vector<64x384xf32> -> vector<64x384xf32>
    %121 = vector.extract_strided_slice %120 {offsets = [0, 0], sizes = [64, 128], strides = [1, 1]} : vector<64x384xf32> to vector<64x128xf32>
    %122 = vector.extract_strided_slice %120 {offsets = [0, 128], sizes = [64, 128], strides = [1, 1]} : vector<64x384xf32> to vector<64x128xf32>
    %123 = vector.extract_strided_slice %120 {offsets = [0, 256], sizes = [64, 128], strides = [1, 1]} : vector<64x384xf32> to vector<64x128xf32>
    %cst_54 = arith.constant 0.000000e+00 : f32
    %124 = vector.broadcast %cst_54 : f32 to vector<1x128xf32>
    %125 = vector.extract_strided_slice %121 {offsets = [0, 0], sizes = [63, 128], strides = [1, 1]} : vector<64x128xf32> to vector<63x128xf32>
    %126 = tpu.concatenate %124, %125 in 0 : vector<1x128xf32>, vector<63x128xf32> -> vector<64x128xf32>
    %127 = vector.extract_strided_slice %123 {offsets = [1, 0], sizes = [63, 128], strides = [1, 1]} : vector<64x128xf32> to vector<63x128xf32>
    %128 = tpu.concatenate %127, %124 in 0 : vector<63x128xf32>, vector<1x128xf32> -> vector<64x128xf32>
    %129 = arith.addf %126, %122 : vector<64x128xf32>
    %130 = arith.addf %129, %128 : vector<64x128xf32>
    %131 = vector.extract_strided_slice %117 {offsets = [32, 0], sizes = [32, 384], strides = [1, 1]} : vector<64x384xf32> to vector<32x384xf32>
    %cst_55 = arith.constant dense<0.000000e+00> : vector<64x384xf32>
    %132 = tpu.matmul %118, %131, %cst_55 {dimension_numbers = #tpu.dot_dimension_numbers<[1], [0], [0], [1], [0, 0, 1, 1], [], []>} : vector<64x32xf32>, vector<32x384xf32>, vector<64x384xf32> -> vector<64x384xf32>
    %133 = vector.extract_strided_slice %132 {offsets = [0, 0], sizes = [64, 128], strides = [1, 1]} : vector<64x384xf32> to vector<64x128xf32>
    %134 = vector.extract_strided_slice %132 {offsets = [0, 128], sizes = [64, 128], strides = [1, 1]} : vector<64x384xf32> to vector<64x128xf32>
    %135 = vector.extract_strided_slice %132 {offsets = [0, 256], sizes = [64, 128], strides = [1, 1]} : vector<64x384xf32> to vector<64x128xf32>
    %cst_56 = arith.constant 0.000000e+00 : f32
    %136 = vector.broadcast %cst_56 : f32 to vector<1x128xf32>
    %137 = vector.extract_strided_slice %133 {offsets = [0, 0], sizes = [63, 128], strides = [1, 1]} : vector<64x128xf32> to vector<63x128xf32>
    %138 = tpu.concatenate %136, %137 in 0 : vector<1x128xf32>, vector<63x128xf32> -> vector<64x128xf32>
    %139 = vector.extract_strided_slice %135 {offsets = [1, 0], sizes = [63, 128], strides = [1, 1]} : vector<64x128xf32> to vector<63x128xf32>
    %140 = tpu.concatenate %139, %136 in 0 : vector<63x128xf32>, vector<1x128xf32> -> vector<64x128xf32>
    %141 = arith.addf %138, %134 : vector<64x128xf32>
    %142 = arith.addf %141, %140 : vector<64x128xf32>
    %143 = tpu.concatenate %130, %142 in 0 : vector<64x128xf32>, vector<64x128xf32> -> vector<128x128xf32>
    %c0_57 = arith.constant 0 : index
    %c0_58 = arith.constant 0 : index
    %c0_59 = arith.constant 0 : index
    %144 = vector.load %arg16[%c0_57, %c0_58, %c0_59] : memref<1x1x128xf32, #tpu.memory_space<vmem>>, vector<1x1x128xf32>
    %145 = vector.shape_cast %144 : vector<1x1x128xf32> to vector<1x128xf32>
    %146 = vector.broadcast %145 : vector<1x128xf32> to vector<128x128xf32>
    %147 = arith.mulf %143, %146 : vector<128x128xf32>
    %c0_60 = arith.constant 0 : index
    %c0_61 = arith.constant 0 : index
    %c0_62 = arith.constant 0 : index
    %148 = vector.load %arg20[%c0_60, %c0_61, %c0_62] : memref<1x1x128xf32, #tpu.memory_space<vmem>>, vector<1x1x128xf32>
    %149 = vector.shape_cast %148 : vector<1x1x128xf32> to vector<1x128xf32>
    %150 = vector.broadcast %149 : vector<1x128xf32> to vector<128x128xf32>
    %151 = arith.addf %147, %150 : vector<128x128xf32>
    %cst_63 = arith.constant 0.000000e+00 : f32
    %152 = vector.broadcast %cst_63 : f32 to vector<128x128xf32>
    %153 = arith.maximumf %151, %152 : vector<128x128xf32>
    %c0_64 = arith.constant 0 : index
    %c0_65 = arith.constant 0 : index
    %c0_66 = arith.constant 0 : index
    %154 = vector.load %arg12[%c0_64, %c0_65, %c0_66] : memref<1x128x128xf32, #tpu.memory_space<vmem>>, vector<1x128x128xf32>
    %155 = vector.shape_cast %154 : vector<1x128x128xf32> to vector<128x128xf32>
    %cst_67 = arith.constant dense<0.000000e+00> : vector<128x128xf32>
    %156 = tpu.matmul %153, %155, %cst_67 {dimension_numbers = #tpu.dot_dimension_numbers<[1], [0], [0], [1], [0, 0, 1, 1], [], []>} : vector<128x128xf32>, vector<128x128xf32>, vector<128x128xf32> -> vector<128x128xf32>
    %c0_68 = arith.constant 0 : index
    %c0_69 = arith.constant 0 : index
    %157 = vector.load %arg5[%c0_68, %c0_69] : memref<128x64xf32, #tpu.memory_space<vmem>>, vector<128x64xf32>
    %158 = vector.extract_strided_slice %156 {offsets = [0, 0], sizes = [64, 128], strides = [1, 1]} : vector<128x128xf32> to vector<64x128xf32>
    %cst_70 = arith.constant dense<0.000000e+00> : vector<128x128xf32>
    %159 = tpu.matmul %157, %158, %cst_70 {dimension_numbers = #tpu.dot_dimension_numbers<[1], [0], [0], [1], [0, 0, 1, 1], [], []>} : vector<128x64xf32>, vector<64x128xf32>, vector<128x128xf32> -> vector<128x128xf32>
    %160 = vector.extract_strided_slice %156 {offsets = [64, 0], sizes = [64, 128], strides = [1, 1]} : vector<128x128xf32> to vector<64x128xf32>
    %cst_71 = arith.constant dense<0.000000e+00> : vector<128x128xf32>
    %161 = tpu.matmul %157, %160, %cst_71 {dimension_numbers = #tpu.dot_dimension_numbers<[1], [0], [0], [1], [0, 0, 1, 1], [], []>} : vector<128x64xf32>, vector<64x128xf32>, vector<128x128xf32> -> vector<128x128xf32>
    %162 = tpu.concatenate %159, %161 in 0 : vector<128x128xf32>, vector<128x128xf32> -> vector<256x128xf32>
    %c0_72 = arith.constant 0 : index
    %c0_73 = arith.constant 0 : index
    %c0_74 = arith.constant 0 : index
    %163 = vector.load %arg21[%c0_72, %c0_73, %c0_74] : memref<1x1x1xf32, #tpu.memory_space<vmem>>, vector<1x1x1xf32>
    %164 = vector.shape_cast %163 : vector<1x1x1xf32> to vector<1x1xf32>
    %165 = vector.broadcast %164 : vector<1x1xf32> to vector<256x128xf32>
    %166 = arith.addf %162, %165 : vector<256x128xf32>
    %167 = vector.extract_strided_slice %166 {offsets = [0, 0], sizes = [128, 128], strides = [1, 1]} : vector<256x128xf32> to vector<128x128xf32>
    %cst_75 = arith.constant dense<0xFF800000> : vector<128xf32>
    %168 = vector.multi_reduction <maximumf>, %167, %cst_75 [1] : vector<128x128xf32> to vector<128xf32>
    %169 = vector.shape_cast %168 : vector<128xf32> to vector<128x1xf32>
    %cst_76 = arith.constant dense<0xFF800000> : vector<1xf32>
    %170 = vector.multi_reduction <maximumf>, %169, %cst_76 [0] : vector<128x1xf32> to vector<1xf32>
    %171 = vector.shape_cast %170 : vector<1xf32> to vector<1x1xf32>
    %172 = vector.shape_cast %171 : vector<1x1xf32> to vector<1x1xf32>
    %173 = vector.broadcast %172 : vector<1x1xf32> to vector<128x1xf32>
    %174 = vector.extract_strided_slice %166 {offsets = [128, 0], sizes = [128, 128], strides = [1, 1]} : vector<256x128xf32> to vector<128x128xf32>
    %cst_77 = arith.constant dense<0xFF800000> : vector<128xf32>
    %175 = vector.multi_reduction <maximumf>, %174, %cst_77 [1] : vector<128x128xf32> to vector<128xf32>
    %176 = vector.shape_cast %175 : vector<128xf32> to vector<128x1xf32>
    %cst_78 = arith.constant dense<0xFF800000> : vector<1xf32>
    %177 = vector.multi_reduction <maximumf>, %176, %cst_78 [0] : vector<128x1xf32> to vector<1xf32>
    %178 = vector.shape_cast %177 : vector<1xf32> to vector<1x1xf32>
    %179 = vector.shape_cast %178 : vector<1x1xf32> to vector<1x1xf32>
    %180 = vector.broadcast %179 : vector<1x1xf32> to vector<128x1xf32>
    %181 = tpu.concatenate %173, %180 in 0 : vector<128x1xf32>, vector<128x1xf32> -> vector<256x1xf32>
    %182 = vector.broadcast %181 : vector<256x1xf32> to vector<256x128xf32>
    %183 = arith.subf %166, %182 : vector<256x128xf32>
    %184 = math.exp %183 : vector<256x128xf32>
    %c0_79 = arith.constant 0 : index
    %c0_80 = arith.constant 0 : index
    %185 = vector.load %arg7[%c0_79, %c0_80] : memref<128x2xf32, #tpu.memory_space<vmem>>, vector<128x2xf32>
    %cst_81 = arith.constant dense<0.000000e+00> : vector<256x2xf32>
    %186 = tpu.matmul %184, %185, %cst_81 {dimension_numbers = #tpu.dot_dimension_numbers<[1], [0], [0], [1], [0, 0, 1, 1], [], []>} : vector<256x128xf32>, vector<128x2xf32>, vector<256x2xf32> -> vector<256x2xf32>
    %c0_82 = arith.constant 0 : index
    %c0_83 = arith.constant 0 : index
    %187 = vector.load %arg6[%c0_82, %c0_83] : memref<4x256xf32, #tpu.memory_space<vmem>>, vector<4x256xf32>
    %cst_84 = arith.constant dense<0.000000e+00> : vector<4x2xf32>
    %188 = tpu.matmul %187, %186, %cst_84 {dimension_numbers = #tpu.dot_dimension_numbers<[1], [0], [0], [1], [0, 0, 1, 1], [], []>} : vector<4x256xf32>, vector<256x2xf32>, vector<4x2xf32> -> vector<4x2xf32>
    %189 = vector.extract_strided_slice %188 {offsets = [0, 0], sizes = [2, 1], strides = [1, 1]} : vector<4x2xf32> to vector<2x1xf32>
    %190 = vector.extract_strided_slice %188 {offsets = [0, 1], sizes = [2, 1], strides = [1, 1]} : vector<4x2xf32> to vector<2x1xf32>
    %191 = arith.divf %190, %189 : vector<2x1xf32>
    %192 = vector.extract_strided_slice %188 {offsets = [2, 0], sizes = [2, 1], strides = [1, 1]} : vector<4x2xf32> to vector<2x1xf32>
    %193 = arith.divf %192, %189 : vector<2x1xf32>
    %194 = tpu.concatenate %191, %193 in 1 : vector<2x1xf32>, vector<2x1xf32> -> vector<2x2xf32>
    %c0_85 = arith.constant 0 : index
    %c0_86 = arith.constant 0 : index
    %c0_87 = arith.constant 0 : index
    %195 = vector.load %arg22[%c0_85, %c0_86, %c0_87] : memref<1x2x2xf32, #tpu.memory_space<vmem>>, vector<1x2x2xf32>
    %196 = vector.shape_cast %195 : vector<1x2x2xf32> to vector<2x2xf32>
    %197 = vector.shape_cast %194 : vector<2x2xf32> to vector<1x2x2xf32>
    tpu.vector_store %arg22[%c0_85, %c0_86, %c0_87], %197 {strides = array<i32>} : memref<1x2x2xf32, #tpu.memory_space<vmem>>, vector<1x2x2xf32>,
    return
  }
  func.func @transform_0(%arg0: i32) -> (i32, i32) {
    %c0_i32 = arith.constant 0 : i32
    %c0_i32_0 = arith.constant 0 : i32
    %c0_i32_1 = arith.constant 0 : i32
    return %c0_i32, %c0_i32_0 : i32, i32
  }
  func.func @transform_1(%arg0: i32) -> (i32, i32) {
    %c0_i32 = arith.constant 0 : i32
    %c0_i32_0 = arith.constant 0 : i32
    %c0_i32_1 = arith.constant 0 : i32
    return %c0_i32, %c0_i32_0 : i32, i32
  }
  func.func @transform_2(%arg0: i32) -> (i32, i32) {
    %c0_i32 = arith.constant 0 : i32
    %c0_i32_0 = arith.constant 0 : i32
    %c0_i32_1 = arith.constant 0 : i32
    return %c0_i32, %c0_i32_0 : i32, i32
  }
  func.func @transform_3(%arg0: i32) -> (i32, i32) {
    %c0_i32 = arith.constant 0 : i32
    %c0_i32_0 = arith.constant 0 : i32
    %c0_i32_1 = arith.constant 0 : i32
    return %c0_i32, %c0_i32_0 : i32, i32
  }
  func.func @transform_4(%arg0: i32) -> (i32, i32) {
    %c0_i32 = arith.constant 0 : i32
    %c0_i32_0 = arith.constant 0 : i32
    %c0_i32_1 = arith.constant 0 : i32
    return %c0_i32, %c0_i32_0 : i32, i32
  }
  func.func @transform_5(%arg0: i32) -> (i32, i32) {
    %c0_i32 = arith.constant 0 : i32
    %c0_i32_0 = arith.constant 0 : i32
    %c0_i32_1 = arith.constant 0 : i32
    return %c0_i32, %c0_i32_0 : i32, i32
  }
  func.func @transform_6(%arg0: i32) -> (i32, i32) {
    %c0_i32 = arith.constant 0 : i32
    %c0_i32_0 = arith.constant 0 : i32
    %c0_i32_1 = arith.constant 0 : i32
    return %c0_i32, %c0_i32_0 : i32, i32
  }
  func.func @transform_7(%arg0: i32) -> (i32, i32, i32) {
    %c0_i32 = arith.constant 0 : i32
    %c0_i32_0 = arith.constant 0 : i32
    %c0_i32_1 = arith.constant 0 : i32
    return %arg0, %c0_i32, %c0_i32_0 : i32, i32, i32
  }
  func.func @transform_8(%arg0: i32) -> (i32, i32, i32) {
    %c0_i32 = arith.constant 0 : i32
    %c0_i32_0 = arith.constant 0 : i32
    %c0_i32_1 = arith.constant 0 : i32
    return %arg0, %c0_i32, %c0_i32_0 : i32, i32, i32
  }
  func.func @transform_9(%arg0: i32) -> (i32, i32, i32) {
    %c0_i32 = arith.constant 0 : i32
    %c0_i32_0 = arith.constant 0 : i32
    %c0_i32_1 = arith.constant 0 : i32
    return %arg0, %c0_i32, %c0_i32_0 : i32, i32, i32
  }
  func.func @transform_10(%arg0: i32) -> (i32, i32, i32) {
    %c0_i32 = arith.constant 0 : i32
    %c0_i32_0 = arith.constant 0 : i32
    %c0_i32_1 = arith.constant 0 : i32
    return %arg0, %c0_i32, %c0_i32_0 : i32, i32, i32
  }
  func.func @transform_11(%arg0: i32) -> (i32, i32, i32) {
    %c0_i32 = arith.constant 0 : i32
    %c0_i32_0 = arith.constant 0 : i32
    %c0_i32_1 = arith.constant 0 : i32
    return %arg0, %c0_i32, %c0_i32_0 : i32, i32, i32
  }
  func.func @transform_12(%arg0: i32) -> (i32, i32, i32) {
    %c0_i32 = arith.constant 0 : i32
    %c0_i32_0 = arith.constant 0 : i32
    %c0_i32_1 = arith.constant 0 : i32
    return %arg0, %c0_i32, %c0_i32_0 : i32, i32, i32
  }
  func.func @transform_13(%arg0: i32) -> (i32, i32, i32) {
    %c0_i32 = arith.constant 0 : i32
    %c0_i32_0 = arith.constant 0 : i32
    %c0_i32_1 = arith.constant 0 : i32
    return %arg0, %c0_i32, %c0_i32_0 : i32, i32, i32
  }
  func.func @transform_14(%arg0: i32) -> (i32, i32, i32) {
    %c0_i32 = arith.constant 0 : i32
    %c0_i32_0 = arith.constant 0 : i32
    %c0_i32_1 = arith.constant 0 : i32
    return %arg0, %c0_i32, %c0_i32_0 : i32, i32, i32
  }
  func.func @transform_15(%arg0: i32) -> (i32, i32, i32) {
    %c0_i32 = arith.constant 0 : i32
    %c0_i32_0 = arith.constant 0 : i32
    %c0_i32_1 = arith.constant 0 : i32
    return %arg0, %c0_i32, %c0_i32_0 : i32, i32, i32
  }
  func.func @transform_16(%arg0: i32) -> (i32, i32, i32) {
    %c0_i32 = arith.constant 0 : i32
    %c0_i32_0 = arith.constant 0 : i32
    %c0_i32_1 = arith.constant 0 : i32
    return %arg0, %c0_i32, %c0_i32_0 : i32, i32, i32
  }
  func.func @transform_17(%arg0: i32) -> (i32, i32, i32) {
    %c0_i32 = arith.constant 0 : i32
    %c0_i32_0 = arith.constant 0 : i32
    %c0_i32_1 = arith.constant 0 : i32
    return %arg0, %c0_i32, %c0_i32_0 : i32, i32, i32
  }
  func.func @transform_18(%arg0: i32) -> (i32, i32, i32) {
    %c0_i32 = arith.constant 0 : i32
    %c0_i32_0 = arith.constant 0 : i32
    %c0_i32_1 = arith.constant 0 : i32
    return %arg0, %c0_i32, %c0_i32_0 : i32, i32, i32
  }
  func.func @transform_19(%arg0: i32) -> (i32, i32, i32) {
    %c0_i32 = arith.constant 0 : i32
    %c0_i32_0 = arith.constant 0 : i32
    %c0_i32_1 = arith.constant 0 : i32
    return %arg0, %c0_i32, %c0_i32_0 : i32, i32, i32
  }
  func.func @transform_20(%arg0: i32) -> (i32, i32, i32) {
    %c0_i32 = arith.constant 0 : i32
    %c0_i32_0 = arith.constant 0 : i32
    %c0_i32_1 = arith.constant 0 : i32
    return %arg0, %c0_i32, %c0_i32_0 : i32, i32, i32
  }
  func.func @transform_21(%arg0: i32) -> (i32, i32, i32) {
    %c0_i32 = arith.constant 0 : i32
    %c0_i32_0 = arith.constant 0 : i32
    %c0_i32_1 = arith.constant 0 : i32
    return %arg0, %c0_i32, %c0_i32_0 : i32, i32, i32
  }
}

</mosaic_0001>

<bundles_post_ra>
// kernel: forward.1
= control target key start
LH: loop header
LB: loop body
LE: loop exit
PB: predicated region body
PF: predicated region fallthrough
CT: control target
= control target key end

     0   :  { %s5633_s0 = inlined_call_operand.vmem [shape: f32[16,32], index: 0, kind: input, shape index: {}]   ;;  %s5634_s1 = inlined_call_operand.vmem [shape: f32[16,8], index: 1, kind: input, shape index: {}]   ;;  %s5635_s2 = inlined_call_operand.hbm [shape: f32[32,16], index: 2, kind: input, shape index: {}]   ;;  %s5636_s3 = inlined_call_operand.hbm [shape: f32[64,32], index: 3, kind: input, shape index: {}]   ;;  %s5637_s4 = inlined_call_operand.hbm [shape: f32[128,64], index: 4, kind: input, shape index: {}]   ;;  %s5638_s5 = inlined_call_operand.hbm [shape: f32[4,256], index: 5, kind: input, shape index: {}]   ;;  %s5639_s6 = inlined_call_operand.hbm [shape: f32[128,2], index: 6, kind: input, shape index: {}]   ;;  %s5640_s7 = inlined_call_operand.vmem [shape: f32[2,32,384], index: 7, kind: input, shape index: {}]   ;;  %s5641_s8 = inlined_call_operand.hbm [shape: f32[2,128,384], index: 8, kind: input, shape index: {}]   ;;  %s5642_s9 = inlined_call_operand.hbm [shape: f32[2,128,384], index: 9, kind: input, shape index: {}]   ;;  %s5643_s10 = inlined_call_operand.hbm [shape: f32[2,128,384], index: 10, kind: input, shape index: {}]   ;;  %s5644_s11 = inlined_call_operand.hbm [shape: f32[2,128,128], index: 11, kind: input, shape index: {}]   ;;  %s5645_s12 = inlined_call_operand.hbm [shape: f32[2,1,128], index: 12, kind: input, shape index: {}]   ;;  %s5646_s13 = inlined_call_operand.hbm [shape: f32[2,1,128], index: 13, kind: input, shape index: {}]   ;;  %s5647_s14 = inlined_call_operand.vmem [shape: f32[2,1,128], index: 14, kind: input, shape index: {}]   ;;  %s5648_s15 = inlined_call_operand.vmem [shape: f32[2,1,128], index: 15, kind: input, shape index: {}]   ;;  %s5649_s16 = inlined_call_operand.vmem [shape: f32[2,1,128], index: 16, kind: input, shape index: {}]   ;;  %s5650_s17 = inlined_call_operand.vmem [shape: f32[2,1,128], index: 17, kind: input, shape index: {}]   ;;  %s5651_s18 = inlined_call_operand.vmem [shape: f32[2,1,128], index: 18, kind: input, shape index: {}]   ;;  %s5652_s19 = inlined_call_operand.vmem [shape: f32[2,1,128], index: 19, kind: input, shape index: {}]   ;;  %s5653_s20 = inlined_call_operand.vmem [shape: f32[2,1,1], index: 20, kind: input, shape index: {}]   ;;  %s5654_s21 = inlined_call_operand.vmem [shape: f32[2,2,2], index: 21, kind: output, shape index: {}]  }
   0x1   :  { %5679 = sst [smem:[#allocation34_spill]] %s5633_s0 }
   0x2   :  { %5680 = sst [smem:[#allocation35_spill]] %s5634_s1 }
   0x3   :  { %5681 = sst [smem:[#allocation36_spill]] %s5635_s2 }
   0x4   :  { %5682 = sst [smem:[#allocation37_spill]] %s5636_s3 }
   0x5   :  { %5683 = sst [smem:[#allocation38_spill]] %s5637_s4 }
   0x6   :  { %5684 = sst [smem:[#allocation39_spill]] %s5638_s5 }
   0x7   :  { %5685 = sst [smem:[#allocation40_spill]] %s5640_s7 }
   0x8   :  { %5686 = sst [smem:[#allocation41_spill]] %s5641_s8 }
   0x9   :  { %5687 = sst [smem:[#allocation42_spill]] %s5643_s10 }
   0xa   :  { %5688 = sst [smem:[#allocation43_spill]] %s5647_s14 }
   0xb   :  { %5689 = sst [smem:[#allocation44_spill]] %s5648_s15 }
   0xc   :  { %5690 = sst [smem:[#allocation45_spill]] %s5649_s16 }
   0xd   :  { %5691 = sst [smem:[#allocation46_spill]] %s5650_s17 }
   0xe   :  { %5692 = sst [smem:[#allocation47_spill]] %s5651_s18 }
   0xf   :  { %5693 = sst [smem:[#allocation48_spill]] %s5652_s19 }
  0x10   :  { %5694 = sst [smem:[#allocation49_spill]] %s5653_s20 }
  0x11   :  { %5695 = sst [smem:[#allocation50_spill]] %s5654_s21 }
  0x12   :  { %26 = vsyncpa [#allocation3], 0 }
  0x13   :  { %27 = vsyncpa [#allocation5], 0 }
  0x14   :  { %28 = vsyncpa [#allocation8], 0 }
  0x15   :  { %29 = vsyncpa [#allocation11], 0 }
  0x16   :  { %31 = vsyncpa [#allocation11 + $0x1], 0 }
  0x17   :  { %32 = vsyncpa [#allocation14], 0 }
  0x18   :  { %34 = vsyncpa [#allocation14 + $0x1], 0 }
  0x19   :  { %35 = vsyncpa [#allocation17], 0 }
  0x1a   :  { %37 = vsyncpa [#allocation17 + $0x1], 0  ;;  %s4527_s2 = smov 0   ;;  %s4529_s25 = smov 0  }
  0x1b   :  { %s4531_s26 = smov 0   ;;  %s4533_s27 = smov 0  }
  0x1c LB: > { %5696 = sst [smem:[#allocation25_spill]] %s4395_s25  ;;  %s4546_s3 = sadd.s32 4294967295, %s4403_s27   ;;  %s4403_s27 = sphi %s4533_s27, %s5737_s27   ;;  %s4399_s26 = sphi %s4531_s26, %s5740_s26   ;;  %s4395_s25 = sphi %s4529_s25, %s5739_s25   ;;  %s4391_s2 = sphi %s4527_s2, %s5738_s2  }
  0x1d   : > { %5697 = sst [smem:[#allocation26_spill]] %s4399_s26  ;;  %p236_p0 = scmp.ne.s32.totalorder %s4395_s25, %s4391_s2 }
  0x1e   : > { %5698 = sst [smem:[#allocation27_spill]] %s4546_s3  ;;  %p237_p1 = scmp.eq.s32.totalorder %s4546_s3, 0 }
  0x1f   : > { %p3657_p2 = scmp.ge.s32.totalorder %s4403_s27, 1  ;;  %p585_p3 = scmp.lt.s32.totalorder %s4403_s27, 3 }
  0x20   : > { %p4554_p4 = por %p237_p1, %p236_p0  ;;  %s5703_s30 = sld [smem:[#allocation37_spill]] }
  0x21   : > { %p4558_p5 = pnand %p3657_p2, %p585_p3  ;;  %s4405_s22 = smov [#allocation4]  }
  0x22   : > { %s5699_s28 = scalar_select %p4554_p4, 1, 0 }
  0x23   : > { %s5701_s29 = scalar_select %p4558_p5, 1, 0 }
  0x24   : > { %5700 = sst [smem:[#allocation28_spill]] %s5699_s28  ;;  %p3850_p6 = pneg %p4558_p5 }
  0x25   : > { %5702 = sst [smem:[#allocation29_spill]] %s5701_s29  ;;  %s618_s23 = sshll.u32 %s4405_s22, 4  ;;  %s619_s23 = int_to_ptr.vmem [resolvable:$true] %s618_s23 }
  0x26   : > { %s616_s5 = sshll.u32 %s5703_s30, 4  ;;  %p4569_p7 = pnand %p3850_p6, %p237_p1  ;;  %s617_s5 = int_to_ptr.hbm [resolvable:$true] %s616_s5 }
  0x27   : > { %s5705_s0 = sld [smem:[#allocation39_spill]]  ;;  %s5660_s30 = smov 128  }
  0x28   : > { %s5662_s21 = smov 8   ;;  %s4408_s22 = smov [#allocation7]  }
  0x29   : > { %3856 = dma.hbm_to_vmem [thread:$0]  (!%p4569_p7), %s617_s5, 1024, %s619_s23, [#allocation5], %s5660_s30, %s5660_s30, %s5662_s21  }
  0x2a   : > { %s647_s20 = sshll.u32 %s4408_s22, 4  ;;  %s4584_s24 = sadd.s32 1, %s4403_s27   ;;  %s648_s20 = int_to_ptr.vmem [resolvable:$true] %s647_s20 }
  0x2b   : > { %5706 = sst [smem:[#allocation30_spill]] %s4584_s24  ;;  %s223_s2 = sadd.s32 1, %s4399_s26 }
  0x2c   : > { %p230_p8 = scmp.ne.s32.totalorder %s4399_s26, %s4395_s25  ;;  %p231_p10 = scmp.eq.s32.totalorder %s4403_s27, 0 }
  0x2d   : > { %s645_s4 = sshll.u32 %s5705_s0, 4  ;;  %s220_s0 = ssub.s32 %s4403_s27, %s4584_s24  ;;  %s646_s4 = int_to_ptr.hbm [resolvable:$true] %s645_s4 }
  0x2e   : > { %3862 = dma.hbm_to_vmem [thread:$0]  (!%p4569_p7), %s646_s4, 128, %s648_s20, [#allocation8]  }
  0x2f   : > { %p221_p9 = scmp.eq.s32.totalorder %s220_s0, 0  ;;  %p3890_p11 = scmp.lt.s32.totalorder %s4403_s27, 2 }
  0x30   : > { %s4594_s18 = sand.u32 1, %s4403_s27   ;;  %p232_p12 = por %p231_p10, %p230_p8 }
  0x31   : > { %s4597_s14 = scalar_select %p221_p9, %s4399_s26, %s223_s2  }
  0x32   : > { %s4600_s5 = sand.u32 1, %s4399_s26   ;;  %s4603_s23 = smul.u32 384, %s4403_s27 }
  0x33   : > { %5707 = sst [smem:[#allocation31_spill]] %s4597_s14  ;;  %s4606_s20 = smul.u32 384, %s4600_s5 }
  0x34   : > { %p4608_p13 = pnand %p3890_p11, %p232_p12  ;;  %s5709_s8 = sld [smem:[#allocation41_spill]] }
  0x35   : > { %s684_s21 = scalar_lea.vmem [#allocation10], %s4606_s20 }
  0x36   : > { %s692_s14 = sshll.u32 %s684_s21, 4  ;;  %p4620_p2 = pneg %p4608_p13  ;;  %s693_s14 = int_to_ptr.vmem [resolvable:$true] %s692_s14 }
  0x3a   : > { %s689_s2 = scalar_lea.hbm %s5709_s8, %s4603_s23 }
  0x3b   : > { %s690_s30 = sshll.u32 %s689_s2, 4  ;;  %s4086_s2 = scalar_lea.hbm %s5709_s8, 768  ;;  %s691_s30 = int_to_ptr.hbm [resolvable:$true] %s690_s30 }
  0x3c   : > { %s4079_s24 = sshra.s32 %s691_s30, 4  ;;  %s4080_s24 = int_to_ptr.hbm [resolvable:$true] %s4079_s24 }
  0x3d   : > { %s4081_s17 = scalar_lea.hbm %s4080_s24, 384  ;;  %p4087_p8 = scmp.lt.s32.totalorder %s4080_s24, %s5709_s8 }
  0x3e   : > { %p4082_p0 = scmp.ne.s32.totalorder %s4080_s24, %s4081_s17  ;;  %p4088_p9 = scmp.lt.s32.totalorder %s4086_s2, %s4081_s17 }
  0x40   : > { %p4084_p3 = pnand %p4620_p2, %p4082_p0  ;;  %p4089_p10 = por %p4088_p9, %p4087_p8 }
  0x42   : > { %p4085_p6 = pneg %p4084_p3 }
  0x44   : > { %p4090_p11 = pnand %p4089_p10, %p4085_p6 }
  0x46   : > { %4093 = shalt.err (!%p4090_p11)
}
  0x47   : > { %s4409_s26 = smov 384   ;;  %s4410_s15 = smov 24  }
  0x48   : > { %s5711_s22 = scalar_lea.sflag [#allocation11], %s4594_s18  ;;  %s5712_s10 = sld [smem:[#allocation42_spill]] }
  0x49   : > { %3869 = dma.hbm_to_vmem [thread:$0]  (!%p4608_p13), %s691_s30, 6144, %s693_s14, %s5711_s22, %s4409_s26, %s4409_s26, %s4410_s15  }
  0x4a   : > { %s728_s2 = scalar_lea.vmem [#allocation13], %s4606_s20  ;;  %s725_s8 = scalar_lea.sflag [#allocation14], %s4594_s18 }
  0x4b   : > { %s736_s21 = sshll.u32 %s728_s2, 4  ;;  %s737_s21 = int_to_ptr.vmem [resolvable:$true] %s736_s21 }
  0x4e   : > { %s733_s17 = scalar_lea.hbm %s5712_s10, %s4603_s23  ;;  %s4116_s14 = scalar_lea.hbm %s5712_s10, 768 }
  0x4f   : > { %s734_s0 = sshll.u32 %s733_s17, 4  ;;  %s735_s0 = int_to_ptr.hbm [resolvable:$true] %s734_s0 }
  0x50   : > { %s4109_s7 = sshra.s32 %s735_s0, 4  ;;  %s4110_s7 = int_to_ptr.hbm [resolvable:$true] %s4109_s7 }
  0x51   : > { %s4111_s28 = scalar_lea.hbm %s4110_s7, 384  ;;  %p4117_p6 = scmp.lt.s32.totalorder %s4110_s7, %s5712_s10 }
  0x52   : > { %p4112_p12 = scmp.ne.s32.totalorder %s4110_s7, %s4111_s28  ;;  %p4118_p8 = scmp.lt.s32.totalorder %s4116_s14, %s4111_s28 }
  0x54   : > { %p4114_p0 = pnand %p4112_p12, %p4620_p2  ;;  %p4119_p9 = por %p4118_p8, %p4117_p6 }
  0x56   : > { %p4115_p3 = pneg %p4114_p0 }
  0x58   : > { %p4120_p10 = pnand %p4119_p9, %p4115_p3 }
  0x5a   : > { %4123 = shalt.err (!%p4120_p10)
}
  0x5b   : > { %3875 = dma.hbm_to_vmem [thread:$0]  (!%p4608_p13), %s735_s0, 6144, %s737_s21, %s725_s8, %s4409_s26, %s4409_s26, %s4410_s15  }
  0x5c   : > { %s774_s7 = scalar_lea.hbm %s5645_s12, %s4403_s27  ;;  %s771_s28 = scalar_lea.vmem [#allocation16], %s4600_s5 }
  0x5d   : > { %s778_s19 = sshll.u32 %s771_s28, 4  ;;  %s776_s24 = sshll.u32 %s774_s7, 4  ;;  %s779_s19 = int_to_ptr.vmem [resolvable:$true] %s778_s19  ;;  %s777_s24 = int_to_ptr.hbm [resolvable:$true] %s776_s24 }
  0x5e   : > { %s5713_s14 = sld [smem:[#allocation36_spill]]  ;;  %s769_s22 = scalar_lea.sflag [#allocation17], %s4594_s18 }
  0x5f   : > { %s4139_s10 = sshra.s32 %s777_s24, 4  ;;  %s4146_s25 = scalar_lea.hbm %s5645_s12, 2  ;;  %s4140_s10 = int_to_ptr.hbm [resolvable:$true] %s4139_s10 }
  0x60   : > { %s4141_s29 = scalar_lea.hbm %s4140_s10, 1  ;;  %p4147_p3 = scmp.lt.s32.totalorder %s4140_s10, %s5645_s12 }
  0x61   : > { %p4142_p11 = scmp.ne.s32.totalorder %s4140_s10, %s4141_s29  ;;  %p4148_p6 = scmp.lt.s32.totalorder %s4146_s25, %s4141_s29 }
  0x63   : > { %p4144_p12 = pnand %p4142_p11, %p4620_p2  ;;  %p4149_p8 = por %p4148_p6, %p4147_p3 }
  0x64   : > { %s602_s30 = sshll.u32 %s5713_s14, 4  ;;  %s603_s30 = int_to_ptr.hbm [resolvable:$true] %s602_s30 }
  0x65   : > { %p4145_p0 = pneg %p4144_p12 }
  0x67   : > { %p4150_p9 = pnand %p4149_p8, %p4145_p0 }
  0x69   : > { %4153 = shalt.err (!%p4150_p9)
}
  0x6a   : > { %3881 = dma.hbm_to_vmem [thread:$0]  (!%p4608_p13), %s777_s24, 16, %s779_s19, %s769_s22  }
  0x6b   : > { %s4411_s28 = smov [#allocation2]   ;;  %s5714_s0 = sld [smem:[#allocation38_spill]] }
  0x6c   : > { %s604_s17 = sshll.u32 %s4411_s28, 4  ;;  %s5715_s29 = smov 8   ;;  %s605_s17 = int_to_ptr.vmem [resolvable:$true] %s604_s17 }
  0x6d   : > { %s5716_s21 = smov 128   ;;  %s656_s19 = sshll.u32 %s5639_s6, 4  ;;  %s657_s19 = int_to_ptr.hbm [resolvable:$true] %s656_s19 }
  0x6e   : > { %3853 = dma.hbm_to_vmem [thread:$0]  (!%p4569_p7), %s603_s30, 512, %s605_s17, [#allocation3], %s5716_s21, %s5716_s21, %s5715_s29  }
  0x6f   : > { %s4412_s24 = smov [#allocation6]   ;;  %s4413_s28 = smov [#allocation9]  }
  0x70   : > { %s632_s7 = sshll.u32 %s4412_s24, 4  ;;  %s658_s2 = sshll.u32 %s4413_s28, 4  ;;  %s633_s7 = int_to_ptr.vmem [resolvable:$true] %s632_s7  ;;  %s659_s2 = int_to_ptr.vmem [resolvable:$true] %s658_s2 }
  0x71   : > { %s630_s10 = sshll.u32 %s5714_s0, 4  ;;  %s711_s30 = scalar_lea.hbm %s5642_s9, %s4603_s23  ;;  %s631_s10 = int_to_ptr.hbm [resolvable:$true] %s630_s10 }
  0x72   : > { %3859 = dma.hbm_to_vmem [thread:$0]  (!%p4569_p7), %s631_s10, 2048, %s633_s7, [#allocation5], %s5716_s21, %s5716_s21, %s5715_s29  }
  0x73   : > { %3865 = dma.hbm_to_vmem [thread:$0]  (!%p4569_p7), %s657_s19, 2048, %s659_s2, [#allocation8], %s5716_s21, %s5716_s21, %s5715_s29  }
  0x74   : > { %s712_s17 = sshll.u32 %s711_s30, 4  ;;  %s706_s25 = scalar_lea.vmem [#allocation12], %s4606_s20  ;;  %s713_s17 = int_to_ptr.hbm [resolvable:$true] %s712_s17 }
  0x75   : > { %s714_s3 = sshll.u32 %s706_s25, 4  ;;  %s4259_s24 = sshra.s32 %s713_s17, 4  ;;  %s715_s3 = int_to_ptr.vmem [resolvable:$true] %s714_s3  ;;  %s4260_s24 = int_to_ptr.hbm [resolvable:$true] %s4259_s24 }
  0x76   : > { %s4261_s10 = scalar_lea.hbm %s4260_s24, 384  ;;  %s4266_s1 = scalar_lea.hbm %s5642_s9, 768 }
  0x77   : > { %p4262_p10 = scmp.ne.s32.totalorder %s4260_s24, %s4261_s10  ;;  %p4267_p7 = scmp.lt.s32.totalorder %s4260_s24, %s5642_s9 }
  0x78   : > { %p4268_p0 = scmp.lt.s32.totalorder %s4266_s1, %s4261_s10 }
  0x79   : > { %p4264_p11 = pnand %p4262_p10, %p4620_p2 }
  0x7a   : > { %p4269_p3 = por %p4268_p0, %p4267_p7 }
  0x7b   : > { %p4265_p12 = pneg %p4264_p11 }
  0x7d   : > { %p4270_p6 = pnand %p4269_p3, %p4265_p12 }
  0x7f   : > { %4273 = shalt.err (!%p4270_p6)
}
  0x80   : > { %s5717_s20 = scalar_lea.sflag [#allocation11], %s4594_s18  ;;  %s3667_s19 = sshll.u32 %s4600_s5, 7 }
  0x81   : > { %3872 = dma.hbm_to_vmem [thread:$0]  (!%p4608_p13), %s713_s17, 6144, %s715_s3, %s5717_s20, %s4409_s26, %s4409_s26, %s4410_s15  }
  0x82   : > { %s3803_s2 = sshll.u32 %s4403_s27, 7  ;;  %s750_s10 = scalar_lea.vmem [#allocation15], %s3667_s19 }
  0x83   : > { %s755_s25 = scalar_lea.hbm %s5644_s11, %s3803_s2  ;;  %s758_s7 = sshll.u32 %s750_s10, 4  ;;  %s759_s7 = int_to_ptr.vmem [resolvable:$true] %s758_s7 }
  0x84   : > { %s756_s24 = sshll.u32 %s755_s25, 4  ;;  %s4296_s26 = scalar_lea.hbm %s5644_s11, 256  ;;  %s757_s24 = int_to_ptr.hbm [resolvable:$true] %s756_s24 }
  0x85   : > { %s4289_s28 = sshra.s32 %s757_s24, 4  ;;  %s4290_s28 = int_to_ptr.hbm [resolvable:$true] %s4289_s28 }
  0x86   : > { %s4291_s1 = scalar_lea.hbm %s4290_s28, 128  ;;  %p4297_p11 = scmp.lt.s32.totalorder %s4290_s28, %s5644_s11 }
  0x87   : > { %p4292_p8 = scmp.ne.s32.totalorder %s4290_s28, %s4291_s1  ;;  %p4298_p12 = scmp.lt.s32.totalorder %s4296_s26, %s4291_s1 }
  0x89   : > { %p4294_p9 = pnand %p4292_p8, %p4620_p2  ;;  %p4299_p7 = por %p4298_p12, %p4297_p11 }
  0x8b   : > { %p4295_p10 = pneg %p4294_p9 }
  0x8d   : > { %p4300_p0 = pnand %p4299_p7, %p4295_p10 }
  0x8f   : > { %4303 = shalt.err (!%p4300_p0)
}
  0x90   : > { %3878 = dma.hbm_to_vmem [thread:$0]  (!%p4608_p13), %s757_s24, 2048, %s759_s7, %s725_s8, %s5716_s21, %s5716_s21, %s5715_s29  }
  0x91   : > { %s791_s19 = scalar_lea.hbm %s5646_s13, %s4403_s27  ;;  %s788_s0 = scalar_lea.vmem [#allocation18], %s4600_s5 }
  0x92   : > { %s793_s2 = sshll.u32 %s791_s19, 4  ;;  %s795_s30 = sshll.u32 %s788_s0, 4  ;;  %s794_s2 = int_to_ptr.hbm [resolvable:$true] %s793_s2  ;;  %s796_s30 = int_to_ptr.vmem [resolvable:$true] %s795_s30 }
  0x93   : > { %s4319_s25 = sshra.s32 %s794_s2, 4  ;;  %s4326_s8 = scalar_lea.hbm %s5646_s13, 2  ;;  %s4320_s25 = int_to_ptr.hbm [resolvable:$true] %s4319_s25 }
  0x94   : > { %s4321_s10 = scalar_lea.hbm %s4320_s25, 1  ;;  %p4327_p9 = scmp.lt.s32.totalorder %s4320_s25, %s5646_s13 }
  0x95   : > { %p4322_p3 = scmp.ne.s32.totalorder %s4320_s25, %s4321_s10  ;;  %p4328_p10 = scmp.lt.s32.totalorder %s4326_s8, %s4321_s10 }
  0x97   : > { %p4324_p6 = pnand %p4322_p3, %p4620_p2  ;;  %p4329_p11 = por %p4328_p10, %p4327_p9 }
  0x99   : > { %p4325_p8 = pneg %p4324_p6 }
  0x9b   : > { %p4330_p12 = pnand %p4329_p11, %p4325_p8 }
  0x9d   : > { %4333 = shalt.err (!%p4330_p12)
}
  0x9e   : > { %3884 = dma.hbm_to_vmem [thread:$0]  (!%p4608_p13), %s794_s2, 16, %s796_s30, %s769_s22  }
  0x9f   : > { %846 = sbr.rel (%p4558_p5) target bundleno = 2875 (0xb3b), region = 104 }
  0xa4   : > { %s5719_s27 = sld [smem:[#allocation27_spill]] }
  0xa5   : > { %4366 = dma.done.wait (%p237_p1), [#allocation3], 512  }
  0xa6   : > { %4368 = vsyncadd (%p237_p1), [#allocation3], 4294966784 }
  0xa7   : > { %4370 = dma.done.wait (%p237_p1), [#allocation5], 3072  }
  0xa8   : > { %4372 = vsyncadd (%p237_p1), [#allocation5], 4294964224 }
  0xa9   : > { %4374 = dma.done.wait (%p237_p1), [#allocation8], 2176  }
  0xaa   : > { %4376 = vsyncadd (%p237_p1), [#allocation8], 4294965120  ;;  %s5720_s18 = sld [smem:[#allocation25_spill]]  ;;  %s873_s4 = sand.u32 1, %s5719_s27  }
  0xab   : > { %s874_s7 = scalar_lea.sflag [#allocation11], %s873_s4 }
  0xb0   : > { %s4775_s22 = sand.u32 1, %s5720_s18  }
  0xb1   : > { %s3816_s24 = smul.u32 384, %s4775_s22 }
  0xb3   : > { %s4778_s23 = scalar_lea.vmem [#allocation10], %s3816_s24 }
  0xb4   : > { %4378 = dma.done.wait (%p4554_p4), %s874_s7, 12288  }
  0xb5   : > { %4380 = vsyncadd (%p4554_p4), %s874_s7, 4294955008  ;;  %s4784_s15 = scalar_lea.vmem [#allocation12], %s3816_s24  ;;  %s894_s26 = scalar_lea.sflag [#allocation14], %s873_s4 }
  0xb6   : > { %s4786_s17 = scalar_lea.vmem [#allocation13], %s3816_s24 }
  0xb7   : > { %4382 = dma.done.wait (%p4554_p4), %s894_s26, 8192  }
  0xb8   : > { %4384 = vsyncadd (%p4554_p4), %s894_s26, 4294959104  ;;  %s3676_s3 = sshll.u32 %s4775_s22, 7  ;;  %s914_s20 = scalar_lea.sflag [#allocation17], %s873_s4 }
  0xb9   : > { %s4793_s14 = scalar_lea.vmem [#allocation15], %s3676_s3  ;;  %s916_s19 = scalar_lea.vmem [#allocation16], %s4775_s22 }
  0xba   : > { %4386 = dma.done.wait (%p4554_p4), %s914_s20, 32  }
  0xbb   : > { %4388 = vsyncadd (%p4554_p4), %s914_s20, 4294967264  ;;  %p1033_p1 = scmp.lt.s32.totalorder %s5719_s27, 1  ;;  %s5722_s25 = sld [smem:[#allocation40_spill]]  ;;  %vm1077_vm0 = vcmask 261120   ;;  %v1234_v9 = vld [vmem:[%s4778_s23 + $0x168] sm:$0xff]  ;;  %v1236_v10 = vld [vmem:[%s4778_s23 + $0x178] sm:$0xff] }
  0xbc   : > { %s5723_s8 = sld [smem:[#allocation44_spill]]  ;;  %1237 = vmatpush.msra.mxu3 %v1234_v9  ;;  %v1231_v12 = vld [vmem:[%s4778_s23 + $0x150] sm:$0xff]  ;;  %1283 = vmatpush.msra.mxu1 %v1236_v10  ;;  %v1233_v15 = vld [vmem:[%s4778_s23 + $0x160] sm:$0xff]  ;;  %v1232_v17 = vld [vmem:[%s4778_s23 + $0x158] sm:$0xff]  ;;  %vm1161_vm1 = vcmask 1046528   ;;  %vm1156_vm2 = vcmask 1040384  }
  0xbd   : > { %s5742_s27 = smov (!%p1033_p1, %s5719_s27), 1  ;;  %s5724_s18 = sld [smem:[#allocation48_spill]]  ;;  %v1235_v14 = vld [vmem:[%s4778_s23 + $0x170] sm:$0xff]  ;;  %v1228_v20 = vld [vmem:[%s4778_s23 + $0x138] sm:$0xff]  ;;  %v1229_v21 = vld [vmem:[%s4778_s23 + $0x140] sm:$0xff]  ;;  %vm1308_vm3 = vcmask 64512  }
  0xbe   : > { %s3817_s2 = smul.u32 96, %s5742_s27  ;;  %s5725_s7 = sld [smem:[#allocation34_spill]]  ;;  %1238 = vmatpush.msra.mxu3 %v1231_v12  ;;  %1284 = vmatpush.msra.mxu1 %v1233_v15  ;;  %v1230_v22 = vld [vmem:[%s4778_s23 + $0x148] sm:$0xff]  ;;  %v1225_v23 = vld [vmem:[%s4778_s23 + $0x120] sm:$0xff]  ;;  %v1227_v25 = vld [vmem:[%s4778_s23 + $0x130] sm:$0xff]  ;;  %vm1652_vm4 = vcmask 130048  }
  0xbf   : > { %s5726_s0 = sld [smem:[#allocation45_spill]]  ;;  %v1226_v24 = vld [vmem:[%s4778_s23 + $0x128] sm:$0xff]  ;;  %v1223_v27 = vld [vmem:[%s4778_s23 + $0x110] sm:$0xff]  ;;  %v1224_v28 = vld [vmem:[%s4778_s23 + $0x118] sm:$0xff]  ;;  %s925_s3 = scalar_lea.vmem [#allocation18], %s4775_s22  ;;  %vm2713_vm5 = vcmask 523264  }
  0xc0   : > { %1239 = vmatpush.msra.mxu3 %v1228_v20  ;;  %1285 = vmatpush.msra.mxu1 %v1230_v22  ;;  %v1222_v26 = vld [vmem:[%s4778_s23 + $0x108] sm:$0xff]  ;;  %v1219_v29 = vld [vmem:[%s4778_s23 + $0xf0] sm:$0xff]  ;;  %v1220_v30 = vld [vmem:[%s4778_s23 + $0xf8] sm:$0xff]  ;;  %s5727_s28 = sld [smem:[#allocation35_spill]]  ;;  %vm3364_vm14 = vcmask 7168   ;;  %vm3366_vm15 = vcmask 9216  }
  0xc1   : > { %s4808_s10 = scalar_lea.vmem %s5722_s25, %s3817_s2  ;;  %v1221_v31 = vld [vmem:[%s4778_s23 + $0x100] sm:$0xff]  ;;  %v1216_v32 = vld [vmem:[%s4778_s23 + $0xd8] sm:$0xff]  ;;  %v1218_v34 = vld [vmem:[%s4778_s23 + $0xe8] sm:$0xff]  ;;  %s5728_s24 = sld [smem:[#allocation46_spill]] }
  0xc2   : > { %s1043_s29 = scalar_lea.vmem %s5723_s8, %s5742_s27  ;;  %v1074_v0 = vld [vmem:[%s4808_s10 + $0x48] sm:$0xff]  ;;  %v1071_v1 = vld [vmem:[%s4808_s10 + $0x30] sm:$0xff]  ;;  %v1068_v2 = vld [vmem:[%s4808_s10 + $0x18] sm:$0xff]  ;;  %1240 = vmatpush.msra.mxu3 %v1225_v23  ;;  %1286 = vmatpush.msra.mxu1 %v1227_v25  ;;  %s5731_s20 = sld [smem:[#allocation49_spill]] }
  0xc3   : > { %s1055_s5 = scalar_lea.vmem %s5724_s18, %s5742_s27  ;;  %1096 = vmatpush.msra.mxu0 %v1074_v0  ;;  %v1076_v3 = vld [vmem:[%s4808_s10 + $0x58] sm:$0xff]  ;;  %v1073_v4 = vld [vmem:[%s4808_s10 + $0x40] sm:$0xff]  ;;  %v1070_v7 = vld [vmem:[%s4808_s10 + $0x28] sm:$0xff]  ;;  %s4415_s25 = smov 1  }
  0xc4   : > { %v1065_v5 = vld [vmem:[%s4808_s10] sm:$0xff]  ;;  %1142 = vmatpush.msra.mxu2 %v1076_v3  ;;  %v1075_v8 = vld [vmem:[%s4808_s10 + $0x50] sm:$0xff]  ;;  %v1072_v13 = vld [vmem:[%s4808_s10 + $0x38] sm:$0xff]  ;;  %1241 = vmatpush.msra.mxu3 %v1222_v26  ;;  %s5736_s4 = sld [smem:[#allocation50_spill]] }
  0xc5   : > { %1097 = vmatpush.msra.mxu0 %v1071_v1  ;;  %v1063_v6 = vld [vmem:[%s5725_s7] sm:$0xff]  ;;  %v1067_v11 = vld [vmem:[%s4808_s10 + $0x10] sm:$0xff]  ;;  %v1066_v18 = vld [vmem:[%s4808_s10 + $0x8] sm:$0xff]  ;;  %s1046_s30 = scalar_lea.vmem %s5726_s0, %s5742_s27  ;;  %1287 = vmatpush.msra.mxu1 %v1224_v28 }
  0xc6   : > { %1143 = vmatpush.msra.mxu2 %v1073_v4  ;;  %v1069_v16 = vld [vmem:[%s4808_s10 + $0x20] sm:$0xff]  ;;  %v1064_v19 = vld [vmem:[%s5725_s7 + $0x8] sm:$0xff]  ;;  %1242 = vmatpush.msra.mxu3 %v1219_v29  ;;  %v1217_v33 = vld [vmem:[%s4778_s23 + $0xe0] sm:$0xff]  ;;  %s5730_s10 = sld [smem:[#allocation47_spill]] }
  0xc7   : > { %1098 = vmatpush.msra.mxu0 %v1068_v2  ;;  %1288 = vmatpush.msra.mxu1 %v1221_v31  ;;  %v1213_v35 = vld [vmem:[%s4778_s23 + $0xc0] sm:$0xff]  ;;  %v1214_v36 = vld [vmem:[%s4778_s23 + $0xc8] sm:$0xff]  ;;  %v1215_v37 = vld [vmem:[%s4778_s23 + $0xd0] sm:$0xff]  ;;  %s1049_s26 = scalar_lea.vmem %s5728_s24, %s5742_s27 }
  0xc8   : > { %1144 = vmatpush.msra.mxu2 %v1070_v7  ;;  %1243 = vmatpush.msra.mxu3 %v1216_v32  ;;  %v1210_v38 = vld [vmem:[%s4778_s23 + $0xa8] sm:$0xff]  ;;  %v1211_v39 = vld [vmem:[%s4778_s23 + $0xb0] sm:$0xff]  ;;  %v1212_v40 = vld [vmem:[%s4778_s23 + $0xb8] sm:$0xff]  ;;  %s1058_s22 = scalar_lea.vmem %s5731_s20, %s5742_s27 }
  0xc9   : > { %1099 = vmatpush.msra.mxu0 %v1065_v5  ;;  %1289 = vmatpush.msra.mxu1 %v1218_v34  ;;  %v1207_v41 = vld [vmem:[%s4778_s23 + $0x90] sm:$0xff]  ;;  %v1208_v42 = vld [vmem:[%s4778_s23 + $0x98] sm:$0xff]  ;;  %v1209_v43 = vld [vmem:[%s4778_s23 + $0xa0] sm:$0xff] }
  0xca   : > { %3679 = vmatmul.msk.f32.vlgmr.msra.gmra.mxu0 %vm1077_vm0, %v1063_v6  ;;  %1145 = vmatpush.msra.mxu2 %v1067_v11  ;;  %v1204_v44 = vld [vmem:[%s4778_s23 + $0x78] sm:$0xff]  ;;  %v1205_v45 = vld [vmem:[%s4778_s23 + $0x80] sm:$0xff]  ;;  %v1206_v46 = vld [vmem:[%s4778_s23 + $0x88] sm:$0xff] }
  0xcb   : > { %1119 = vmatpush.msrb.mxu0 %v1075_v8  ;;  %3683 = vmatmul.msk.f32.vlgmr.msra.gmra.mxu2 %vm1077_vm0, %v1063_v6  ;;  %v1201_v47 = vld [vmem:[%s4778_s23 + $0x60] sm:$0xff]  ;;  %v1202_v48 = vld [vmem:[%s4778_s23 + $0x68] sm:$0xff]  ;;  %v1203_v49 = vld [vmem:[%s4778_s23 + $0x70] sm:$0xff] }
  0xcc   : > { %1260 = vmatpush.msrb.mxu2 %v1235_v14  ;;  %1244 = vmatpush.msra.mxu3 %v1213_v35  ;;  %v1198_v50 = vld [vmem:[%s4778_s23 + $0x48] sm:$0xff]  ;;  %v1199_v51 = vld [vmem:[%s4778_s23 + $0x50] sm:$0xff]  ;;  %v1200_v52 = vld [vmem:[%s4778_s23 + $0x58] sm:$0xff]  ;;  %s1052_s1 = scalar_lea.vmem %s5730_s10, %s5742_s27 }
  0xcd   : > { %1120 = vmatpush.msrb.mxu0 %v1072_v13  ;;  %1290 = vmatpush.msra.mxu1 %v1215_v37  ;;  %v1195_v53 = vld [vmem:[%s4778_s23 + $0x30] sm:$0xff]  ;;  %v1196_v54 = vld [vmem:[%s4778_s23 + $0x38] sm:$0xff]  ;;  %v1197_v55 = vld [vmem:[%s4778_s23 + $0x40] sm:$0xff] }
  0xce   : > { %1261 = vmatpush.msrb.mxu2 %v1232_v17  ;;  %1245 = vmatpush.msra.mxu3 %v1210_v38  ;;  %v1192_v56 = vld [vmem:[%s4778_s23 + $0x18] sm:$0xff]  ;;  %v1193_v57 = vld [vmem:[%s4778_s23 + $0x20] sm:$0xff]  ;;  %v1194_v58 = vld [vmem:[%s4778_s23 + $0x28] sm:$0xff] }
  0xcf   : > { %1121 = vmatpush.msrb.mxu0 %v1069_v16  ;;  %1291 = vmatpush.msra.mxu1 %v1212_v40  ;;  %v1189_v59 = vld [vmem:[%s4778_s23] sm:$0xff]  ;;  %v1190_v60 = vld [vmem:[%s4778_s23 + $0x8] sm:$0xff]  ;;  %v1191_v61 = vld [vmem:[%s4778_s23 + $0x10] sm:$0xff] }
  0xd0   : > { %1262 = vmatpush.msrb.mxu2 %v1229_v21  ;;  %1246 = vmatpush.msra.mxu3 %v1207_v41  ;;  %v3944_v7 = vld [vmem:[%s916_s19] ss:$0 sm:$0xff]  ;;  %v1307_v28 = vld [vmem:[%s5727_s28 + $0x8] sm:$0xff]  ;;  %v1558_v32 = vld [vmem:[%s4784_s15 + $0x168] sm:$0xff]  ;;  %s4416_s19 = smov 127  }
  0xd1   : > { %1122 = vmatpush.msrb.mxu0 %v1066_v18  ;;  %1292 = vmatpush.msra.mxu1 %v1209_v43  ;;  %v3945_v10 = vld [vmem:[%s1046_s30] ss:$0 sm:$0xff]  ;;  %v1560_v34 = vld [vmem:[%s4784_s15 + $0x178] sm:$0xff]  ;;  %v1557_v37 = vld [vmem:[%s4784_s15 + $0x160] sm:$0xff]  ;;  %s5729_s30 = sld [smem:[#allocation43_spill]] }
  0xd2   : > { %3680 = vmatmul.msk.f32.gmra.mxu0 %vm1077_vm0, %v1064_v19  ;;  %1263 = vmatpush.msrb.mxu2 %v1226_v24  ;;  %v1306_v24 = vld [vmem:[%s5727_s28] sm:$0xff]  ;;  %v1552_v38 = vld [vmem:[%s4784_s15 + $0x138] sm:$0xff]  ;;  %v1554_v40 = vld [vmem:[%s4784_s15 + $0x148] sm:$0xff] }
  0xd3   : > { %3684 = vmatmul.msk.f32.gmra.mxu2 %vm1077_vm0, %v1064_v19  ;;  %1247 = vmatpush.msra.mxu3 %v1204_v44  ;;  %v1555_v35 = vld [vmem:[%s4784_s15 + $0x150] sm:$0xff]  ;;  %v1549_v41 = vld [vmem:[%s4784_s15 + $0x120] sm:$0xff]  ;;  %v1546_v44 = vld [vmem:[%s4784_s15 + $0x108] sm:$0xff] }
  0xd4   : > { %1264 = vmatpush.msrb.mxu2 %v1223_v27  ;;  %1293 = vmatpush.msra.mxu1 %v1206_v46  ;;  %v1551_v43 = vld [vmem:[%s4784_s15 + $0x130] sm:$0xff]  ;;  %v1548_v46 = vld [vmem:[%s4784_s15 + $0x118] sm:$0xff] }
  0xd5   : > { %1248 = vmatpush.msra.mxu3 %v1201_v47  ;;  %v1543_v47 = vld [vmem:[%s4784_s15 + $0xf0] sm:$0xff] }
  0xd6   : > { %1265 = vmatpush.msrb.mxu2 %v1220_v30  ;;  %1294 = vmatpush.msra.mxu1 %v1203_v49  ;;  %v1545_v49 = vld [vmem:[%s4784_s15 + $0x100] sm:$0xff] }
  0xd7   : > { %1249 = vmatpush.msra.mxu3 %v1198_v50  ;;  %v1540_v50 = vld [vmem:[%s4784_s15 + $0xd8] sm:$0xff]  ;;  %s1040_s23 = scalar_lea.vmem %s5729_s30, %s5742_s27 }
  0xd8   : > { %1266 = vmatpush.msrb.mxu2 %v1217_v33  ;;  %1295 = vmatpush.msra.mxu1 %v1200_v52  ;;  %v1559_v33 = vld [vmem:[%s4784_s15 + $0x170] sm:$0xff]  ;;  %v1542_v52 = vld [vmem:[%s4784_s15 + $0xe8] sm:$0xff] }
  0xd9   : > { %1250 = vmatpush.msra.mxu3 %v1195_v53  ;;  %v1537_v53 = vld [vmem:[%s4784_s15 + $0xc0] sm:$0xff] }
  0xda   : > { %3681 = vmatmul.msk.f32.vlgmr.msrb.gmra.mxu0 %vm1077_vm0, %v1063_v6  ;;  %1267 = vmatpush.msrb.mxu2 %v1214_v36  ;;  %v1556_v36 = vld [vmem:[%s4784_s15 + $0x158] sm:$0xff] }
  0xdb   : > { %1296 = vmatpush.msra.mxu1 %v1197_v55  ;;  %1251 = vmatpush.msra.mxu3 %v1192_v56  ;;  %v1539_v55 = vld [vmem:[%s4784_s15 + $0xd0] sm:$0xff]  ;;  %v1534_v56 = vld [vmem:[%s4784_s15 + $0xa8] sm:$0xff] }
  0xdc   : > { %1268 = vmatpush.msrb.mxu2 %v1211_v39  ;;  %v1553_v39 = vld [vmem:[%s4784_s15 + $0x140] sm:$0xff] }
  0xdd   : > { %1297 = vmatpush.msra.mxu1 %v1194_v58  ;;  %1252 = vmatpush.msra.mxu3 %v1189_v59  ;;  %v1536_v58 = vld [vmem:[%s4784_s15 + $0xb8] sm:$0xff]  ;;  %v1531_v59 = vld [vmem:[%s4784_s15 + $0x90] sm:$0xff] }
  0xde   : > { %1269 = vmatpush.msrb.mxu2 %v1208_v42  ;;  %v1550_v42 = vld [vmem:[%s4784_s15 + $0x128] sm:$0xff] }
  0xdf   : > { %1298 = vmatpush.msra.mxu1 %v1191_v61  ;;  %v1533_v61 = vld [vmem:[%s4784_s15 + $0xa0] sm:$0xff] }
  0xe0   : > { %1270 = vmatpush.msrb.mxu2 %v1205_v45  ;;  %v1547_v45 = vld [vmem:[%s4784_s15 + $0x110] sm:$0xff] }
  0xe2   : > { %3682 = vmatmul.msk.f32.gmra.mxu0 %vm1077_vm0, %v1064_v19  ;;  %1271 = vmatpush.msrb.mxu2 %v1202_v48  ;;  %v1544_v48 = vld [vmem:[%s4784_s15 + $0xf8] sm:$0xff] }
  0xe4   : > { %1272 = vmatpush.msrb.mxu2 %v1199_v51  ;;  %v1541_v51 = vld [vmem:[%s4784_s15 + $0xe0] sm:$0xff] }
  0xe6   : > { %1273 = vmatpush.msrb.mxu2 %v1196_v54  ;;  %v1538_v54 = vld [vmem:[%s4784_s15 + $0xc8] sm:$0xff] }
  0xe8   : > { %1274 = vmatpush.msrb.mxu2 %v1193_v57  ;;  %v1535_v57 = vld [vmem:[%s4784_s15 + $0xb0] sm:$0xff] }
  0xea   : > { %1275 = vmatpush.msrb.mxu2 %v1190_v60  ;;  %v1532_v60 = vld [vmem:[%s4784_s15 + $0x98] sm:$0xff] }
 0x147   : > { %v1101_v62 = vpop.f32.mrf.mxu0 }
 0x148   : > { %v1154_v1 = vrot.slane %v1101_v62, 7  ;;  %v1528_v62 = vld [vmem:[%s4784_s15 + $0x78] sm:$0xff] }
 0x14a   : > { %v1157_v5 = vsel %vm1156_vm2, 0.0, %v1154_v1  ;;  %v1525_v1 = vld [vmem:[%s4784_s15 + $0x60] sm:$0xff] }
 0x14e   : > { %v1147_v0 = vpop.f32.mrf.mxu2 }
 0x14f   : > { %v1104_v63 = vpop.f32.mrf.mxu0  ;;  %v1159_v2 = vrot.slane %v1147_v0, 1  ;;  %v1530_v0 = vld [vmem:[%s4784_s15 + $0x88] sm:$0xff] }
 0x150   : > { %v1166_v11 = vrot.slane %v1104_v63, 7  ;;  %v1529_v63 = vld [vmem:[%s4784_s15 + $0x80] sm:$0xff] }
 0x151   : > { %v1162_v3 = vsel %vm1161_vm1, %v1159_v2, 0.0  ;;  %v1526_v2 = vld [vmem:[%s4784_s15 + $0x68] sm:$0xff] }
 0x152   : > { %v1168_v17 = vsel %vm1156_vm2, 0.0, %v1166_v11  ;;  %v1517_v11 = vld [vmem:[%s4784_s15 + $0x20] sm:$0xff] }
 0x156   : > { %v1150_v8 = vpop.f32.mrf.mxu2 }
 0x157   : > { %v1124_v4 = vpop.f32.mrf.mxu0  ;;  %v1170_v12 = vrot.slane %v1150_v8, 1  ;;  %v1520_v8 = vld [vmem:[%s4784_s15 + $0x38] sm:$0xff] }
 0x158   : > { %v1163_v6 = vadd.f32 %v1157_v5, %v1124_v4  ;;  %v1522_v4 = vld [vmem:[%s4784_s15 + $0x48] sm:$0xff]  ;;  %v1523_v5 = vld [vmem:[%s4784_s15 + $0x50] sm:$0xff] }
 0x159   : > { %v1172_v15 = vsel %vm1161_vm1, %v1170_v12, 0.0  ;;  %v1518_v12 = vld [vmem:[%s4784_s15 + $0x28] sm:$0xff] }
 0x15a   : > { %v1164_v9 = vadd.f32 %v1163_v6, %v1162_v3  ;;  %v1527_v3 = vld [vmem:[%s4784_s15 + $0x70] sm:$0xff]  ;;  %v1524_v6 = vld [vmem:[%s4784_s15 + $0x58] sm:$0xff] }
 0x15c   : > { %v1179_v13 = vmul.f32 %v3944_v7, %v1164_v9  ;;  %v1521_v9 = vld [vmem:[%s4784_s15 + $0x40] sm:$0xff] }
 0x15e   : > { %v1185_v14 = vadd.f32 %v3945_v10, %v1179_v13  ;;  %v1513_v13 = vld [vmem:[%s4784_s15] sm:$0xff] }
 0x15f   : > { %v1127_v16 = vpop.f32.mrf.mxu0 }
 0x160   : > { %v1173_v18 = vadd.f32 %v1168_v17, %v1127_v16  ;;  %v1187_v19 = vmax.f32 %v1185_v14, 0.0  ;;  %v1514_v14 = vld [vmem:[%s4784_s15 + $0x8] sm:$0xff] }
 0x162   : > { %v1174_v20 = vadd.f32 %v1173_v18, %v1172_v15  ;;  %1253 = vmatmul.f32.vlgmr.msra.gmra.mxu3 %v1187_v19  ;;  %1276 = vmatmul.f32.vlgmr.msrb.gmra.mxu2 %v1187_v19  ;;  %v1515_v15 = vld [vmem:[%s4784_s15 + $0x10] sm:$0xff] }
 0x163   : > { %1299 = vmatmul.f32.vlgmr.msra.gmra.mxu1 %v1187_v19 }
 0x164   : > { %v1180_v21 = vmul.f32 %v3944_v7, %v1174_v20  ;;  %v1519_v7 = vld [vmem:[%s4784_s15 + $0x30] sm:$0xff] }
 0x166   : > { %v1186_v22 = vadd.f32 %v3945_v10, %v1180_v21  ;;  %v1516_v10 = vld [vmem:[%s4784_s15 + $0x18] sm:$0xff] }
 0x168   : > { %v1188_v23 = vmax.f32 %v1186_v22, 0.0 }
 0x16a   : > { %1256 = vmatmul.f32.gmra.mxu3 %v1188_v23  ;;  %1279 = vmatmul.f32.gmra.mxu2 %v1188_v23 }
 0x16b   : > { %1302 = vmatmul.f32.gmra.mxu1 %v1188_v23 }
 0x1e0   : > { %v1300_v25 = vpop.f32.mrf.mxu1 }
 0x1e1   : > { %1376 = vmatpush.msrb.mxu3 %v1300_v25 }
 0x1e2   : > { %3689 = vmatmul.msk.f32.vlgmr.msrb.gmra.mxu3 %vm1308_vm3, %v1306_v24 }
 0x1e3   : > { %1561 = vmatpush.msra.mxu3 %v1558_v32 }
 0x1e5   : > { %v1254_v26 = vpop.f32.mrf.mxu3  ;;  %v1277_v27 = vpop.f32.mrf.mxu2  ;;  %1562 = vmatpush.msra.mxu3 %v1555_v35 }
 0x1e6   : > { %1330 = vmatpush.msra.mxu2 %v1254_v26  ;;  %v3946_v26 = vld [vmem:[%s925_s3] ss:$0 sm:$0xff] }
 0x1e7   : > { %3685 = vmatmul.msk.f32.vlgmr.msra.gmra.mxu2 %vm1308_vm3, %v1306_v24  ;;  %1563 = vmatpush.msra.mxu3 %v1552_v38 }
 0x1e8   : > { %v1303_v29 = vpop.f32.mrf.mxu1  ;;  %1353 = vmatpush.msrb.mxu2 %v1277_v27 }
 0x1e9   : > { %1564 = vmatpush.msra.mxu3 %v1549_v41 }
 0x1ea   : > { %1465 = vmatpush.msra.mxu2 %v1303_v29  ;;  %3690 = vmatmul.msk.f32.gmra.mxu3 %vm1308_vm3, %v1307_v28  ;;  %v3947_v29 = vld [vmem:[%s1049_s26] ss:$0 sm:$0xff] }
 0x1eb   : > { %1565 = vmatpush.msra.mxu3 %v1546_v44 }
 0x1ed   : > { %v1257_v30 = vpop.f32.mrf.mxu3  ;;  %v1280_v31 = vpop.f32.mrf.mxu2  ;;  %1566 = vmatpush.msra.mxu3 %v1543_v47 }
 0x1ee   : > { %1419 = vmatpush.msra.mxu0 %v1257_v30  ;;  %1442 = vmatpush.msrb.mxu1 %v1280_v31 }
 0x1ef   : > { %3686 = vmatmul.msk.f32.gmra.mxu2 %vm1308_vm3, %v1307_v28  ;;  %3691 = vmatmul.msk.f32.vlgmr.msra.gmra.mxu0 %vm1308_vm3, %v1306_v24 }
 0x1f0   : > { %3693 = vmatmul.msk.f32.vlgmr.msrb.gmra.mxu1 %vm1308_vm3, %v1306_v24  ;;  %1590 = vmatpush.msrb.mxu0 %v1559_v33 }
 0x1f1   : > { %1619 = vmatpush.msra.mxu1 %v1560_v34  ;;  %1567 = vmatpush.msra.mxu3 %v1540_v50 }
 0x1f2   : > { %1591 = vmatpush.msrb.mxu0 %v1556_v36 }
 0x1f3   : > { %1620 = vmatpush.msra.mxu1 %v1557_v37  ;;  %1568 = vmatpush.msra.mxu3 %v1537_v53 }
 0x1f4   : > { %1592 = vmatpush.msrb.mxu0 %v1553_v39 }
 0x1f5   : > { %1621 = vmatpush.msra.mxu1 %v1554_v40  ;;  %1569 = vmatpush.msra.mxu3 %v1534_v56 }
 0x1f6   : > { %1593 = vmatpush.msrb.mxu0 %v1550_v42 }
 0x1f7   : > { %3687 = vmatmul.msk.f32.vlgmr.msrb.gmra.mxu2 %vm1308_vm3, %v1306_v24  ;;  %3692 = vmatmul.msk.f32.gmra.mxu0 %vm1308_vm3, %v1307_v28 }
 0x1f8   : > { %3694 = vmatmul.msk.f32.gmra.mxu1 %vm1308_vm3, %v1307_v28  ;;  %1594 = vmatpush.msrb.mxu0 %v1547_v45 }
 0x1f9   : > { %1622 = vmatpush.msra.mxu1 %v1551_v43  ;;  %1570 = vmatpush.msra.mxu3 %v1531_v59 }
 0x1fa   : > { %1595 = vmatpush.msrb.mxu0 %v1544_v48 }
 0x1fb   : > { %1623 = vmatpush.msra.mxu1 %v1548_v46  ;;  %1571 = vmatpush.msra.mxu3 %v1528_v62 }
 0x1fc   : > { %1596 = vmatpush.msrb.mxu0 %v1541_v51 }
 0x1fd   : > { %1624 = vmatpush.msra.mxu1 %v1545_v49  ;;  %1572 = vmatpush.msra.mxu3 %v1525_v1 }
 0x1fe   : > { %1597 = vmatpush.msrb.mxu0 %v1538_v54 }
 0x1ff   : > { %3688 = vmatmul.msk.f32.gmra.mxu2 %vm1308_vm3, %v1307_v28  ;;  %1625 = vmatpush.msra.mxu1 %v1542_v52 }
 0x200   : > { %1598 = vmatpush.msrb.mxu0 %v1535_v57  ;;  %1573 = vmatpush.msra.mxu3 %v1522_v4 }
 0x201   : > { %1626 = vmatpush.msra.mxu1 %v1539_v55 }
 0x202   : > { %1599 = vmatpush.msrb.mxu0 %v1532_v60  ;;  %1574 = vmatpush.msra.mxu3 %v1519_v7 }
 0x203   : > { %1627 = vmatpush.msra.mxu1 %v1536_v58 }
 0x204   : > { %1600 = vmatpush.msrb.mxu0 %v1529_v63  ;;  %1575 = vmatpush.msra.mxu3 %v1516_v10  ;;  %v1650_v10 = vld [vmem:[#allocation2 + $0x10] sm:$0xff] }
 0x205   : > { %1628 = vmatpush.msra.mxu1 %v1533_v61 }
 0x206   : > { %1601 = vmatpush.msrb.mxu0 %v1526_v2  ;;  %1576 = vmatpush.msra.mxu3 %v1513_v13 }
 0x207   : > { %3695 = vmatmul.msk.f32.vlgmr.msra.gmra.mxu2 %vm1308_vm3, %v1306_v24  ;;  %1629 = vmatpush.msra.mxu1 %v1530_v0 }
 0x208   : > { %1602 = vmatpush.msrb.mxu0 %v1523_v5 }
 0x209   : > { %1630 = vmatpush.msra.mxu1 %v1527_v3 }
 0x20a   : > { %1603 = vmatpush.msrb.mxu0 %v1520_v8  ;;  %v1648_v8 = vld [vmem:[#allocation2] sm:$0xff] }
 0x20b   : > { %1631 = vmatpush.msra.mxu1 %v1524_v6  ;;  %v1649_v6 = vld [vmem:[#allocation2 + $0x8] sm:$0xff] }
 0x20c   : > { %1604 = vmatpush.msrb.mxu0 %v1517_v11  ;;  %v1651_v11 = vld [vmem:[#allocation2 + $0x18] sm:$0xff] }
 0x20d   : > { %1632 = vmatpush.msra.mxu1 %v1521_v9 }
 0x20e   : > { %1605 = vmatpush.msrb.mxu0 %v1514_v14 }
 0x20f   : > { %3696 = vmatmul.msk.f32.gmra.mxu2 %vm1308_vm3, %v1307_v28  ;;  %1633 = vmatpush.msra.mxu1 %v1518_v12 }
 0x211   : > { %1634 = vmatpush.msra.mxu1 %v1515_v15 }
 0x265   : > { %v1378_v17 = vpop.f32.mrf.mxu3 }
 0x266   : > { %v1394_v21 = vrot.slane %v1378_v17, 1 }
 0x26a   : > { %v1332_v16 = vpop.f32.mrf.mxu2 }
 0x26b   : > { %v1386_v20 = vrot.slane %v1332_v16, 7 }
 0x26c   : > { %v1421_v31 = vpop.f32.mrf.mxu0 }
 0x26d   : > { %v1381_v19 = vpop.f32.mrf.mxu3  ;;  %v1391_v24 = vsel %vm1156_vm2, 0.0, %v1386_v20  ;;  %v1444_v40 = vpop.f32.mrf.mxu1  ;;  %v1475_v46 = vrot.slane %v1421_v31, 7  ;;  %v1981_v31 = vld [vmem:[%s4786_s17 + $0xf0] sm:$0xff] }
 0x26e   : > { %v1395_v22 = vrot.slane %v1381_v19, 1 }
 0x26f   : > { %v1480_v48 = vsel %vm1156_vm2, 0.0, %v1475_v46 }
 0x270   : > { %v1396_v27 = vsel %vm1161_vm1, %v1394_v21, %v1395_v22  ;;  %v1399_v38 = vsel %vm1161_vm1, %v1395_v22, 0.0  ;;  %v1489_v53 = vadd.f32 %v1480_v48, %v1444_v40  ;;  %v1998_v21 = vld [vmem:[%s4786_s17 + $0x178] sm:$0xff]  ;;  %v1993_v22 = vld [vmem:[%s4786_s17 + $0x150] sm:$0xff] }
 0x271   : > { %v1969_v40 = vld [vmem:[%s4786_s17 + $0x90] sm:$0xff]  ;;  %v1962_v48 = vld [vmem:[%s4786_s17 + $0x58] sm:$0xff] }
 0x272   : > { %v1335_v18 = vpop.f32.mrf.mxu2 }
 0x273   : > { %v1387_v30 = vrot.slane %v1335_v18, 7 }
 0x274   : > { %v1424_v42 = vpop.f32.mrf.mxu0 }
 0x275   : > { %v1388_v35 = vsel %vm1156_vm2, %v1386_v20, %v1387_v30  ;;  %v1476_v47 = vrot.slane %v1424_v42, 7  ;;  %v1447_v49 = vpop.f32.mrf.mxu1  ;;  %v1996_v20 = vld [vmem:[%s4786_s17 + $0x168] sm:$0xff]  ;;  %v1986_v30 = vld [vmem:[%s4786_s17 + $0x118] sm:$0xff] }
 0x277   : > { %v1477_v50 = vsel %vm1156_vm2, %v1475_v46, %v1476_v47  ;;  %v1965_v46 = vld [vmem:[%s4786_s17 + $0x70] sm:$0xff]  ;;  %v1960_v47 = vld [vmem:[%s4786_s17 + $0x48] sm:$0xff] }
 0x278   : > { %v1490_v54 = vadd.f32 %v1477_v50, %v1447_v49  ;;  %v1957_v49 = vld [vmem:[%s4786_s17 + $0x30] sm:$0xff]  ;;  %v1959_v50 = vld [vmem:[%s4786_s17 + $0x40] sm:$0xff] }
 0x27a   : > { %v1355_v23 = vpop.f32.mrf.mxu2 }
 0x27b   : > { %v1400_v25 = vadd.f32 %v1391_v24, %v1355_v23  ;;  %v1995_v23 = vld [vmem:[%s4786_s17 + $0x160] sm:$0xff] }
 0x27d   : > { %v1402_v28 = vadd.f32 %v1400_v25, %v1396_v27  ;;  %v1990_v25 = vld [vmem:[%s4786_s17 + $0x138] sm:$0xff]  ;;  %v1987_v27 = vld [vmem:[%s4786_s17 + $0x120] sm:$0xff] }
 0x27f   : > { %v1497_v32 = vmul.f32 %v3946_v26, %v1402_v28  ;;  %v1989_v28 = vld [vmem:[%s4786_s17 + $0x130] sm:$0xff] }
 0x281   : > { %v1505_v33 = vadd.f32 %v3947_v29, %v1497_v32  ;;  %v1983_v32 = vld [vmem:[%s4786_s17 + $0x100] sm:$0xff] }
 0x282   : > { %v1358_v34 = vpop.f32.mrf.mxu2 }
 0x283   : > { %v1401_v36 = vadd.f32 %v1388_v35, %v1358_v34  ;;  %v1509_v37 = vmax.f32 %v1505_v33, 0.0  ;;  %v1978_v34 = vld [vmem:[%s4786_s17 + $0xd8] sm:$0xff]  ;;  %v1980_v35 = vld [vmem:[%s4786_s17 + $0xe8] sm:$0xff] }
 0x285   : > { %v1403_v39 = vadd.f32 %v1401_v36, %v1399_v38  ;;  %1577 = vmatmul.f32.vlgmr.msra.gmra.mxu3 %v1509_v37  ;;  %1606 = vmatmul.f32.vlgmr.msrb.gmra.mxu0 %v1509_v37  ;;  %v1975_v36 = vld [vmem:[%s4786_s17 + $0xc0] sm:$0xff]  ;;  %v1972_v38 = vld [vmem:[%s4786_s17 + $0xa8] sm:$0xff] }
 0x286   : > { %1635 = vmatmul.f32.vlgmr.msra.gmra.mxu1 %v1509_v37  ;;  %v1977_v37 = vld [vmem:[%s4786_s17 + $0xd0] sm:$0xff] }
 0x287   : > { %v1498_v41 = vmul.f32 %v3946_v26, %v1403_v39  ;;  %v1974_v39 = vld [vmem:[%s4786_s17 + $0xb8] sm:$0xff] }
 0x289   : > { %v1506_v43 = vadd.f32 %v3947_v29, %v1498_v41  ;;  %v1971_v41 = vld [vmem:[%s4786_s17 + $0xa0] sm:$0xff] }
 0x28a   : > { %v1467_v44 = vpop.f32.mrf.mxu2 }
 0x28b   : > { %v1510_v45 = vmax.f32 %v1506_v43, 0.0  ;;  %v1483_v51 = vrot.slane %v1467_v44, 1  ;;  %v1966_v43 = vld [vmem:[%s4786_s17 + $0x78] sm:$0xff]  ;;  %v1968_v44 = vld [vmem:[%s4786_s17 + $0x88] sm:$0xff] }
 0x28d   : > { %1580 = vmatmul.f32.gmra.mxu3 %v1510_v45  ;;  %1609 = vmatmul.f32.gmra.mxu0 %v1510_v45 }
 0x28e   : > { %1638 = vmatmul.f32.gmra.mxu1 %v1510_v45  ;;  %v1963_v45 = vld [vmem:[%s4786_s17 + $0x60] sm:$0xff] }
 0x292   : > { %v1470_v52 = vpop.f32.mrf.mxu2 }
 0x293   : > { %v1484_v55 = vrot.slane %v1470_v52, 1  ;;  %v1956_v52 = vld [vmem:[%s4786_s17 + $0x28] sm:$0xff] }
 0x295   : > { %v1488_v56 = vsel %vm1161_vm1, %v1484_v55, 0.0  ;;  %v1485_v57 = vsel %vm1161_vm1, %v1483_v51, %v1484_v55  ;;  %v1954_v51 = vld [vmem:[%s4786_s17 + $0x18] sm:$0xff]  ;;  %v1953_v55 = vld [vmem:[%s4786_s17 + $0x10] sm:$0xff] }
 0x296   : > { %v1491_v58 = vadd.f32 %v1489_v53, %v1485_v57  ;;  %v1492_v59 = vadd.f32 %v1490_v54, %v1488_v56  ;;  %v1951_v54 = vld [vmem:[%s4786_s17] sm:$0xff] }
 0x298   : > { %v1499_v60 = vmul.f32 %v3946_v26, %v1491_v58  ;;  %v1500_v61 = vmul.f32 %v3946_v26, %v1492_v59  ;;  %v1992_v26 = vld [vmem:[%s4786_s17 + $0x148] sm:$0xff] }
 0x29a   : > { %v1507_v62 = vadd.f32 %v3947_v29, %v1499_v60  ;;  %v1508_v0 = vadd.f32 %v3947_v29, %v1500_v61  ;;  %v1984_v29 = vld [vmem:[%s4786_s17 + $0x108] sm:$0xff] }
 0x29c   : > { %v1511_v63 = vmax.f32 %v1507_v62, 0.0  ;;  %v1512_v1 = vmax.f32 %v1508_v0, 0.0 }
 0x29e   : > { %1583 = vmatmul.f32.gmra.mxu3 %v1511_v63  ;;  %1612 = vmatmul.f32.gmra.mxu0 %v1511_v63 }
 0x29f   : > { %1641 = vmatmul.f32.gmra.mxu1 %v1511_v63 }
 0x2a6   : > { %1586 = vmatmul.f32.gmra.mxu3 %v1512_v1  ;;  %1615 = vmatmul.f32.gmra.mxu0 %v1512_v1 }
 0x2a7   : > { %1644 = vmatmul.f32.gmra.mxu1 %v1512_v1 }
 0x302   : > { %v1607_v4 = vpop.f32.mrf.mxu0 }
 0x303   : > { %v1636_v2 = vpop.f32.mrf.mxu1 }
 0x308   : > { %v1578_v3 = vpop.f32.mrf.mxu3 }
 0x30a   : > { %v1610_v9 = vpop.f32.mrf.mxu0 }
 0x30b   : > { %v1639_v5 = vpop.f32.mrf.mxu1 }
 0x30c   : > { %3804 = vmatpush.msrb.mxu3 %v1639_v5 }
 0x30e   : > { %3805 = vmatpush.msrb.mxu3 %v1636_v2 }
 0x30f   : > { %3706 = vmatmul.msk.f32.vlgmr.msrb.gmra.mxu3 %vm1652_vm4, %v1649_v6 }
 0x310   : > { %v1581_v7 = vpop.f32.mrf.mxu3 }
 0x311   : > { %1679 = vmatpush.msrb.mxu2 %v1581_v7 }
 0x313   : > { %1680 = vmatpush.msrb.mxu2 %v1578_v3 }
 0x314   : > { %3697 = vmatmul.msk.f32.vlgmr.msrb.gmra.mxu2 %vm1652_vm4, %v1648_v8 }
 0x315   : > { %1708 = vmatpush.msra.mxu2 %v1610_v9 }
 0x317   : > { %1709 = vmatpush.msra.mxu2 %v1607_v4  ;;  %3707 = vmatmul.msk.f32.gmra.mxu3 %vm1652_vm4, %v1650_v10 }
 0x319   : > { %1737 = vmatpush.msrb.mxu2 %v1639_v5 }
 0x31b   : > { %1738 = vmatpush.msrb.mxu2 %v1636_v2  ;;  %v1613_v12 = vpop.f32.mrf.mxu0 }
 0x31c   : > { %3698 = vmatmul.msk.f32.gmra.mxu2 %vm1652_vm4, %v1649_v6  ;;  %v1642_v13 = vpop.f32.mrf.mxu1 }
 0x31f   : > { %3708 = vmatmul.msk.f32.gmra.mxu3 %vm1652_vm4, %v1651_v11 }
 0x321   : > { %v1584_v14 = vpop.f32.mrf.mxu3 }
 0x323   : > { %v1616_v15 = vpop.f32.mrf.mxu0 }
 0x324   : > { %3699 = vmatmul.msk.f32.gmra.mxu2 %vm1652_vm4, %v1650_v10  ;;  %v1645_v16 = vpop.f32.mrf.mxu1  ;;  %1835 = vmatpush.msrb.mxu1 %v1616_v15 }
 0x326   : > { %1836 = vmatpush.msrb.mxu1 %v1613_v12 }
 0x327   : > { %3713 = vmatmul.msk.f32.vlgmr.msrb.gmra.mxu1 %vm1652_vm4, %v1648_v8 }
 0x328   : > { %2081 = vmatpush.msra.mxu1 %v1998_v21 }
 0x329   : > { %v1587_v17 = vpop.f32.mrf.mxu3 }
 0x32a   : > { %1806 = vmatpush.msra.mxu0 %v1587_v17  ;;  %2082 = vmatpush.msra.mxu1 %v1995_v23 }
 0x32c   : > { %3700 = vmatmul.msk.f32.gmra.mxu2 %vm1652_vm4, %v1651_v11  ;;  %1807 = vmatpush.msra.mxu0 %v1584_v14  ;;  %v5083_v14 = vld [vmem:[%s1052_s1] ss:$0 sm:$0xff]  ;;  %s3678_s1 = sshll.u32 %s5742_s27, 1 }
 0x32d   : > { %3709 = vmatmul.msk.f32.vlgmr.msra.gmra.mxu0 %vm1652_vm4, %v1648_v8  ;;  %2083 = vmatpush.msra.mxu1 %v1992_v26  ;;  %s1062_s26 = scalar_lea.vmem %s5736_s4, %s3678_s1 }
 0x32e   : > { %1999 = vmatpush.msrb.mxu0 %v1996_v20 }
 0x32f   : > { %3714 = vmatmul.msk.f32.gmra.mxu1 %vm1652_vm4, %v1649_v6 }
 0x330   : > { %2000 = vmatpush.msrb.mxu0 %v1993_v22  ;;  %2084 = vmatpush.msra.mxu1 %v1989_v28 }
 0x332   : > { %2001 = vmatpush.msrb.mxu0 %v1990_v25  ;;  %2085 = vmatpush.msra.mxu1 %v1986_v30  ;;  %v1994_v25 = vld [vmem:[%s4786_s17 + $0x158] sm:$0xff] }
 0x334   : > { %3701 = vmatmul.msk.f32.vlgmr.msra.gmra.mxu2 %vm1652_vm4, %v1648_v8  ;;  %2002 = vmatpush.msrb.mxu0 %v1987_v27 }
 0x335   : > { %1864 = vmatpush.msra.mxu2 %v1645_v16  ;;  %3710 = vmatmul.msk.f32.gmra.mxu0 %vm1652_vm4, %v1649_v6 }
 0x336   : > { %2003 = vmatpush.msrb.mxu0 %v1984_v29  ;;  %2086 = vmatpush.msra.mxu1 %v1983_v32  ;;  %v1991_v29 = vld [vmem:[%s4786_s17 + $0x140] sm:$0xff] }
 0x337   : > { %1865 = vmatpush.msra.mxu2 %v1642_v13  ;;  %3715 = vmatmul.msk.f32.gmra.mxu1 %vm1652_vm4, %v1650_v10 }
 0x338   : > { %2004 = vmatpush.msrb.mxu0 %v1981_v31  ;;  %2087 = vmatpush.msra.mxu1 %v1980_v35  ;;  %v1988_v31 = vld [vmem:[%s4786_s17 + $0x128] sm:$0xff] }
 0x33a   : > { %2005 = vmatpush.msrb.mxu0 %v1978_v34  ;;  %2088 = vmatpush.msra.mxu1 %v1977_v37 }
 0x33c   : > { %3702 = vmatmul.msk.f32.gmra.mxu2 %vm1652_vm4, %v1649_v6  ;;  %2006 = vmatpush.msrb.mxu0 %v1975_v36 }
 0x33d   : > { %3711 = vmatmul.msk.f32.gmra.mxu0 %vm1652_vm4, %v1650_v10  ;;  %2089 = vmatpush.msra.mxu1 %v1974_v39 }
 0x33e   : > { %2007 = vmatpush.msrb.mxu0 %v1972_v38 }
 0x33f   : > { %3716 = vmatmul.msk.f32.gmra.mxu1 %vm1652_vm4, %v1651_v11 }
 0x340   : > { %2008 = vmatpush.msrb.mxu0 %v1969_v40  ;;  %2090 = vmatpush.msra.mxu1 %v1971_v41  ;;  %v1985_v40 = vld [vmem:[%s4786_s17 + $0x110] sm:$0xff]  ;;  %v1982_v41 = vld [vmem:[%s4786_s17 + $0xf8] sm:$0xff] }
 0x342   : > { %2009 = vmatpush.msrb.mxu0 %v1966_v43  ;;  %2091 = vmatpush.msra.mxu1 %v1968_v44  ;;  %v1979_v44 = vld [vmem:[%s4786_s17 + $0xe0] sm:$0xff] }
 0x344   : > { %3703 = vmatmul.msk.f32.gmra.mxu2 %vm1652_vm4, %v1650_v10  ;;  %2010 = vmatpush.msrb.mxu0 %v1963_v45 }
 0x345   : > { %3712 = vmatmul.msk.f32.gmra.mxu0 %vm1652_vm4, %v1651_v11  ;;  %2092 = vmatpush.msra.mxu1 %v1965_v46 }
 0x346   : > { %2011 = vmatpush.msrb.mxu0 %v1960_v47 }
 0x347   : > { %2093 = vmatpush.msra.mxu1 %v1962_v48  ;;  %v1976_v48 = vld [vmem:[%s4786_s17 + $0xc8] sm:$0xff] }
 0x348   : > { %2012 = vmatpush.msrb.mxu0 %v1957_v49 }
 0x349   : > { %2094 = vmatpush.msra.mxu1 %v1959_v50 }
 0x34a   : > { %2013 = vmatpush.msrb.mxu0 %v1954_v51 }
 0x34b   : > { %2095 = vmatpush.msra.mxu1 %v1956_v52 }
 0x34c   : > { %3704 = vmatmul.msk.f32.gmra.mxu2 %vm1652_vm4, %v1651_v11  ;;  %2014 = vmatpush.msrb.mxu0 %v1951_v54 }
 0x34d   : > { %2096 = vmatpush.msra.mxu1 %v1953_v55 }
 0x354   : > { %3705 = vmatmul.msk.f32.vlgmr.msrb.gmra.mxu2 %vm1652_vm4, %v1648_v8 }
 0x35c   : > { %3717 = vmatmul.msk.f32.vlgmr.msra.gmra.mxu2 %vm1652_vm4, %v1648_v8  ;;  %v5074_v8 = vld [vmem:[%s1040_s23] ss:$0 sm:$0xff] }
 0x364   : > { %3718 = vmatmul.msk.f32.gmra.mxu2 %vm1652_vm4, %v1649_v6 }
 0x36c   : > { %3719 = vmatmul.msk.f32.gmra.mxu2 %vm1652_vm4, %v1650_v10 }
 0x374   : > { %3720 = vmatmul.msk.f32.gmra.mxu2 %vm1652_vm4, %v1651_v11 }
 0x392   : > { %v1743_v56 = vpop.f32.mrf.mxu3 }
 0x393   : > { %v1773_v62 = vrot.slane %v1743_v56, 1  ;;  %v1973_v56 = vld [vmem:[%s4786_s17 + $0xb0] sm:$0xff] }
 0x397   : > { %v5023_v18 = vpop.f32.mrf.mxu2 }
 0x398   : > { %v1756_v60 = vrot.slane %v5023_v18, 7 }
 0x39a   : > { %v1746_v59 = vpop.f32.mrf.mxu3  ;;  %v1767_v1 = vsel %vm1156_vm2, 0.0, %v1756_v60 }
 0x39b   : > { %v1775_v63 = vrot.slane %v1746_v59, 1 }
 0x39d   : > { %v1776_v6 = vsel %vm1161_vm1, %v1773_v62, %v1775_v63 }
 0x39f   : > { %v5025_v19 = vpop.f32.mrf.mxu2 }
 0x3a0   : > { %v1757_v61 = vrot.slane %v5025_v19, 7 }
 0x3a2   : > { %v1758_v2 = vsel %vm1156_vm2, %v1756_v60, %v1757_v61  ;;  %v1749_v9 = vpop.f32.mrf.mxu3 }
 0x3a3   : > { %v1777_v15 = vrot.slane %v1749_v9, 1  ;;  %v1958_v9 = vld [vmem:[%s4786_s17 + $0x38] sm:$0xff] }
 0x3a4   : > { %v1838_v34 = vpop.f32.mrf.mxu1 }
 0x3a5   : > { %v1778_v23 = vsel %vm1161_vm1, %v1775_v63, %v1777_v15 }
 0x3a7   : > { %v5031_v24 = vpop.f32.mrf.mxu2 }
 0x3a8   : > { %v1759_v11 = vrot.slane %v5031_v24, 7  ;;  %v1997_v24 = vld [vmem:[%s4786_s17 + $0x170] sm:$0xff] }
 0x3a9   : > { %2040 = vmatpush.msra.mxu0 %v1997_v24 }
 0x3aa   : > { %v1760_v18 = vsel %vm1156_vm2, %v1757_v61, %v1759_v11  ;;  %v1809_v22 = vpop.f32.mrf.mxu0  ;;  %v1967_v61 = vld [vmem:[%s4786_s17 + $0x80] sm:$0xff] }
 0x3ab   : > { %2041 = vmatpush.msra.mxu0 %v1994_v25  ;;  %v1883_v38 = vrot.slane %v1809_v22, 7 }
 0x3ac   : > { %v1841_v55 = vpop.f32.mrf.mxu1 }
 0x3ad   : > { %2042 = vmatpush.msra.mxu0 %v1991_v29  ;;  %v1894_v47 = vsel %vm1156_vm2, 0.0, %v1883_v38 }
 0x3ae   : > { %v1911_v50 = vadd.f32 %v1894_v47, %v1838_v34 }
 0x3af   : > { %v5041_v33 = vpop.f32.mrf.mxu2  ;;  %2043 = vmatpush.msra.mxu0 %v1988_v31 }
 0x3b0   : > { %v1761_v26 = vrot.slane %v5041_v33, 7  ;;  %v1783_v33 = vsel %vm1161_vm1, %v1777_v15, 0.0 }
 0x3b1   : > { %2044 = vmatpush.msra.mxu0 %v1985_v40 }
 0x3b2   : > { %v1762_v32 = vsel %vm1156_vm2, %v1759_v11, %v1761_v26  ;;  %v1812_v39 = vpop.f32.mrf.mxu0 }
 0x3b3   : > { %2045 = vmatpush.msra.mxu0 %v1982_v41  ;;  %v1884_v54 = vrot.slane %v1812_v39, 7 }
 0x3b5   : > { %2046 = vmatpush.msra.mxu0 %v1979_v44  ;;  %v1885_v63 = vsel %vm1156_vm2, %v1883_v38, %v1884_v54 }
 0x3b7   : > { %v1711_v42 = vpop.f32.mrf.mxu2  ;;  %2047 = vmatpush.msra.mxu0 %v1976_v48  ;;  %v5150_v48 = vld [vmem:[#allocation4 + $0x8] sm:$0xff] }
 0x3b8   : > { %v1784_v4 = vadd.f32 %v1767_v1, %v1711_v42 }
 0x3b9   : > { %2048 = vmatpush.msra.mxu0 %v1973_v56  ;;  %v5168_v56 = vld [vmem:[#allocation4 + $0x20] sm:$0xff] }
 0x3ba   : > { %v1815_v60 = vpop.f32.mrf.mxu0 }
 0x3bf   : > { %v1714_v53 = vpop.f32.mrf.mxu2 }
 0x3c0   : > { %v1785_v5 = vadd.f32 %v1758_v2, %v1714_v53  ;;  %v1912_v2 = vadd.f32 %v1885_v63, %v1841_v55 }
 0x3c2   : > { %v1789_v12 = vadd.f32 %v1785_v5, %v1776_v6  ;;  %v1886_v5 = vrot.slane %v1815_v60, 7 }
 0x3c4   : > { %v1924_v19 = vmul.f32 %v5074_v8, %v1789_v12 }
 0x3c6   : > { %v1936_v28 = vadd.f32 %v5083_v14, %v1924_v19 }
 0x3c7   : > { %v1717_v57 = vpop.f32.mrf.mxu2 }
 0x3c8   : > { %v1786_v20 = vadd.f32 %v1760_v18, %v1717_v57  ;;  %v5101_v37 = vmax.f32 %v1936_v28, 0.0  ;;  %v1970_v57 = vld [vmem:[%s4786_s17 + $0x98] sm:$0xff]  ;;  %v1952_v18 = vld [vmem:[%s4786_s17 + $0x8] sm:$0xff] }
 0x3c9   : > { %2049 = vmatpush.msra.mxu0 %v1970_v57 }
 0x3ca   : > { %v1790_v27 = vadd.f32 %v1786_v20, %v1778_v23 }
 0x3cb   : > { %2050 = vmatpush.msra.mxu0 %v1967_v61  ;;  %v5180_v61 = vld [vmem:[#allocation4 + $0x30] sm:$0xff] }
 0x3cc   : > { %v1925_v35 = vmul.f32 %v5074_v8, %v1790_v27 }
 0x3ce   : > { %v1937_v43 = vadd.f32 %v5083_v14, %v1925_v35 }
 0x3cf   : > { %v1720_v58 = vpop.f32.mrf.mxu2 }
 0x3d0   : > { %v1787_v36 = vadd.f32 %v1762_v32, %v1720_v58  ;;  %v5113_v51 = vmax.f32 %v1937_v43, 0.0 }
 0x3d2   : > { %v1791_v42 = vadd.f32 %v1787_v36, %v1783_v33 }
 0x3d4   : > { %v1926_v49 = vmul.f32 %v5074_v8, %v1791_v42 }
 0x3d6   : > { %v1938_v59 = vadd.f32 %v5083_v14, %v1926_v49 }
 0x3d7   : > { %v1740_v0 = vpop.f32.mrf.mxu2 }
 0x3d8   : > { %v1772_v3 = vrot.slane %v1740_v0, 1  ;;  %v1964_v0 = vld [vmem:[%s4786_s17 + $0x68] sm:$0xff] }
 0x3d9   : > { %2051 = vmatpush.msra.mxu0 %v1964_v0  ;;  %v5188_v0 = vld [vmem:[#allocation4 + $0x38] sm:$0xff] }
 0x3da   : > { %v1774_v7 = vsel %vm1161_vm1, %v1772_v3, %v1773_v62  ;;  %v1946_v3 = vmax.f32 %v1938_v59, 0.0  ;;  %v5174_v59 = vld [vmem:[#allocation4 + $0x28] sm:$0xff] }
 0x3db   : > { %v1788_v10 = vadd.f32 %v1784_v4, %v1774_v7  ;;  %v1961_v7 = vld [vmem:[%s4786_s17 + $0x50] sm:$0xff] }
 0x3dc   : > { %2052 = vmatpush.msra.mxu0 %v1961_v7  ;;  %v2628_v7 = vld [vmem:[%s4793_s14 + $0x60] sm:$0xff] }
 0x3dd   : > { %v1923_v13 = vmul.f32 %v5074_v8, %v1788_v10  ;;  %v1844_v10 = vpop.f32.mrf.mxu1 }
 0x3de   : > { %2053 = vmatpush.msra.mxu0 %v1958_v9  ;;  %v2627_v9 = vld [vmem:[%s4793_s14 + $0x58] sm:$0xff] }
 0x3df   : > { %v1935_v16 = vadd.f32 %v5083_v14, %v1923_v13  ;;  %v1867_v17 = vpop.f32.mrf.mxu2  ;;  %v1955_v13 = vld [vmem:[%s4786_s17 + $0x20] sm:$0xff] }
 0x3e0   : > { %v1899_v45 = vrot.slane %v1867_v17, 1  ;;  %v1818_v17 = vpop.f32.mrf.mxu0  ;;  %2054 = vmatpush.msra.mxu0 %v1955_v13  ;;  %v2623_v13 = vld [vmem:[%s4793_s14 + $0x38] sm:$0xff] }
 0x3e1   : > { %v5088_v21 = vmax.f32 %v1935_v16, 0.0  ;;  %v1887_v16 = vsel %vm1156_vm2, %v1884_v54, %v1886_v5  ;;  %v1888_v24 = vrot.slane %v1818_v17, 7  ;;  %v2621_v17 = vld [vmem:[%s4793_s14 + $0x28] sm:$0xff] }
 0x3e2   : > { %v1913_v20 = vadd.f32 %v1887_v16, %v1844_v10  ;;  %2055 = vmatpush.msra.mxu0 %v1952_v18  ;;  %v2626_v10 = vld [vmem:[%s4793_s14 + $0x50] sm:$0xff]  ;;  %v2620_v18 = vld [vmem:[%s4793_s14 + $0x20] sm:$0xff] }
 0x3e3   : > { %2015 = vmatmul.f32.vlgmr.msrb.gmra.mxu0 %v5088_v21  ;;  %2097 = vmatmul.f32.vlgmr.msra.gmra.mxu1 %v5088_v21  ;;  %v1889_v28 = vsel %vm1156_vm2, %v1886_v5, %v1888_v24  ;;  %v2630_v5 = vld [vmem:[%s4793_s14 + $0x70] sm:$0xff]  ;;  %v2617_v24 = vld [vmem:[%s4793_s14 + $0x8] sm:$0xff] }
 0x3e5   : > { %v1847_v27 = vpop.f32.mrf.mxu1 }
 0x3e7   : > { %v1870_v30 = vpop.f32.mrf.mxu2 }
 0x3e8   : > { %v1900_v46 = vrot.slane %v1870_v30, 1  ;;  %v1914_v30 = vadd.f32 %v1889_v28, %v1847_v27 }
 0x3ea   : > { %v1901_v53 = vsel %vm1161_vm1, %v1899_v45, %v1900_v46 }
 0x3eb   : > { %2018 = vmatmul.f32.gmra.mxu0 %v5101_v37  ;;  %2100 = vmatmul.f32.gmra.mxu1 %v5101_v37  ;;  %v1915_v58 = vadd.f32 %v1911_v50, %v1901_v53  ;;  %v5156_v50 = vld [vmem:[#allocation4 + $0x10] sm:$0xff]  ;;  %v5162_v53 = vld [vmem:[#allocation4 + $0x18] sm:$0xff] }
 0x3ed   : > { %v1927_v1 = vmul.f32 %v5074_v8, %v1915_v58 }
 0x3ef   : > { %v1873_v52 = vpop.f32.mrf.mxu2  ;;  %v1939_v12 = vadd.f32 %v5083_v14, %v1927_v1 }
 0x3f0   : > { %v1902_v62 = vrot.slane %v1873_v52, 1 }
 0x3f1   : > { %v1947_v22 = vmax.f32 %v1939_v12, 0.0  ;;  %v2624_v12 = vld [vmem:[%s4793_s14 + $0x40] sm:$0xff] }
 0x3f2   : > { %v1903_v4 = vsel %vm1161_vm1, %v1900_v46, %v1902_v62  ;;  %v5144_v46 = vld [vmem:[#allocation4] sm:$0xff] }
 0x3f3   : > { %2021 = vmatmul.f32.gmra.mxu0 %v5113_v51  ;;  %2103 = vmatmul.f32.gmra.mxu1 %v5113_v51  ;;  %v1916_v11 = vadd.f32 %v1912_v2, %v1903_v4  ;;  %v2631_v4 = vld [vmem:[%s4793_s14 + $0x78] sm:$0xff] }
 0x3f5   : > { %v1928_v19 = vmul.f32 %v5074_v8, %v1916_v11  ;;  %v2625_v11 = vld [vmem:[%s4793_s14 + $0x48] sm:$0xff] }
 0x3f7   : > { %v1876_v6 = vpop.f32.mrf.mxu2  ;;  %v1940_v26 = vadd.f32 %v5083_v14, %v1928_v19  ;;  %v2619_v19 = vld [vmem:[%s4793_s14 + $0x18] sm:$0xff] }
 0x3f8   : > { %v1904_v15 = vrot.slane %v1876_v6, 1  ;;  %v2629_v6 = vld [vmem:[%s4793_s14 + $0x68] sm:$0xff] }
 0x3f9   : > { %v1948_v31 = vmax.f32 %v1940_v26, 0.0 }
 0x3fa   : > { %v1905_v23 = vsel %vm1161_vm1, %v1902_v62, %v1904_v15  ;;  %v1910_v32 = vsel %vm1161_vm1, %v1904_v15, 0.0  ;;  %v2622_v15 = vld [vmem:[%s4793_s14 + $0x30] sm:$0xff] }
 0x3fb   : > { %2024 = vmatmul.f32.gmra.mxu0 %v1946_v3  ;;  %2106 = vmatmul.f32.gmra.mxu1 %v1946_v3  ;;  %v1917_v25 = vadd.f32 %v1913_v20, %v1905_v23  ;;  %v1918_v34 = vadd.f32 %v1914_v30, %v1910_v32 }
 0x3fd   : > { %v1929_v29 = vmul.f32 %v5074_v8, %v1917_v25  ;;  %v1930_v36 = vmul.f32 %v5074_v8, %v1918_v34  ;;  %v2616_v25 = vld [vmem:[%s4793_s14] sm:$0xff] }
 0x3ff   : > { %v1941_v35 = vadd.f32 %v5083_v14, %v1929_v29  ;;  %v1942_v38 = vadd.f32 %v5083_v14, %v1930_v36  ;;  %v5278_v36 = vld [vmem:[%s1043_s29] ss:$0 sm:$0xff] }
 0x401   : > { %v1949_v33 = vmax.f32 %v1941_v35, 0.0  ;;  %v1950_v39 = vmax.f32 %v1942_v38, 0.0 }
 0x403   : > { %2027 = vmatmul.f32.gmra.mxu0 %v1947_v22  ;;  %2109 = vmatmul.f32.gmra.mxu1 %v1947_v22 }
 0x40b   : > { %2030 = vmatmul.f32.gmra.mxu0 %v1948_v31  ;;  %2112 = vmatmul.f32.gmra.mxu1 %v1948_v31 }
 0x413   : > { %2033 = vmatmul.f32.gmra.mxu0 %v1949_v33  ;;  %2115 = vmatmul.f32.gmra.mxu1 %v1949_v33 }
 0x41b   : > { %2036 = vmatmul.f32.gmra.mxu0 %v1950_v39  ;;  %2118 = vmatmul.f32.gmra.mxu1 %v1950_v39 }
 0x423   : > { %2056 = vmatmul.f32.vlgmr.msra.gmra.mxu0 %v5088_v21 }
 0x42b   : > { %2059 = vmatmul.f32.gmra.mxu0 %v5101_v37 }
 0x433   : > { %2062 = vmatmul.f32.gmra.mxu0 %v5113_v51 }
 0x43b   : > { %2065 = vmatmul.f32.gmra.mxu0 %v1946_v3 }
 0x443   : > { %2068 = vmatmul.f32.gmra.mxu0 %v1947_v22  ;;  %v2618_v22 = vld [vmem:[%s4793_s14 + $0x10] sm:$0xff] }
 0x44b   : > { %2071 = vmatmul.f32.gmra.mxu0 %v1948_v31 }
 0x453   : > { %2074 = vmatmul.f32.gmra.mxu0 %v1949_v33 }
 0x45b   : > { %2077 = vmatmul.f32.gmra.mxu0 %v1950_v39  ;;  %v5286_v39 = vld [vmem:[%s1055_s5] ss:$0 sm:$0xff] }
 0x460   : > { %v2016_v8 = vpop.f32.mrf.mxu0  ;;  %v2098_v40 = vpop.f32.mrf.mxu1 }
 0x468   : > { %v2019_v41 = vpop.f32.mrf.mxu0  ;;  %v2101_v42 = vpop.f32.mrf.mxu1 }
 0x470   : > { %v2022_v43 = vpop.f32.mrf.mxu0  ;;  %v2104_v14 = vpop.f32.mrf.mxu1 }
 0x478   : > { %v2025_v44 = vpop.f32.mrf.mxu0  ;;  %v2107_v45 = vpop.f32.mrf.mxu1 }
 0x479   : > { %2166 = vmatpush.msrb.mxu2 %v2025_v44  ;;  %2248 = vmatpush.msrb.mxu0 %v2107_v45 }
 0x47b   : > { %2167 = vmatpush.msrb.mxu2 %v2022_v43  ;;  %2249 = vmatpush.msrb.mxu0 %v2104_v14 }
 0x47d   : > { %2168 = vmatpush.msrb.mxu2 %v2019_v41  ;;  %2250 = vmatpush.msrb.mxu0 %v2101_v42 }
 0x47f   : > { %2169 = vmatpush.msrb.mxu2 %v2016_v8  ;;  %2251 = vmatpush.msrb.mxu0 %v2098_v40 }
 0x480   : > { %v2028_v21 = vpop.f32.mrf.mxu0  ;;  %3721 = vmatmul.msk.f32.vlgmr.msrb.gmra.mxu2 %vm1077_vm0, %v5144_v46  ;;  %3737 = vmatmul.msk.f32.vlgmr.msrb.gmra.mxu0 %vm1077_vm0, %v5144_v46  ;;  %v2110_v52 = vpop.f32.mrf.mxu1 }
 0x481   : > { %2632 = vmatpush.msra.mxu0 %v2631_v4 }
 0x483   : > { %2633 = vmatpush.msra.mxu0 %v2630_v5 }
 0x485   : > { %2634 = vmatpush.msra.mxu0 %v2629_v6 }
 0x487   : > { %2635 = vmatpush.msra.mxu0 %v2628_v7 }
 0x488   : > { %v2031_v37 = vpop.f32.mrf.mxu0  ;;  %3722 = vmatmul.msk.f32.gmra.mxu2 %vm1077_vm0, %v5150_v48  ;;  %3738 = vmatmul.msk.f32.gmra.mxu0 %vm1077_vm0, %v5150_v48  ;;  %v2113_v55 = vpop.f32.mrf.mxu1 }
 0x489   : > { %2636 = vmatpush.msra.mxu0 %v2627_v9 }
 0x48b   : > { %2637 = vmatpush.msra.mxu0 %v2626_v10 }
 0x48d   : > { %2638 = vmatpush.msra.mxu0 %v2625_v11 }
 0x48f   : > { %2639 = vmatpush.msra.mxu0 %v2624_v12 }
 0x490   : > { %v2034_v47 = vpop.f32.mrf.mxu0  ;;  %3723 = vmatmul.msk.f32.gmra.mxu2 %vm1077_vm0, %v5156_v50  ;;  %3739 = vmatmul.msk.f32.gmra.mxu0 %vm1077_vm0, %v5156_v50  ;;  %v2116_v58 = vpop.f32.mrf.mxu1 }
 0x491   : > { %2640 = vmatpush.msra.mxu0 %v2623_v13 }
 0x493   : > { %2641 = vmatpush.msra.mxu0 %v2622_v15 }
 0x495   : > { %2642 = vmatpush.msra.mxu0 %v2621_v17 }
 0x497   : > { %2643 = vmatpush.msra.mxu0 %v2620_v18 }
 0x498   : > { %v2037_v49 = vpop.f32.mrf.mxu0  ;;  %3724 = vmatmul.msk.f32.gmra.mxu2 %vm1077_vm0, %v5162_v53  ;;  %3740 = vmatmul.msk.f32.gmra.mxu0 %vm1077_vm0, %v5162_v53  ;;  %v2119_v62 = vpop.f32.mrf.mxu1 }
 0x499   : > { %2644 = vmatpush.msra.mxu0 %v2619_v19 }
 0x49b   : > { %2645 = vmatpush.msra.mxu0 %v2618_v22 }
 0x49d   : > { %2646 = vmatpush.msra.mxu0 %v2617_v24 }
 0x49f   : > { %2647 = vmatpush.msra.mxu0 %v2616_v25 }
 0x4a0   : > { %v2057_v51 = vpop.f32.mrf.mxu0  ;;  %3725 = vmatmul.msk.f32.gmra.mxu2 %vm1077_vm0, %v5168_v56  ;;  %3741 = vmatmul.msk.f32.gmra.mxu0 %vm1077_vm0, %v5168_v56 }
 0x4a8   : > { %v2060_v54 = vpop.f32.mrf.mxu0  ;;  %3726 = vmatmul.msk.f32.gmra.mxu2 %vm1077_vm0, %v5174_v59  ;;  %3742 = vmatmul.msk.f32.gmra.mxu0 %vm1077_vm0, %v5174_v59 }
 0x4b0   : > { %v2063_v57 = vpop.f32.mrf.mxu0  ;;  %3727 = vmatmul.msk.f32.gmra.mxu2 %vm1077_vm0, %v5180_v61  ;;  %3743 = vmatmul.msk.f32.gmra.mxu0 %vm1077_vm0, %v5180_v61 }
 0x4b8   : > { %v2066_v60 = vpop.f32.mrf.mxu0  ;;  %3728 = vmatmul.msk.f32.gmra.mxu2 %vm1077_vm0, %v5188_v0  ;;  %3744 = vmatmul.msk.f32.gmra.mxu0 %vm1077_vm0, %v5188_v0 }
 0x4b9   : > { %2207 = vmatpush.msrb.mxu1 %v2066_v60  ;;  %3806 = vmatpush.msra.mxu3 %v2066_v60 }
 0x4bb   : > { %2208 = vmatpush.msrb.mxu1 %v2063_v57  ;;  %3807 = vmatpush.msra.mxu3 %v2063_v57 }
 0x4bd   : > { %2209 = vmatpush.msrb.mxu1 %v2060_v54  ;;  %3808 = vmatpush.msra.mxu3 %v2060_v54 }
 0x4bf   : > { %2210 = vmatpush.msrb.mxu1 %v2057_v51  ;;  %3809 = vmatpush.msra.mxu3 %v2057_v51 }
 0x4c0   : > { %v2069_v63 = vpop.f32.mrf.mxu0  ;;  %3729 = vmatmul.msk.f32.vlgmr.msrb.gmra.mxu1 %vm1077_vm0, %v5144_v46  ;;  %3736 = vmatmul.msk.f32.vlgmr.msra.gmra.mxu3 %vm1077_vm0, %v5188_v0 }
 0x4c1   : > { %2451 = vmatpush.msrb.mxu3 %v2119_v62  ;;  %2369 = vmatpush.msra.mxu1 %v2037_v49 }
 0x4c3   : > { %2452 = vmatpush.msrb.mxu3 %v2116_v58  ;;  %2370 = vmatpush.msra.mxu1 %v2034_v47 }
 0x4c5   : > { %2453 = vmatpush.msrb.mxu3 %v2113_v55  ;;  %2371 = vmatpush.msra.mxu1 %v2031_v37 }
 0x4c7   : > { %2454 = vmatpush.msrb.mxu3 %v2110_v52  ;;  %2372 = vmatpush.msra.mxu1 %v2028_v21 }
 0x4c8   : > { %v2072_v1 = vpop.f32.mrf.mxu0  ;;  %3730 = vmatmul.msk.f32.gmra.mxu1 %vm1077_vm0, %v5150_v48  ;;  %3761 = vmatmul.msk.f32.vlgmr.msrb.gmra.mxu3 %vm1077_vm0, %v5144_v46 }
 0x4d0   : > { %v2075_v2 = vpop.f32.mrf.mxu0  ;;  %3731 = vmatmul.msk.f32.gmra.mxu1 %vm1077_vm0, %v5156_v50  ;;  %3762 = vmatmul.msk.f32.gmra.mxu3 %vm1077_vm0, %v5150_v48 }
 0x4d8   : > { %v2078_v3 = vpop.f32.mrf.mxu0  ;;  %3732 = vmatmul.msk.f32.gmra.mxu1 %vm1077_vm0, %v5162_v53  ;;  %3763 = vmatmul.msk.f32.gmra.mxu3 %vm1077_vm0, %v5156_v50 }
 0x4d9   : > { %2410 = vmatpush.msra.mxu2 %v2078_v3 }
 0x4db   : > { %2411 = vmatpush.msra.mxu2 %v2075_v2 }
 0x4dd   : > { %2412 = vmatpush.msra.mxu2 %v2072_v1 }
 0x4df   : > { %2413 = vmatpush.msra.mxu2 %v2069_v63 }
 0x4e0   : > { %3733 = vmatmul.msk.f32.gmra.mxu1 %vm1077_vm0, %v5168_v56  ;;  %3753 = vmatmul.msk.f32.vlgmr.msra.gmra.mxu2 %vm1077_vm0, %v5144_v46 }
 0x4e1   : > { %3764 = vmatmul.msk.f32.gmra.mxu3 %vm1077_vm0, %v5162_v53 }
 0x4e8   : > { %3734 = vmatmul.msk.f32.gmra.mxu1 %vm1077_vm0, %v5174_v59  ;;  %3754 = vmatmul.msk.f32.gmra.mxu2 %vm1077_vm0, %v5150_v48 }
 0x4e9   : > { %3765 = vmatmul.msk.f32.gmra.mxu3 %vm1077_vm0, %v5168_v56 }
 0x4f0   : > { %3735 = vmatmul.msk.f32.gmra.mxu1 %vm1077_vm0, %v5180_v61  ;;  %3755 = vmatmul.msk.f32.gmra.mxu2 %vm1077_vm0, %v5156_v50 }
 0x4f1   : > { %3766 = vmatmul.msk.f32.gmra.mxu3 %vm1077_vm0, %v5174_v59 }
 0x4f8   : > { %3745 = vmatmul.msk.f32.vlgmr.msra.gmra.mxu1 %vm1077_vm0, %v5144_v46  ;;  %3756 = vmatmul.msk.f32.gmra.mxu2 %vm1077_vm0, %v5162_v53 }
 0x4f9   : > { %3767 = vmatmul.msk.f32.gmra.mxu3 %vm1077_vm0, %v5180_v61 }
 0x4fd   : > { %v2253_v20 = vpop.f32.mrf.mxu0 }
 0x4fe   : > { %v2317_v31 = vrot.slane %v2253_v20, 1 }
 0x500   : > { %3746 = vmatmul.msk.f32.gmra.mxu1 %vm1077_vm0, %v5150_v48  ;;  %3757 = vmatmul.msk.f32.gmra.mxu2 %vm1077_vm0, %v5168_v56 }
 0x501   : > { %3768 = vmatmul.msk.f32.gmra.mxu3 %vm1077_vm0, %v5188_v0 }
 0x503   : > { %v2171_v16 = vpop.f32.mrf.mxu2 }
 0x504   : > { %v2285_v29 = vrot.slane %v2171_v16, 7 }
 0x505   : > { %v2256_v26 = vpop.f32.mrf.mxu0 }
 0x506   : > { %v2318_v32 = vrot.slane %v2256_v26, 1  ;;  %v2308_v34 = vsel %vm1156_vm2, 0.0, %v2285_v29 }
 0x508   : > { %3747 = vmatmul.msk.f32.gmra.mxu1 %vm1077_vm0, %v5156_v50  ;;  %3758 = vmatmul.msk.f32.gmra.mxu2 %vm1077_vm0, %v5174_v59  ;;  %v2319_v38 = vsel %vm1161_vm1, %v2317_v31, %v2318_v32 }
 0x50b   : > { %v2174_v23 = vpop.f32.mrf.mxu2 }
 0x50c   : > { %v2286_v41 = vrot.slane %v2174_v23, 7 }
 0x50d   : > { %v2259_v28 = vpop.f32.mrf.mxu0 }
 0x50e   : > { %v2320_v14 = vrot.slane %v2259_v28, 1  ;;  %v2287_v21 = vsel %vm1156_vm2, %v2285_v29, %v2286_v41 }
 0x510   : > { %3748 = vmatmul.msk.f32.gmra.mxu1 %vm1077_vm0, %v5162_v53  ;;  %3759 = vmatmul.msk.f32.gmra.mxu2 %vm1077_vm0, %v5180_v61  ;;  %v2321_v47 = vsel %vm1161_vm1, %v2318_v32, %v2320_v14 }
 0x513   : > { %v2177_v27 = vpop.f32.mrf.mxu2 }
 0x514   : > { %v2288_v49 = vrot.slane %v2177_v27, 7 }
 0x515   : > { %v2262_v40 = vpop.f32.mrf.mxu0 }
 0x516   : > { %v2322_v52 = vrot.slane %v2262_v40, 1 }
 0x518   : > { %3749 = vmatmul.msk.f32.gmra.mxu1 %vm1077_vm0, %v5168_v56  ;;  %3760 = vmatmul.msk.f32.gmra.mxu2 %vm1077_vm0, %v5188_v0  ;;  %v2289_v56 = vsel %vm1156_vm2, %v2286_v41, %v2288_v49 }
 0x51b   : > { %v2180_v30 = vpop.f32.mrf.mxu2 }
 0x51d   : > { %v2265_v51 = vpop.f32.mrf.mxu0 }
 0x520   : > { %3750 = vmatmul.msk.f32.gmra.mxu1 %vm1077_vm0, %v5174_v59  ;;  %v2323_v59 = vsel %vm1161_vm1, %v2320_v14, %v2322_v52 }
 0x523   : > { %v2183_v43 = vpop.f32.mrf.mxu2 }
 0x524   : > { %v2292_v11 = vrot.slane %v2183_v43, 7 }
 0x525   : > { %v2268_v1 = vpop.f32.mrf.mxu0 }
 0x526   : > { %v2326_v13 = vrot.slane %v2268_v1, 1 }
 0x528   : > { %3751 = vmatmul.msk.f32.gmra.mxu1 %vm1077_vm0, %v5180_v61  ;;  %v2290_v61 = vrot.slane %v2180_v30, 7 }
 0x52a   : > { %v2291_v4 = vsel %vm1156_vm2, %v2288_v49, %v2290_v61  ;;  %v2293_v18 = vsel %vm1156_vm2, %v2290_v61, %v2292_v11 }
 0x52b   : > { %v2186_v54 = vpop.f32.mrf.mxu2 }
 0x52c   : > { %v2294_v26 = vrot.slane %v2186_v54, 7 }
 0x52d   : > { %v2271_v19 = vpop.f32.mrf.mxu0 }
 0x52e   : > { %v2328_v28 = vrot.slane %v2271_v19, 1  ;;  %v2295_v31 = vsel %vm1156_vm2, %v2292_v11, %v2294_v26 }
 0x530   : > { %3752 = vmatmul.msk.f32.gmra.mxu1 %vm1077_vm0, %v5188_v0  ;;  %v2324_v0 = vrot.slane %v2265_v51, 1 }
 0x532   : > { %v2325_v9 = vsel %vm1161_vm1, %v2322_v52, %v2324_v0  ;;  %v2327_v23 = vsel %vm1161_vm1, %v2324_v0, %v2326_v13 }
 0x533   : > { %v2189_v7 = vpop.f32.mrf.mxu2 }
 0x53b   : > { %v2192_v25 = vpop.f32.mrf.mxu2 }
 0x53d   : > { %v2212_v35 = vpop.f32.mrf.mxu1 }
 0x53e   : > { %v2341_v33 = vadd.f32 %v2308_v34, %v2212_v35 }
 0x540   : > { %v2349_v8 = vadd.f32 %v2341_v33, %v2319_v38  ;;  %v2329_v33 = vsel %vm1161_vm1, %v2326_v13, %v2328_v28  ;;  %v2298_v38 = vrot.slane %v2192_v25, 7 }
 0x542   : > { %v2564_v42 = vmul.f32 %v5278_v36, %v2349_v8  ;;  %v2274_v8 = vpop.f32.mrf.mxu0 }
 0x543   : > { %v2233_v62 = vpop.f32.mrf.mxu3  ;;  %v2330_v14 = vrot.slane %v2274_v8, 1 }
 0x544   : > { %v2584_v44 = vadd.f32 %v5286_v39, %v2564_v42  ;;  %v2296_v42 = vrot.slane %v2189_v7, 7 }
 0x545   : > { %v2215_v45 = vpop.f32.mrf.mxu1  ;;  %v2340_v49 = vsel %vm1161_vm1, %v2330_v14, 0.0 }
 0x546   : > { %v2600_v37 = vmax.f32 %v2584_v44, 0.0  ;;  %v2342_v46 = vadd.f32 %v2287_v21, %v2215_v45  ;;  %v2299_v44 = vsel %vm1156_vm2, %v2296_v42, %v2298_v38 }
 0x548   : > { %v2350_v48 = vadd.f32 %v2342_v46, %v2321_v47  ;;  %2648 = vmatmul.f32.vlgmr.msra.gmra.mxu0 %v2600_v37  ;;  %v2297_v37 = vsel %vm1156_vm2, %v2294_v26, %v2296_v42  ;;  %v2348_v46 = vadd.f32 %v2299_v44, %v2233_v62 }
 0x54a   : > { %v2565_v50 = vmul.f32 %v5278_v36, %v2350_v48 }
 0x54b   : > { %v2456_v15 = vpop.f32.mrf.mxu3 }
 0x54c   : > { %v2585_v53 = vadd.f32 %v5286_v39, %v2565_v50  ;;  %v2331_v50 = vsel %vm1161_vm1, %v2328_v28, %v2330_v14 }
 0x54d   : > { %v2218_v55 = vpop.f32.mrf.mxu1 }
 0x54e   : > { %v2343_v57 = vadd.f32 %v2289_v56, %v2218_v55  ;;  %v2601_v58 = vmax.f32 %v2585_v53, 0.0  ;;  %v2356_v53 = vadd.f32 %v2348_v46, %v2340_v49  ;;  %v2520_v56 = vrot.slane %v2456_v15, 1 }
 0x550   : > { %v2351_v60 = vadd.f32 %v2343_v57, %v2323_v59  ;;  %2651 = vmatmul.f32.gmra.mxu0 %v2601_v58 }
 0x552   : > { %v2566_v63 = vmul.f32 %v5278_v36, %v2351_v60  ;;  %v2571_v60 = vmul.f32 %v5278_v36, %v2356_v53 }
 0x553   : > { %v2459_v32 = vpop.f32.mrf.mxu3 }
 0x554   : > { %v2586_v2 = vadd.f32 %v5286_v39, %v2566_v63  ;;  %v2521_v58 = vrot.slane %v2459_v32, 1 }
 0x555   : > { %v2221_v3 = vpop.f32.mrf.mxu1 }
 0x556   : > { %v2344_v5 = vadd.f32 %v2291_v4, %v2221_v3  ;;  %v2602_v6 = vmax.f32 %v2586_v2, 0.0  ;;  %v2522_v0 = vsel %vm1161_vm1, %v2520_v56, %v2521_v58  ;;  %v2591_v3 = vadd.f32 %v5286_v39, %v2571_v60 }
 0x558   : > { %v2352_v10 = vadd.f32 %v2344_v5, %v2325_v9  ;;  %2654 = vmatmul.f32.gmra.mxu0 %v2602_v6 }
 0x55a   : > { %v2567_v12 = vmul.f32 %v5278_v36, %v2352_v10  ;;  %v2607_v10 = vmax.f32 %v2591_v3, 0.0 }
 0x55b   : > { %v2462_v51 = vpop.f32.mrf.mxu3 }
 0x55c   : > { %v2587_v16 = vadd.f32 %v5286_v39, %v2567_v12  ;;  %v2523_v5 = vrot.slane %v2462_v51, 1 }
 0x55d   : > { %v2224_v17 = vpop.f32.mrf.mxu1 }
 0x55e   : > { %v2345_v20 = vadd.f32 %v2293_v18, %v2224_v17  ;;  %v2603_v22 = vmax.f32 %v2587_v16, 0.0  ;;  %v2524_v13 = vsel %vm1161_vm1, %v2521_v58, %v2523_v5 }
 0x560   : > { %v2353_v24 = vadd.f32 %v2345_v20, %v2327_v23  ;;  %2657 = vmatmul.f32.gmra.mxu0 %v2603_v22 }
 0x562   : > { %v2568_v27 = vmul.f32 %v5278_v36, %v2353_v24 }
 0x563   : > { %v2415_v41 = vpop.f32.mrf.mxu2 }
 0x564   : > { %v2588_v29 = vadd.f32 %v5286_v39, %v2568_v27  ;;  %v2465_v2 = vpop.f32.mrf.mxu3 }
 0x565   : > { %v2227_v30 = vpop.f32.mrf.mxu1  ;;  %v2525_v20 = vrot.slane %v2465_v2, 1 }
 0x566   : > { %v2346_v34 = vadd.f32 %v2295_v31, %v2227_v30  ;;  %v2604_v35 = vmax.f32 %v2588_v29, 0.0 }
 0x567   : > { %v2526_v27 = vsel %vm1161_vm1, %v2523_v5, %v2525_v20 }
 0x568   : > { %v2354_v40 = vadd.f32 %v2346_v34, %v2329_v33  ;;  %2660 = vmatmul.f32.gmra.mxu0 %v2604_v35 }
 0x56a   : > { %v2569_v43 = vmul.f32 %v5278_v36, %v2354_v40 }
 0x56b   : > { %v2418_v55 = vpop.f32.mrf.mxu2 }
 0x56c   : > { %v2589_v45 = vadd.f32 %v5286_v39, %v2569_v43  ;;  %v2468_v18 = vpop.f32.mrf.mxu3 }
 0x56d   : > { %v2230_v21 = vpop.f32.mrf.mxu1  ;;  %v2527_v32 = vrot.slane %v2468_v18, 1 }
 0x56e   : > { %v2347_v47 = vadd.f32 %v2297_v37, %v2230_v21  ;;  %v2605_v48 = vmax.f32 %v2589_v45, 0.0 }
 0x56f   : > { %v2528_v40 = vsel %vm1161_vm1, %v2525_v20, %v2527_v32 }
 0x570   : > { %v2355_v52 = vadd.f32 %v2347_v47, %v2331_v50  ;;  %2663 = vmatmul.f32.gmra.mxu0 %v2605_v48 }
 0x572   : > { %v2570_v54 = vmul.f32 %v5278_v36, %v2355_v52 }
 0x573   : > { %v2421_v6 = vpop.f32.mrf.mxu2 }
 0x574   : > { %v2590_v57 = vadd.f32 %v5286_v39, %v2570_v54  ;;  %v2471_v33 = vpop.f32.mrf.mxu3 }
 0x575   : > { %v2374_v59 = vpop.f32.mrf.mxu1  ;;  %v2529_v45 = vrot.slane %v2471_v33, 1 }
 0x576   : > { %v2606_v61 = vmax.f32 %v2590_v57, 0.0  ;;  %v2488_v62 = vrot.slane %v2374_v59, 7 }
 0x577   : > { %v2530_v49 = vsel %vm1161_vm1, %v2527_v32, %v2529_v45 }
 0x578   : > { %2666 = vmatmul.f32.gmra.mxu0 %v2606_v61  ;;  %v2511_v63 = vsel %vm1156_vm2, 0.0, %v2488_v62 }
 0x579   : > { %v2544_v1 = vadd.f32 %v2511_v63, %v2415_v41 }
 0x57b   : > { %v2552_v4 = vadd.f32 %v2544_v1, %v2522_v0  ;;  %v2424_v25 = vpop.f32.mrf.mxu2 }
 0x57c   : > { %v2474_v47 = vpop.f32.mrf.mxu3 }
 0x57d   : > { %v2572_v7 = vmul.f32 %v5278_v36, %v2552_v4  ;;  %v2377_v9 = vpop.f32.mrf.mxu1 }
 0x57e   : > { %v2489_v11 = vrot.slane %v2377_v9, 7 }
 0x57f   : > { %v2592_v15 = vadd.f32 %v5286_v39, %v2572_v7 }
 0x580   : > { %2669 = vmatmul.f32.gmra.mxu0 %v2607_v10  ;;  %v2490_v12 = vsel %vm1156_vm2, %v2488_v62, %v2489_v11 }
 0x581   : > { %v2545_v16 = vadd.f32 %v2490_v12, %v2418_v55  ;;  %v2608_v19 = vmax.f32 %v2592_v15, 0.0  ;;  %v2531_v55 = vrot.slane %v2474_v47, 1  ;;  %v2702_v47 = vld [vmem:[#allocation6 + $0x28] sm:$0xff] }
 0x583   : > { %v2553_v17 = vadd.f32 %v2545_v16, %v2524_v13  ;;  %v2427_v42 = vpop.f32.mrf.mxu2  ;;  %v2532_v60 = vsel %vm1161_vm1, %v2529_v45, %v2531_v55  ;;  %v2700_v45 = vld [vmem:[#allocation6 + $0x18] sm:$0xff] }
 0x584   : > { %v2477_v63 = vpop.f32.mrf.mxu3 }
 0x585   : > { %v2573_v22 = vmul.f32 %v5278_v36, %v2553_v17  ;;  %v2380_v23 = vpop.f32.mrf.mxu1  ;;  %v2533_v2 = vrot.slane %v2477_v63, 1 }
 0x586   : > { %v2491_v24 = vrot.slane %v2380_v23, 7 }
 0x587   : > { %v2593_v28 = vadd.f32 %v5286_v39, %v2573_v22  ;;  %v2534_v9 = vsel %vm1161_vm1, %v2531_v55, %v2533_v2  ;;  %v2543_v20 = vsel %vm1161_vm1, %v2533_v2, 0.0  ;;  %v2708_v55 = vld [vmem:[#allocation6 + $0x58] sm:$0xff] }
 0x588   : > { %2672 = vmatmul.f32.gmra.mxu0 %v2608_v19  ;;  %v2492_v26 = vsel %vm1156_vm2, %v2489_v11, %v2491_v24 }
 0x589   : > { %v2546_v29 = vadd.f32 %v2492_v26, %v2421_v6  ;;  %v2609_v31 = vmax.f32 %v2593_v28, 0.0 }
 0x58b   : > { %v2554_v30 = vadd.f32 %v2546_v29, %v2526_v27  ;;  %v2430_v52 = vpop.f32.mrf.mxu2 }
 0x58d   : > { %v2574_v34 = vmul.f32 %v5278_v36, %v2554_v30  ;;  %v2383_v35 = vpop.f32.mrf.mxu1 }
 0x58e   : > { %v2493_v38 = vrot.slane %v2383_v35, 7 }
 0x58f   : > { %v2594_v41 = vadd.f32 %v5286_v39, %v2574_v34 }
 0x590   : > { %2675 = vmatmul.f32.gmra.mxu0 %v2609_v31  ;;  %v2494_v8 = vsel %vm1156_vm2, %v2491_v24, %v2493_v38 }
 0x591   : > { %v2547_v43 = vadd.f32 %v2494_v8, %v2424_v25  ;;  %v2610_v44 = vmax.f32 %v2594_v41, 0.0  ;;  %v4414_v8 = vmov 0  }
 0x592   : > { %3940 = vset.pattern.permute.xlu0 %v4414_v8  ;;  %3941 = vset.pattern.permute.xlu1 %v4414_v8 }
 0x593   : > { %v2555_v14 = vadd.f32 %v2547_v43, %v2528_v40  ;;  %v2433_v3 = vpop.f32.mrf.mxu2  ;;  %v2697_v40 = vld [vmem:[#allocation6] sm:$0xff] }
 0x595   : > { %v2575_v21 = vmul.f32 %v5278_v36, %v2555_v14  ;;  %v2386_v37 = vpop.f32.mrf.mxu1  ;;  %v2699_v14 = vld [vmem:[#allocation6 + $0x10] sm:$0xff] }
 0x596   : > { %v2495_v46 = vrot.slane %v2386_v37, 7  ;;  %v2701_v37 = vld [vmem:[#allocation6 + $0x20] sm:$0xff] }
 0x597   : > { %v2595_v50 = vadd.f32 %v5286_v39, %v2575_v21 }
 0x598   : > { %2678 = vmatmul.f32.gmra.mxu0 %v2610_v44  ;;  %v2496_v48 = vsel %vm1156_vm2, %v2493_v38, %v2495_v46  ;;  %v3950_v38 = vld [vmem:[%s1058_s22] ss:$0 sm:$0xff] }
 0x599   : > { %v2548_v51 = vadd.f32 %v2496_v48, %v2427_v42  ;;  %v2611_v54 = vmax.f32 %v2595_v50, 0.0  ;;  %2896 = vperm.xlu0 %3940, %v3950_v38   ;;  %v2698_v42 = vld [vmem:[#allocation6 + $0x8] sm:$0xff] }
 0x59b   : > { %v2556_v53 = vadd.f32 %v2548_v51, %v2530_v49  ;;  %v2436_v18 = vpop.f32.mrf.mxu2  ;;  %v2703_v49 = vld [vmem:[#allocation6 + $0x30] sm:$0xff]  ;;  %v2704_v51 = vld [vmem:[#allocation6 + $0x38] sm:$0xff] }
 0x59d   : > { %v2576_v56 = vmul.f32 %v5278_v36, %v2556_v53  ;;  %v2389_v57 = vpop.f32.mrf.mxu1  ;;  %v2706_v53 = vld [vmem:[#allocation6 + $0x48] sm:$0xff] }
 0x59e   : > { %v2497_v58 = vrot.slane %v2389_v57, 7  ;;  %v2710_v57 = vld [vmem:[#allocation6 + $0x68] sm:$0xff] }
 0x59f   : > { %v2596_v61 = vadd.f32 %v5286_v39, %v2576_v56  ;;  %v2709_v56 = vld [vmem:[#allocation6 + $0x60] sm:$0xff] }
 0x5a0   : > { %2681 = vmatmul.f32.gmra.mxu0 %v2611_v54  ;;  %v2498_v59 = vsel %vm1156_vm2, %v2495_v46, %v2497_v58  ;;  %v2707_v54 = vld [vmem:[#allocation6 + $0x50] sm:$0xff] }
 0x5a1   : > { %v2549_v62 = vadd.f32 %v2498_v59, %v2430_v52  ;;  %v2612_v1 = vmax.f32 %v2596_v61, 0.0  ;;  %v2705_v52 = vld [vmem:[#allocation6 + $0x40] sm:$0xff]  ;;  %v2712_v59 = vld [vmem:[#allocation6 + $0x78] sm:$0xff] }
 0x5a3   : > { %v2557_v0 = vadd.f32 %v2549_v62, %v2532_v60 }
 0x5a5   : > { %v2577_v4 = vmul.f32 %v5278_v36, %v2557_v0  ;;  %v2392_v5 = vpop.f32.mrf.mxu1 }
 0x5a6   : > { %v2499_v6 = vrot.slane %v2392_v5, 7 }
 0x5a7   : > { %v2597_v10 = vadd.f32 %v5286_v39, %v2577_v4 }
 0x5a8   : > { %2684 = vmatmul.f32.gmra.mxu0 %v2612_v1  ;;  %v2500_v7 = vsel %vm1156_vm2, %v2497_v58, %v2499_v6  ;;  %v2711_v58 = vld [vmem:[#allocation6 + $0x70] sm:$0xff] }
 0x5a9   : > { %v2550_v11 = vadd.f32 %v2500_v7, %v2433_v3  ;;  %v2613_v13 = vmax.f32 %v2597_v10, 0.0 }
 0x5ab   : > { %v2558_v12 = vadd.f32 %v2550_v11, %v2534_v9 }
 0x5ad   : > { %v2578_v15 = vmul.f32 %v5278_v36, %v2558_v12  ;;  %v2395_v16 = vpop.f32.mrf.mxu1 }
 0x5ae   : > { %v2501_v17 = vrot.slane %v2395_v16, 7 }
 0x5af   : > { %v2598_v22 = vadd.f32 %v5286_v39, %v2578_v15 }
 0x5b0   : > { %2687 = vmatmul.f32.gmra.mxu0 %v2613_v13  ;;  %v2502_v19 = vsel %vm1156_vm2, %v2499_v6, %v2501_v17 }
 0x5b1   : > { %v2551_v23 = vadd.f32 %v2502_v19, %v2436_v18  ;;  %v2614_v25 = vmax.f32 %v2598_v22, 0.0 }
 0x5b3   : > { %v2559_v24 = vadd.f32 %v2551_v23, %v2543_v20 }
 0x5b5   : > { %v2579_v26 = vmul.f32 %v5278_v36, %v2559_v24 }
 0x5b7   : > { %v2599_v27 = vadd.f32 %v5286_v39, %v2579_v26 }
 0x5b8   : > { %2690 = vmatmul.f32.gmra.mxu0 %v2614_v25 }
 0x5b9   : > { %v2615_v28 = vmax.f32 %v2599_v27, 0.0 }
 0x5c0   : > { %2693 = vmatmul.f32.gmra.mxu0 %v2615_v28 }
 0x5c5   : > { %v2649_v29 = vpop.f32.mrf.mxu0 }
 0x5cd   : > { %v2652_v30 = vpop.f32.mrf.mxu0 }
 0x5d5   : > { %v2655_v31 = vpop.f32.mrf.mxu0 }
 0x5dd   : > { %v2658_v32 = vpop.f32.mrf.mxu0 }
 0x5e5   : > { %v2661_v34 = vpop.f32.mrf.mxu0 }
 0x5ed   : > { %v2664_v35 = vpop.f32.mrf.mxu0 }
 0x5f5   : > { %v2667_v33 = vpop.f32.mrf.mxu0 }
 0x5fd   : > { %v2670_v36 = vpop.f32.mrf.mxu0 }
 0x5fe   : > { %2770 = vmatpush.msrb.mxu1 %v2670_v36 }
 0x600   : > { %2771 = vmatpush.msrb.mxu1 %v2667_v33 }
 0x602   : > { %2772 = vmatpush.msrb.mxu1 %v2664_v35 }
 0x604   : > { %2773 = vmatpush.msrb.mxu1 %v2661_v34 }
 0x605   : > { %v2673_v39 = vpop.f32.mrf.mxu0 }
 0x606   : > { %2774 = vmatpush.msrb.mxu1 %v2658_v32 }
 0x608   : > { %2775 = vmatpush.msrb.mxu1 %v2655_v31 }
 0x60a   : > { %2776 = vmatpush.msrb.mxu1 %v2652_v30 }
 0x60b   : > { %v5383_v60 = vpop.permute.xlu0 %2896 }
 0x60c   : > { %2777 = vmatpush.msrb.mxu1 %v2649_v29 }
 0x60d   : > { %v2676_v41 = vpop.f32.mrf.mxu0  ;;  %3769 = vmatmul.msk.f32.vlgmr.msrb.gmra.mxu1 %vm2713_vm5, %v2697_v40 }
 0x615   : > { %v2679_v43 = vpop.f32.mrf.mxu0  ;;  %3770 = vmatmul.msk.f32.gmra.mxu1 %vm2713_vm5, %v2698_v42 }
 0x61d   : > { %v2682_v44 = vpop.f32.mrf.mxu0  ;;  %3771 = vmatmul.msk.f32.gmra.mxu1 %vm2713_vm5, %v2699_v14 }
 0x625   : > { %v2685_v21 = vpop.f32.mrf.mxu0  ;;  %3772 = vmatmul.msk.f32.gmra.mxu1 %vm2713_vm5, %v2700_v45 }
 0x62d   : > { %v2688_v46 = vpop.f32.mrf.mxu0  ;;  %3773 = vmatmul.msk.f32.gmra.mxu1 %vm2713_vm5, %v2701_v37 }
 0x635   : > { %v2691_v48 = vpop.f32.mrf.mxu0  ;;  %3774 = vmatmul.msk.f32.gmra.mxu1 %vm2713_vm5, %v2702_v47 }
 0x63d   : > { %v2694_v50 = vpop.f32.mrf.mxu0  ;;  %3775 = vmatmul.msk.f32.gmra.mxu1 %vm2713_vm5, %v2703_v49 }
 0x63e   : > { %2835 = vmatpush.msrb.mxu2 %v2694_v50 }
 0x640   : > { %2836 = vmatpush.msrb.mxu2 %v2691_v48 }
 0x642   : > { %2837 = vmatpush.msrb.mxu2 %v2688_v46 }
 0x644   : > { %2838 = vmatpush.msrb.mxu2 %v2685_v21 }
 0x645   : > { %3776 = vmatmul.msk.f32.gmra.mxu1 %vm2713_vm5, %v2704_v51 }
 0x646   : > { %2839 = vmatpush.msrb.mxu2 %v2682_v44 }
 0x648   : > { %2840 = vmatpush.msrb.mxu2 %v2679_v43 }
 0x64a   : > { %2841 = vmatpush.msrb.mxu2 %v2676_v41 }
 0x64c   : > { %2842 = vmatpush.msrb.mxu2 %v2673_v39 }
 0x64d   : > { %3777 = vmatmul.msk.f32.gmra.mxu1 %vm2713_vm5, %v2705_v52  ;;  %3785 = vmatmul.msk.f32.vlgmr.msrb.gmra.mxu2 %vm2713_vm5, %v2697_v40 }
 0x655   : > { %3778 = vmatmul.msk.f32.gmra.mxu1 %vm2713_vm5, %v2706_v53  ;;  %3786 = vmatmul.msk.f32.gmra.mxu2 %vm2713_vm5, %v2698_v42 }
 0x65d   : > { %3779 = vmatmul.msk.f32.gmra.mxu1 %vm2713_vm5, %v2707_v54  ;;  %3787 = vmatmul.msk.f32.gmra.mxu2 %vm2713_vm5, %v2699_v14 }
 0x665   : > { %3780 = vmatmul.msk.f32.gmra.mxu1 %vm2713_vm5, %v2708_v55  ;;  %3788 = vmatmul.msk.f32.gmra.mxu2 %vm2713_vm5, %v2700_v45 }
 0x66d   : > { %3781 = vmatmul.msk.f32.gmra.mxu1 %vm2713_vm5, %v2709_v56  ;;  %3789 = vmatmul.msk.f32.gmra.mxu2 %vm2713_vm5, %v2701_v37 }
 0x675   : > { %3782 = vmatmul.msk.f32.gmra.mxu1 %vm2713_vm5, %v2710_v57  ;;  %3790 = vmatmul.msk.f32.gmra.mxu2 %vm2713_vm5, %v2702_v47 }
 0x67d   : > { %3783 = vmatmul.msk.f32.gmra.mxu1 %vm2713_vm5, %v2711_v58  ;;  %3791 = vmatmul.msk.f32.gmra.mxu2 %vm2713_vm5, %v2703_v49 }
 0x685   : > { %3784 = vmatmul.msk.f32.gmra.mxu1 %vm2713_vm5, %v2712_v59  ;;  %3792 = vmatmul.msk.f32.gmra.mxu2 %vm2713_vm5, %v2704_v51 }
 0x68a   : > { %v2779_v61 = vpop.f32.mrf.mxu1 }
 0x68b   : > { %v5386_v62 = vadd.f32 %v5383_v60, %v2779_v61 }
 0x68d   : > { %2931 = vmax.xlane.f32.xlu0 %v5386_v62  ;;  %3793 = vmatmul.msk.f32.gmra.mxu2 %vm2713_vm5, %v2705_v52 }
 0x692   : > { %v2782_v63 = vpop.f32.mrf.mxu1 }
 0x693   : > { %v5391_v0 = vadd.f32 %v5383_v60, %v2782_v63 }
 0x695   : > { %2933 = vmax.xlane.f32.xlu1 %v5391_v0  ;;  %3794 = vmatmul.msk.f32.gmra.mxu2 %vm2713_vm5, %v2706_v53 }
 0x69a   : > { %v2785_v1 = vpop.f32.mrf.mxu1 }
 0x69b   : > { %v5396_v2 = vadd.f32 %v5383_v60, %v2785_v1 }
 0x69d   : > { %2935 = vmax.xlane.f32.xlu1 %v5396_v2  ;;  %3795 = vmatmul.msk.f32.gmra.mxu2 %vm2713_vm5, %v2707_v54 }
 0x6a2   : > { %v2788_v3 = vpop.f32.mrf.mxu1 }
 0x6a3   : > { %v5401_v4 = vadd.f32 %v5383_v60, %v2788_v3 }
 0x6a5   : > { %2937 = vmax.xlane.f32.xlu2 %v5401_v4  ;;  %3796 = vmatmul.msk.f32.gmra.mxu2 %vm2713_vm5, %v2708_v55 }
 0x6aa   : > { %v2791_v5 = vpop.f32.mrf.mxu1 }
 0x6ab   : > { %v5406_v6 = vadd.f32 %v5383_v60, %v2791_v5 }
 0x6ad   : > { %2939 = vmax.xlane.f32.xlu2 %v5406_v6  ;;  %3797 = vmatmul.msk.f32.gmra.mxu2 %vm2713_vm5, %v2709_v56 }
 0x6b2   : > { %v2794_v7 = vpop.f32.mrf.mxu1 }
 0x6b3   : > { %v5411_v9 = vadd.f32 %v5383_v60, %v2794_v7 }
 0x6b5   : > { %2941 = vmax.xlane.f32.xlu1 %v5411_v9  ;;  %3798 = vmatmul.msk.f32.gmra.mxu2 %vm2713_vm5, %v2710_v57 }
 0x6ba   : > { %v2797_v10 = vpop.f32.mrf.mxu1 }
 0x6bb   : > { %v5416_v11 = vadd.f32 %v5383_v60, %v2797_v10 }
 0x6bd   : > { %2943 = vmax.xlane.f32.xlu2 %v5416_v11  ;;  %3799 = vmatmul.msk.f32.gmra.mxu2 %vm2713_vm5, %v2711_v58 }
 0x6c2   : > { %v2800_v12 = vpop.f32.mrf.mxu1 }
 0x6c3   : > { %v5421_v13 = vadd.f32 %v5383_v60, %v2800_v12 }
 0x6c5   : > { %2945 = vmax.xlane.f32.xlu1 %v5421_v13  ;;  %3800 = vmatmul.msk.f32.gmra.mxu2 %vm2713_vm5, %v2712_v59 }
 0x6ca   : > { %v2803_v15 = vpop.f32.mrf.mxu1 }
 0x6cb   : > { %v5426_v16 = vadd.f32 %v5383_v60, %v2803_v15 }
 0x6cd   : > { %2947 = vmax.xlane.f32.xlu2 %v5426_v16 }
 0x6d0   : > { %v2844_v17 = vpop.f32.mrf.mxu2 }
 0x6d1   : > { %v5454_v36 = vadd.f32 %v5383_v60, %v2844_v17 }
 0x6d2   : > { %v2806_v18 = vpop.f32.mrf.mxu1 }
 0x6d3   : > { %v5430_v19 = vadd.f32 %v5383_v60, %v2806_v18 }
 0x6d5   : > { %2949 = vmax.xlane.f32.xlu1 %v5430_v19 }
 0x6d8   : > { %v2847_v20 = vpop.f32.mrf.mxu2 }
 0x6d9   : > { %v5464_v41 = vadd.f32 %v5383_v60, %v2847_v20 }
 0x6da   : > { %v2809_v22 = vpop.f32.mrf.mxu1 }
 0x6db   : > { %v5434_v23 = vadd.f32 %v5383_v60, %v2809_v22 }
 0x6dd   : > { %2951 = vmax.xlane.f32.xlu2 %v5434_v23 }
 0x6e0   : > { %v2850_v24 = vpop.f32.mrf.mxu2 }
 0x6e1   : > { %v5467_v42 = vadd.f32 %v5383_v60, %v2850_v24 }
 0x6e2   : > { %v2812_v25 = vpop.f32.mrf.mxu1 }
 0x6e3   : > { %v5438_v26 = vadd.f32 %v5383_v60, %v2812_v25 }
 0x6e5   : > { %2953 = vmax.xlane.f32.xlu1 %v5438_v26 }
 0x6e8   : > { %v2853_v27 = vpop.f32.mrf.mxu2 }
 0x6e9   : > { %v5472_v14 = vadd.f32 %v5383_v60, %v2853_v27 }
 0x6ea   : > { %v2815_v28 = vpop.f32.mrf.mxu1 }
 0x6eb   : > { %v5442_v29 = vadd.f32 %v5383_v60, %v2815_v28 }
 0x6ed   : > { %2955 = vmax.xlane.f32.xlu2 %v5442_v29 }
 0x6f0   : > { %v2856_v30 = vpop.f32.mrf.mxu2 }
 0x6f1   : > { %v5475_v44 = vadd.f32 %v5383_v60, %v2856_v30 }
 0x6f2   : > { %v2818_v31 = vpop.f32.mrf.mxu1 }
 0x6f3   : > { %v5446_v32 = vadd.f32 %v5383_v60, %v2818_v31 }
 0x6f5   : > { %2957 = vmax.xlane.f32.xlu1 %v5446_v32 }
 0x6f8   : > { %v2859_v34 = vpop.f32.mrf.mxu2 }
 0x6f9   : > { %v5480_v21 = vadd.f32 %v5383_v60, %v2859_v34 }
 0x6fa   : > { %v2821_v35 = vpop.f32.mrf.mxu1 }
 0x6fb   : > { %v5450_v33 = vadd.f32 %v5383_v60, %v2821_v35 }
 0x6fd   : > { %2959 = vmax.xlane.f32.xlu2 %v5450_v33 }
 0x700   : > { %v2862_v38 = vpop.f32.mrf.mxu2  ;;  %v2932_v22 = vpop.xlane.xlu0 %2931 }
 0x701   : > { %v5483_v37 = vadd.f32 %v5383_v60, %v2862_v38 }
 0x702   : > { %v2824_v8 = vpop.f32.mrf.mxu1 }
 0x703   : > { %v5457_v39 = vadd.f32 %v5383_v60, %v2824_v8 }
 0x705   : > { %2961 = vmax.xlane.f32.xlu0 %v5457_v39  ;;  %2984 = vmax.xlane.f32.xlu2 %v5454_v36 }
 0x708   : > { %v5461_v40 = vpop.f32.mrf.mxu2  ;;  %v2934_v58 = vpop.xlane.xlu1 %2933 }
 0x70d   : > { %2986 = vmax.xlane.f32.xlu0 %v5464_v41  ;;  %2988 = vmax.xlane.f32.xlu2 %v5467_v42 }
 0x710   : > { %v2868_v43 = vpop.f32.mrf.mxu2  ;;  %v2936_v1 = vpop.xlane.xlu1 %2935 }
 0x711   : > { %v5488_v47 = vadd.f32 %v5383_v60, %v2868_v43 }
 0x715   : > { %2990 = vmax.xlane.f32.xlu0 %v5472_v14  ;;  %2992 = vmax.xlane.f32.xlu2 %v5475_v44 }
 0x718   : > { %v2871_v45 = vpop.f32.mrf.mxu2  ;;  %v2938_v59 = vpop.xlane.xlu2 %2937 }
 0x719   : > { %v5491_v48 = vadd.f32 %v5383_v60, %v2871_v45 }
 0x71d   : > { %2994 = vmax.xlane.f32.xlu0 %v5480_v21  ;;  %2996 = vmax.xlane.f32.xlu2 %v5483_v37 }
 0x720   : > { %v2874_v46 = vpop.f32.mrf.mxu2  ;;  %v2940_v3 = vpop.xlane.xlu2 %2939 }
 0x721   : > { %v5496_v50 = vadd.f32 %v5383_v60, %v2874_v46  ;;  %v2963_v27 = vmax.f32 %v2932_v22, %v2940_v3  ;;  %v5521_v22 = vadd.f32 %v5383_v60, %v5461_v40 }
 0x725   : > { %3000 = vmax.xlane.f32.xlu0 %v5488_v47  ;;  %3002 = vmax.xlane.f32.xlu2 %v5491_v48 }
 0x728   : > { %v2877_v49 = vpop.f32.mrf.mxu2  ;;  %v2942_v5 = vpop.xlane.xlu1 %2941 }
 0x729   : > { %v5499_v51 = vadd.f32 %v5383_v60, %v2877_v49  ;;  %v2964_v24 = vmax.f32 %v2934_v58, %v2942_v5 }
 0x72d   : > { %3004 = vmax.xlane.f32.xlu0 %v5496_v50  ;;  %3006 = vmax.xlane.f32.xlu2 %v5499_v51 }
 0x730   : > { %v2880_v52 = vpop.f32.mrf.mxu2  ;;  %v2944_v7 = vpop.xlane.xlu2 %2943 }
 0x731   : > { %v5504_v53 = vadd.f32 %v5383_v60, %v2880_v52  ;;  %v2965_v28 = vmax.f32 %v2936_v1, %v2944_v7  ;;  %v3157_v7 = vld [vmem:[#allocation9 + $0x70] sm:$0xff] }
 0x735   : > { %3008 = vmax.xlane.f32.xlu0 %v5504_v53 }
 0x738   : > { %v2883_v54 = vpop.f32.mrf.mxu2  ;;  %v2946_v10 = vpop.xlane.xlu1 %2945 }
 0x739   : > { %v5508_v55 = vadd.f32 %v5383_v60, %v2883_v54  ;;  %v2966_v30 = vmax.f32 %v2938_v59, %v2946_v10  ;;  %v3158_v59 = vld [vmem:[#allocation9 + $0x78] sm:$0xff]  ;;  %v3156_v10 = vld [vmem:[#allocation9 + $0x68] sm:$0xff] }
 0x73a   : > { %3159 = vmatpush.msra.mxu3 %v3158_v59 }
 0x73b   : > { %3010 = vmax.xlane.f32.xlu2 %v5508_v55 }
 0x73c   : > { %3160 = vmatpush.msra.mxu3 %v3157_v7 }
 0x73e   : > { %3161 = vmatpush.msra.mxu3 %v3156_v10 }
 0x740   : > { %v2886_v56 = vpop.f32.mrf.mxu2  ;;  %v2948_v12 = vpop.xlane.xlu2 %2947 }
 0x741   : > { %v5512_v57 = vadd.f32 %v5383_v60, %v2886_v56  ;;  %v2967_v35 = vmax.f32 %v2963_v27, %v2948_v12  ;;  %v3155_v12 = vld [vmem:[#allocation9 + $0x60] sm:$0xff]  ;;  %v3146_v27 = vld [vmem:[#allocation9 + $0x18] sm:$0xff] }
 0x742   : > { %3162 = vmatpush.msra.mxu3 %v3155_v12 }
 0x743   : > { %5732 = vst [vmem:[#allocation32_spill] sm:$0xff] %v5512_v57  ;;  %3012 = vmax.xlane.f32.xlu0 %v5512_v57 }
 0x748   : > { %v2889_v61 = vpop.f32.mrf.mxu2  ;;  %v2950_v15 = vpop.xlane.xlu1 %2949 }
 0x749   : > { %v5516_v63 = vadd.f32 %v5383_v60, %v2889_v61  ;;  %v2968_v31 = vmax.f32 %v2964_v24, %v2950_v15  ;;  %v3154_v15 = vld [vmem:[#allocation9 + $0x58] sm:$0xff]  ;;  %v3148_v24 = vld [vmem:[#allocation9 + $0x28] sm:$0xff] }
 0x74a   : > { %3163 = vmatpush.msra.mxu3 %v3154_v15 }
 0x74b   : > { %5733 = vst [vmem:[#allocation33_spill] sm:$0xff] %v5516_v63  ;;  %3014 = vmax.xlane.f32.xlu2 %v5516_v63 }
 0x750   : > { %v2952_v17 = vpop.xlane.xlu2 %2951 }
 0x751   : > { %v2969_v38 = vmax.f32 %v2965_v28, %v2952_v17  ;;  %v3153_v17 = vld [vmem:[#allocation9 + $0x50] sm:$0xff] }
 0x752   : > { %3164 = vmatpush.msra.mxu3 %v3153_v17  ;;  %v3145_v28 = vld [vmem:[#allocation9 + $0x10] sm:$0xff] }
 0x758   : > { %v2954_v18 = vpop.xlane.xlu1 %2953 }
 0x759   : > { %v2970_v8 = vmax.f32 %v2966_v30, %v2954_v18  ;;  %v3152_v18 = vld [vmem:[#allocation9 + $0x48] sm:$0xff] }
 0x75a   : > { %3165 = vmatpush.msra.mxu3 %v3152_v18  ;;  %v3144_v30 = vld [vmem:[#allocation9 + $0x8] sm:$0xff] }
 0x760   : > { %v2956_v20 = vpop.xlane.xlu2 %2955 }
 0x761   : > { %v2971_v46 = vmax.f32 %v2967_v35, %v2956_v20  ;;  %v3151_v20 = vld [vmem:[#allocation9 + $0x40] sm:$0xff] }
 0x762   : > { %3166 = vmatpush.msra.mxu3 %v3151_v20 }
 0x768   : > { %v2958_v25 = vpop.xlane.xlu1 %2957 }
 0x769   : > { %v2972_v43 = vmax.f32 %v2968_v31, %v2958_v25  ;;  %v3147_v25 = vld [vmem:[#allocation9 + $0x20] sm:$0xff] }
 0x76a   : > { %v3143_v31 = vld [vmem:[#allocation9] sm:$0xff] }
 0x76b   : > { %v2975_v54 = vmax.f32 %v2971_v46, %v2972_v43 }
 0x770   : > { %v2960_v34 = vpop.xlane.xlu2 %2959 }
 0x771   : > { %v2973_v49 = vmax.f32 %v2969_v38, %v2960_v34 }
 0x778   : > { %v2962_v45 = vpop.xlane.xlu0 %2961  ;;  %v2985_v34 = vpop.xlane.xlu2 %2984 }
 0x779   : > { %v2974_v52 = vmax.f32 %v2970_v8, %v2962_v45 }
 0x77b   : > { %v2976_v56 = vmax.f32 %v2973_v49, %v2974_v52 }
 0x77d   : > { %v2977_v61 = vmax.f32 %v2975_v54, %v2976_v56 }
 0x77f   : > { %v2978_v63 = vrot.slane %v2977_v61, 4 }
 0x780   : > { %v2987_v35 = vpop.xlane.xlu0 %2986  ;;  %v2989_v38 = vpop.xlane.xlu2 %2988 }
 0x781   : > { %v2979_v57 = vmax.f32 %v2977_v61, %v2978_v63  ;;  %v3150_v63 = vld [vmem:[#allocation9 + $0x38] sm:$0xff] }
 0x782   : > { %3167 = vmatpush.msra.mxu3 %v3150_v63 }
 0x783   : > { %v2980_v58 = vrot.slane %v2979_v57, 2 }
 0x785   : > { %v2981_v5 = vmax.f32 %v2979_v57, %v2980_v58  ;;  %v3149_v57 = vld [vmem:[#allocation9 + $0x30] sm:$0xff] }
 0x786   : > { %3168 = vmatpush.msra.mxu3 %v3149_v57 }
 0x787   : > { %v2982_v3 = vrot.slane %v2981_v5, 1 }
 0x788   : > { %3169 = vmatpush.msra.mxu3 %v3148_v24  ;;  %v2991_v8 = vpop.xlane.xlu0 %2990  ;;  %v2993_v40 = vpop.xlane.xlu2 %2992 }
 0x789   : > { %v2983_v1 = vmax.f32 %v2981_v5, %v2982_v3 }
 0x78a   : > { %3170 = vmatpush.msra.mxu3 %v3147_v25  ;;  %v3016_v25 = vmax.f32 %v2985_v34, %v2993_v40 }
 0x78b   : > { %3039 = vperm.xlu1 %3941, %v2983_v1  }
 0x78c   : > { %3171 = vmatpush.msra.mxu3 %v3146_v27 }
 0x78e   : > { %3172 = vmatpush.msra.mxu3 %v3145_v28 }
 0x790   : > { %3173 = vmatpush.msra.mxu3 %v3144_v30  ;;  %v2995_v49 = vpop.xlane.xlu0 %2994  ;;  %v2997_v56 = vpop.xlane.xlu2 %2996 }
 0x791   : > { %v3018_v27 = vmax.f32 %v2989_v38, %v2997_v56 }
 0x792   : > { %3174 = vmatpush.msra.mxu3 %v3143_v31 }
 0x798   : > { %v3001_v58 = vpop.xlane.xlu0 %3000  ;;  %v3003_v1 = vpop.xlane.xlu2 %3002 }
 0x7a0   : > { %v3005_v7 = vpop.xlane.xlu0 %3004  ;;  %v3007_v12 = vpop.xlane.xlu2 %3006 }
 0x7a8   : > { %v3009_v17 = vpop.xlane.xlu0 %3008 }
 0x7ae   : > { %v3011_v20 = vpop.xlane.xlu2 %3010 }
 0x7b5   : > { %2998 = vmax.xlane.f32.xlu1 %v5521_v22 }
 0x7fd   : > { %v5524_v60 = vpop.permute.xlu1 %3039 }
 0x7fe   : > { %v3047_v43 = vsub.f32 %v5386_v62, %v5524_v60  ;;  %v3048_v46 = vsub.f32 %v5391_v0, %v5524_v60  ;;  %v3049_v61 = vsub.f32 %v5396_v2, %v5524_v60  ;;  %v3050_v62 = vsub.f32 %v5401_v4, %v5524_v60 }
 0x7ff   : > { %v3051_v10 = vsub.f32 %v5406_v6, %v5524_v60  ;;  %v3052_v18 = vsub.f32 %v5411_v9, %v5524_v60  ;;  %v3017_v4 = vmax.f32 %v2987_v35, %v2995_v49  ;;  %v3013_v6 = vpop.xlane.xlu0 %3012  ;;  %v3053_v31 = vsub.f32 %v5416_v11, %v5524_v60  ;;  %v3015_v9 = vpop.xlane.xlu2 %3014 }
 0x800   : > { %v3079_v45 = vmul.f32 1.442695, %v3047_v43  ;;  %v3081_v52 = vmul.f32 1.442695, %v3048_v46  ;;  %v3083_v5 = vmul.f32 1.442695, %v3049_v61  ;;  %v3020_v43 = vmax.f32 %v3016_v25, %v3001_v58 }
 0x801   : > { %v3085_v59 = vmul.f32 1.442695, %v3050_v62  ;;  %v3087_v15 = vmul.f32 1.442695, %v3051_v10  ;;  %v3089_v63 = vmul.f32 1.442695, %v3052_v18  ;;  %v3021_v28 = vmax.f32 %v3017_v4, %v3003_v1 }
 0x802   : > { %3951 = vpow2.f32 %v3079_v45  ;;  %v3022_v45 = vmax.f32 %v3018_v27, %v3005_v7  ;;  %v3091_v49 = vmul.f32 1.442695, %v3053_v31 }
 0x803   : > { %3953 = vpow2.f32 %v3081_v52  ;;  %v3025_v46 = vmax.f32 %v3021_v28, %v3011_v20 }
 0x804   : > { %3955 = vpow2.f32 %v3083_v5  ;;  %v3026_v61 = vmax.f32 %v3022_v45, %v3013_v6 }
 0x805   : > { %3957 = vpow2.f32 %v3085_v59  ;;  %v3055_v59 = vsub.f32 %v5426_v16, %v5524_v60  ;;  %v3058_v16 = vsub.f32 %v5438_v26, %v5524_v60  ;;  %v3061_v26 = vsub.f32 %v5450_v33, %v5524_v60 }
 0x806   : > { %3959 = vpow2.f32 %v3087_v15 }
 0x807   : > { %3961 = vpow2.f32 %v3089_v63  ;;  %v3095_v10 = vmul.f32 1.442695, %v3055_v59  ;;  %v3101_v63 = vmul.f32 1.442695, %v3058_v16  ;;  %v3107_v28 = vmul.f32 1.442695, %v3061_v26 }
 0x808   : > { %v3952_v54 = vpop.eup %3951  ;;  %3963 = vpow2.f32 %v3091_v49 }
 0x809   : > { %3175 = vmatmul.f32.vlgmr.msra.gmra.mxu3 %v3952_v54  ;;  %v3954_v3 = vpop.eup %3953  ;;  %v3024_v54 = vmax.f32 %v3020_v43, %v3009_v17  ;;  %v3057_v17 = vsub.f32 %v5434_v23, %v5524_v60  ;;  %v3060_v23 = vsub.f32 %v5446_v32, %v5524_v60 }
 0x80a   : > { %v3956_v0 = vpop.eup %3955 }
 0x80b   : > { %v3958_v2 = vpop.eup %3957  ;;  %v3028_v5 = vmax.f32 %v3024_v54, %v3025_v46  ;;  %v3099_v18 = vmul.f32 1.442695, %v3057_v17  ;;  %v3105_v25 = vmul.f32 1.442695, %v3060_v23 }
 0x80c   : > { %v3960_v57 = vpop.eup %3959 }
 0x80d   : > { %v3962_v38 = vpop.eup %3961 }
 0x80e   : > { %v3964_v1 = vpop.eup %3963 }
 0x811   : > { %3178 = vmatmul.f32.gmra.mxu3 %v3954_v3 }
 0x819   : > { %3181 = vmatmul.f32.gmra.mxu3 %v3956_v0 }
 0x821   : > { %3184 = vmatmul.f32.gmra.mxu3 %v3958_v2 }
 0x828   : > { %v2999_v24 = vpop.xlane.xlu1 %2998 }
 0x829   : > { %v3019_v30 = vmax.f32 %v2991_v8, %v2999_v24  ;;  %3187 = vmatmul.f32.gmra.mxu3 %v3960_v57  ;;  %v3054_v8 = vsub.f32 %v5421_v13, %v5524_v60  ;;  %v3056_v13 = vsub.f32 %v5430_v19, %v5524_v60  ;;  %v3059_v19 = vsub.f32 %v5442_v29, %v5524_v60 }
 0x82a   : > { %v3062_v29 = vsub.f32 %v5457_v39, %v5524_v60 }
 0x82b   : > { %v3023_v52 = vmax.f32 %v3019_v30, %v3007_v12  ;;  %v3093_v58 = vmul.f32 1.442695, %v3054_v8  ;;  %v3097_v15 = vmul.f32 1.442695, %v3056_v13  ;;  %v3103_v57 = vmul.f32 1.442695, %v3059_v19 }
 0x82c   : > { %v3109_v6 = vmul.f32 1.442695, %v3062_v29 }
 0x82d   : > { %v3027_v35 = vmax.f32 %v3023_v52, %v3015_v9  ;;  %3965 = vpow2.f32 %v3093_v58 }
 0x82e   : > { %3967 = vpow2.f32 %v3095_v10 }
 0x82f   : > { %v3029_v34 = vmax.f32 %v3026_v61, %v3027_v35  ;;  %3969 = vpow2.f32 %v3097_v15 }
 0x830   : > { %3971 = vpow2.f32 %v3099_v18 }
 0x831   : > { %v3030_v40 = vmax.f32 %v3028_v5, %v3029_v34  ;;  %3190 = vmatmul.f32.gmra.mxu3 %v3962_v38  ;;  %3973 = vpow2.f32 %v3101_v63 }
 0x832   : > { %3975 = vpow2.f32 %v3103_v57 }
 0x833   : > { %v3031_v56 = vrot.slane %v3030_v40, 4  ;;  %v3966_v12 = vpop.eup %3965  ;;  %3977 = vpow2.f32 %v3105_v25 }
 0x834   : > { %v3968_v2 = vpop.eup %3967  ;;  %3979 = vpow2.f32 %v3107_v28 }
 0x835   : > { %v3032_v11 = vmax.f32 %v3030_v40, %v3031_v56  ;;  %v3970_v20 = vpop.eup %3969  ;;  %3981 = vpow2.f32 %v3109_v6 }
 0x836   : > { %v3972_v4 = vpop.eup %3971 }
 0x837   : > { %v3033_v3 = vrot.slane %v3032_v11, 2  ;;  %v3974_v24 = vpop.eup %3973 }
 0x838   : > { %v3976_v27 = vpop.eup %3975 }
 0x839   : > { %3193 = vmatmul.f32.gmra.mxu3 %v3964_v1  ;;  %v3034_v62 = vmax.f32 %v3032_v11, %v3033_v3  ;;  %v3978_v30 = vpop.eup %3977 }
 0x83a   : > { %v3980_v31 = vpop.eup %3979 }
 0x83b   : > { %v3035_v0 = vrot.slane %v3034_v62, 1  ;;  %v3982_v43 = vpop.eup %3981 }
 0x83d   : > { %v3036_v7 = vmax.f32 %v3034_v62, %v3035_v0 }
 0x83f   : > { %3044 = vperm.xlu0 %3940, %v3036_v7  }
 0x841   : > { %3196 = vmatmul.f32.gmra.mxu3 %v3966_v12 }
 0x849   : > { %3199 = vmatmul.f32.gmra.mxu3 %v3968_v2 }
 0x851   : > { %3202 = vmatmul.f32.gmra.mxu3 %v3970_v20 }
 0x859   : > { %3205 = vmatmul.f32.gmra.mxu3 %v3972_v4 }
 0x861   : > { %3208 = vmatmul.f32.gmra.mxu3 %v3974_v24 }
 0x869   : > { %3211 = vmatmul.f32.gmra.mxu3 %v3976_v27 }
 0x871   : > { %3214 = vmatmul.f32.gmra.mxu3 %v3978_v30  ;;  %v5734_v30 = vld [vmem:[#allocation32_spill] sm:$0xff] }
 0x879   : > { %3217 = vmatmul.f32.gmra.mxu3 %v3980_v31  ;;  %v5735_v31 = vld [vmem:[#allocation33_spill] sm:$0xff] }
 0x881   : > { %3220 = vmatmul.f32.gmra.mxu3 %v3982_v43 }
 0x88c   : > { %v5558_v32 = vpop.f32.mrf.mxu3 }
 0x894   : > { %v5560_v45 = vpop.f32.mrf.mxu3 }
 0x89c   : > { %v5562_v46 = vpop.f32.mrf.mxu3 }
 0x8a4   : > { %v5564_v33 = vpop.f32.mrf.mxu3 }
 0x8ac   : > { %v5566_v52 = vpop.f32.mrf.mxu3 }
 0x8b1   : > { %v5568_v9 = vpop.permute.xlu0 %3044 }
 0x8b2   : > { %v3063_v39 = vsub.f32 %v5454_v36, %v5568_v9  ;;  %v3064_v61 = vsub.f32 %v5464_v41, %v5568_v9  ;;  %v3065_v34 = vsub.f32 %v5467_v42, %v5568_v9  ;;  %v3066_v36 = vsub.f32 %v5472_v14, %v5568_v9 }
 0x8b3   : > { %v3067_v58 = vsub.f32 %v5475_v44, %v5568_v9  ;;  %v3068_v62 = vsub.f32 %v5480_v21, %v5568_v9  ;;  %v3069_v14 = vsub.f32 %v5483_v37, %v5568_v9  ;;  %v3070_v44 = vsub.f32 %v5521_v22, %v5568_v9 }
 0x8b4   : > { %v5572_v60 = vpop.f32.mrf.mxu3  ;;  %v3111_v54 = vmul.f32 1.442695, %v3063_v39  ;;  %v3113_v35 = vmul.f32 1.442695, %v3064_v61  ;;  %v3115_v38 = vmul.f32 1.442695, %v3065_v34  ;;  %v3071_v21 = vsub.f32 %v5488_v47, %v5568_v9 }
 0x8b5   : > { %v3117_v56 = vmul.f32 1.442695, %v3066_v36  ;;  %v3119_v3 = vmul.f32 1.442695, %v3067_v58  ;;  %v3121_v59 = vmul.f32 1.442695, %v3068_v62  ;;  %v3072_v37 = vsub.f32 %v5491_v48, %v5568_v9 }
 0x8b6   : > { %3983 = vpow2.f32 %v3111_v54  ;;  %v3123_v10 = vmul.f32 1.442695, %v3069_v14  ;;  %v3125_v15 = vmul.f32 1.442695, %v3070_v44  ;;  %v3127_v18 = vmul.f32 1.442695, %v3071_v21 }
 0x8b7   : > { %3985 = vpow2.f32 %v3113_v35  ;;  %v3129_v63 = vmul.f32 1.442695, %v3072_v37  ;;  %v3073_v22 = vsub.f32 %v5496_v50, %v5568_v9  ;;  %v3074_v47 = vsub.f32 %v5499_v51, %v5568_v9 }
 0x8b8   : > { %3987 = vpow2.f32 %v3115_v38  ;;  %v3075_v50 = vsub.f32 %v5504_v53, %v5568_v9  ;;  %v3076_v51 = vsub.f32 %v5508_v55, %v5568_v9  ;;  %v3077_v29 = vsub.f32 %v5734_v30, %v5568_v9 }
 0x8b9   : > { %3989 = vpow2.f32 %v3117_v56  ;;  %v3131_v57 = vmul.f32 1.442695, %v3073_v22  ;;  %v3133_v48 = vmul.f32 1.442695, %v3074_v47  ;;  %v3078_v43 = vsub.f32 %v5735_v31, %v5568_v9  ;;  %v3272_v56 = vld [vmem:[#allocation7] sm:$0xff] }
 0x8ba   : > { %3991 = vpow2.f32 %v3119_v3  ;;  %v3135_v27 = vmul.f32 1.442695, %v3075_v50  ;;  %v3137_v28 = vmul.f32 1.442695, %v3076_v51  ;;  %v3139_v55 = vmul.f32 1.442695, %v3077_v29 }
 0x8bb   : > { %3993 = vpow2.f32 %v3121_v59  ;;  %3274 = vst [vmem:[#allocation1] ss:$2 sm:$0xff] %v3272_v56 }
 0x8bc   : > { %v3984_v49 = vpop.eup %3983  ;;  %v5576_v5 = vpop.f32.mrf.mxu3  ;;  %3995 = vpow2.f32 %v3123_v10 }
 0x8bd   : > { %3223 = vmatmul.f32.gmra.mxu3 %v3984_v49  ;;  %v3986_v40 = vpop.eup %3985  ;;  %3997 = vpow2.f32 %v3125_v15 }
 0x8be   : > { %v3988_v41 = vpop.eup %3987  ;;  %3999 = vpow2.f32 %v3127_v18 }
 0x8bf   : > { %v3990_v1 = vpop.eup %3989  ;;  %4001 = vpow2.f32 %v3129_v63 }
 0x8c0   : > { %v3992_v0 = vpop.eup %3991  ;;  %4003 = vpow2.f32 %v3131_v57 }
 0x8c1   : > { %v3994_v12 = vpop.eup %3993  ;;  %4005 = vpow2.f32 %v3133_v48 }
 0x8c2   : > { %v3996_v2 = vpop.eup %3995  ;;  %4007 = vpow2.f32 %v3135_v27  ;;  %v3276_v58 = vld.sshfl [vmem:[#allocation1 + $0x8] sm:$0xff pattern:$0x75316420] }
 0x8c3   : > { %v3998_v20 = vpop.eup %3997  ;;  %4009 = vpow2.f32 %v3137_v28 }
 0x8c4   : > { %v5580_v8 = vpop.f32.mrf.mxu3  ;;  %v4000_v4 = vpop.eup %3999  ;;  %4011 = vpow2.f32 %v3139_v55 }
 0x8c5   : > { %3226 = vmatmul.f32.gmra.mxu3 %v3986_v40  ;;  %v4002_v24 = vpop.eup %4001 }
 0x8c6   : > { %v4004_v25 = vpop.eup %4003 }
 0x8c7   : > { %v4006_v26 = vpop.eup %4005 }
 0x8c8   : > { %v4008_v53 = vpop.eup %4007 }
 0x8c9   : > { %v4010_v6 = vpop.eup %4009 }
 0x8ca   : > { %v4012_v39 = vpop.eup %4011 }
 0x8cc   : > { %v3200_v11 = vpop.f32.mrf.mxu3 }
 0x8cd   : > { %3229 = vmatmul.f32.gmra.mxu3 %v3988_v41 }
 0x8d4   : > { %v3203_v42 = vpop.f32.mrf.mxu3 }
 0x8d5   : > { %3232 = vmatmul.f32.gmra.mxu3 %v3990_v1 }
 0x8dc   : > { %v3206_v7 = vpop.f32.mrf.mxu3 }
 0x8dd   : > { %3235 = vmatmul.f32.gmra.mxu3 %v3992_v0 }
 0x8e4   : > { %v3209_v13 = vpop.f32.mrf.mxu3 }
 0x8e5   : > { %3238 = vmatmul.f32.gmra.mxu3 %v3994_v12 }
 0x8ec   : > { %v3212_v17 = vpop.f32.mrf.mxu3 }
 0x8ed   : > { %3241 = vmatmul.f32.gmra.mxu3 %v3996_v2 }
 0x8f4   : > { %v3215_v16 = vpop.f32.mrf.mxu3 }
 0x8f5   : > { %3244 = vmatmul.f32.gmra.mxu3 %v3998_v20 }
 0x8fc   : > { %v3218_v19 = vpop.f32.mrf.mxu3 }
 0x8fd   : > { %3247 = vmatmul.f32.gmra.mxu3 %v4000_v4 }
 0x904   : > { %v3221_v23 = vpop.f32.mrf.mxu3 }
 0x905   : > { %3250 = vmatmul.f32.gmra.mxu3 %v4002_v24  ;;  %3279 = vmatpush.msrb.mxu0 %v3221_v23 }
 0x907   : > { %3280 = vmatpush.msrb.mxu0 %v3218_v19 }
 0x909   : > { %3281 = vmatpush.msrb.mxu0 %v3215_v16 }
 0x90b   : > { %3282 = vmatpush.msrb.mxu0 %v3212_v17 }
 0x90d   : > { %3253 = vmatmul.f32.gmra.mxu3 %v4004_v25  ;;  %3283 = vmatpush.msrb.mxu0 %v3209_v13 }
 0x90f   : > { %3284 = vmatpush.msrb.mxu0 %v3206_v7 }
 0x911   : > { %3285 = vmatpush.msrb.mxu0 %v3203_v42 }
 0x913   : > { %3286 = vmatpush.msrb.mxu0 %v3200_v11  ;;  %v3275_v11 = vld.sshfl [vmem:[#allocation1] sm:$0xff pattern:$0x75316420] }
 0x915   : > { %3256 = vmatmul.f32.gmra.mxu3 %v4006_v26  ;;  %3287 = vmatpush.msrb.mxu0 %v5580_v8 }
 0x917   : > { %3288 = vmatpush.msrb.mxu0 %v5576_v5 }
 0x919   : > { %3289 = vmatpush.msrb.mxu0 %v5572_v60 }
 0x91b   : > { %3290 = vmatpush.msrb.mxu0 %v5566_v52  ;;  %v3141_v52 = vmul.f32 1.442695, %v3078_v43 }
 0x91d   : > { %3259 = vmatmul.f32.gmra.mxu3 %v4008_v53  ;;  %3291 = vmatpush.msrb.mxu0 %v5564_v33  ;;  %4013 = vpow2.f32 %v3141_v52 }
 0x91f   : > { %3292 = vmatpush.msrb.mxu0 %v5562_v46 }
 0x921   : > { %3293 = vmatpush.msrb.mxu0 %v5560_v45 }
 0x923   : > { %3294 = vmatpush.msrb.mxu0 %v5558_v32  ;;  %v4014_v33 = vpop.eup %4013 }
 0x924   : > { %3295 = vmatmul.f32.vlgmr.msrb.gmra.mxu0 %v3275_v11 }
 0x925   : > { %3262 = vmatmul.f32.gmra.mxu3 %v4010_v6 }
 0x92d   : > { %3265 = vmatmul.f32.gmra.mxu3 %v4012_v39 }
 0x935   : > { %3268 = vmatmul.f32.gmra.mxu3 %v4014_v33 }
 0x940   : > { %v3224_v60 = vpop.f32.mrf.mxu3 }
 0x948   : > { %v3227_v54 = vpop.f32.mrf.mxu3 }
 0x950   : > { %v3230_v46 = vpop.f32.mrf.mxu3 }
 0x958   : > { %v3233_v61 = vpop.f32.mrf.mxu3 }
 0x960   : > { %v3236_v45 = vpop.f32.mrf.mxu3 }
 0x968   : > { %v3239_v35 = vpop.f32.mrf.mxu3 }
 0x970   : > { %v3242_v49 = vpop.f32.mrf.mxu3 }
 0x978   : > { %v3245_v32 = vpop.f32.mrf.mxu3 }
 0x980   : > { %v3248_v5 = vpop.f32.mrf.mxu3 }
 0x988   : > { %v3251_v34 = vpop.f32.mrf.mxu3 }
 0x990   : > { %v3254_v38 = vpop.f32.mrf.mxu3 }
 0x998   : > { %v3257_v40 = vpop.f32.mrf.mxu3 }
 0x9a0   : > { %v3260_v8 = vpop.f32.mrf.mxu3 }
 0x9a1   : > { %v3296_v3 = vpop.f32.mrf.mxu0 }
 0x9a8   : > { %v3263_v9 = vpop.f32.mrf.mxu3 }
 0x9b0   : > { %v3266_v36 = vpop.f32.mrf.mxu3 }
 0x9b8   : > { %v3269_v41 = vpop.f32.mrf.mxu3 }
 0x9b9   : > { %3299 = vmatpush.msra.mxu1 %v3269_v41 }
 0x9bb   : > { %3300 = vmatpush.msra.mxu1 %v3266_v36 }
 0x9bd   : > { %3301 = vmatpush.msra.mxu1 %v3263_v9 }
 0x9bf   : > { %3302 = vmatpush.msra.mxu1 %v3260_v8 }
 0x9c1   : > { %3303 = vmatpush.msra.mxu1 %v3257_v40 }
 0x9c3   : > { %3304 = vmatpush.msra.mxu1 %v3254_v38 }
 0x9c5   : > { %3305 = vmatpush.msra.mxu1 %v3251_v34 }
 0x9c7   : > { %3306 = vmatpush.msra.mxu1 %v3248_v5 }
 0x9c9   : > { %3307 = vmatpush.msra.mxu1 %v3245_v32 }
 0x9cb   : > { %3308 = vmatpush.msra.mxu1 %v3242_v49 }
 0x9cd   : > { %3309 = vmatpush.msra.mxu1 %v3239_v35 }
 0x9cf   : > { %3310 = vmatpush.msra.mxu1 %v3236_v45 }
 0x9d1   : > { %3311 = vmatpush.msra.mxu1 %v3233_v61 }
 0x9d3   : > { %3312 = vmatpush.msra.mxu1 %v3230_v46 }
 0x9d5   : > { %3313 = vmatpush.msra.mxu1 %v3227_v54 }
 0x9d7   : > { %3314 = vmatpush.msra.mxu1 %v3224_v60 }
 0x9d8   : > { %3315 = vmatmul.f32.vlgmr.msra.gmra.mxu1 %v3276_v58 }
 0xa55   : > { %v3316_v1 = vpop.f32.mrf.mxu1 }
 0xa56   : > { %v3317_v42 = vadd.f32 %v3316_v1, %v3296_v3 }
 0xa58   : > { %v3338_v62 = vrot.slane %v3317_v42, 6  ;;  %3320 = vrot.lane.b32.xlu2 %v3317_v42, %s4415_s25 }
 0xa5a   : > { %4015 = vrcp.f32 %v3338_v62  ;;  %v3351_v14 = vand.u32 2147483648, %v3338_v62  ;;  %v3349_v12 = vand.u32 2147483647, %v3338_v62  ;;  %vm3345_vm7 = vweird.f32 %v3338_v62 }
 0xa5c   : > { %v3352_v44 = vor.u32 1.1754944e-38, %v3351_v14  ;;  %vm3350_vm9 = vcmp.eq.f32.partialorder %v3349_v12, 8.507059e+37 }
 0xa60   : > { %v4016_v59 = vpop.eup %4015 }
 0xa61   : > { %v3341_v0 = vmul.f32 %v4016_v59, %v3338_v62  ;;  %vm3346_vm6 = vweird.f32 %v4016_v59 }
 0xa62   : > { %vm3347_vm8 = vmor %vm3345_vm7, %vm3346_vm6 }
 0xa63   : > { %v3342_v7 = vsub.f32 1.0, %v3341_v0 }
 0xa65   : > { %v3343_v10 = vmul.f32 %v4016_v59, %v3342_v7 }
 0xa67   : > { %v3344_v13 = vadd.f32 %v4016_v59, %v3343_v10 }
 0xa69   : > { %v3348_v15 = vsel %vm3347_vm8, %v4016_v59, %v3344_v13 }
 0xa6a   : > { %v3353_v2 = vsel %vm3350_vm9, %v3352_v44, %v3348_v15 }
 0xa6b   : > { %v3354_v17 = vmul.f32 %v3353_v2, %v3317_v42 }
 0xa6d   : > { %v3360_v21 = vrot.slane %v3354_v17, 2 }
 0xa6f   : > { %3361 = vrot.lane.b32.xlu0 %v3360_v21, %s4415_s25 }
 0xab2   : > { %v3321_v18 = vpop.permute.xlu2 %3320 }
 0xab3   : > { %4017 = vrcp.f32 %v3321_v18  ;;  %v3334_v63 = vand.u32 2147483648, %v3321_v18  ;;  %v3332_v19 = vand.u32 2147483647, %v3321_v18  ;;  %vm3328_vm11 = vweird.f32 %v3321_v18 }
 0xab5   : > { %v3335_v57 = vor.u32 1.1754944e-38, %v3334_v63  ;;  %vm3333_vm13 = vcmp.eq.f32.partialorder %v3332_v19, 8.507059e+37 }
 0xab9   : > { %v4018_v20 = vpop.eup %4017 }
 0xaba   : > { %v3324_v16 = vmul.f32 %v4018_v20, %v3321_v18  ;;  %vm3329_vm10 = vweird.f32 %v4018_v20 }
 0xabb   : > { %vm3330_vm12 = vmor %vm3328_vm11, %vm3329_vm10 }
 0xabc   : > { %v3325_v37 = vsub.f32 1.0, %v3324_v16 }
 0xabe   : > { %v3326_v4 = vmul.f32 %v4018_v20, %v3325_v37 }
 0xac0   : > { %v3327_v22 = vadd.f32 %v4018_v20, %v3326_v4 }
 0xac2   : > { %v3331_v24 = vsel %vm3330_vm12, %v4018_v20, %v3327_v22 }
 0xac3   : > { %v3336_v23 = vsel %vm3333_vm13, %v3335_v57, %v3331_v24 }
 0xac4   : > { %v3337_v47 = vmul.f32 %v3336_v23, %v3317_v42 }
 0xac6   : > { %3356 = vrot.lane.b32.xlu1 %v3337_v47, %s4416_s19 }
 0xae1   : > { %v3362_v48 = vpop.permute.xlu0 %3361 }
 0xb38   : > { %v3357_v25 = vpop.permute.xlu1 %3356 }
 0xb39   : > { %v3365_v50 = vsel %vm3364_vm14, %v3357_v25, %v3362_v48 }
 0xb3a   : > { %3367 = vst.msk [vmem:[%s1062_s26] sm:$0x3] %vm3366_vm15, %v3365_v50 }
 0xb3b PF: > { %s5737_s27 = sld [smem:[#allocation30_spill]] }
 0xb3c   : > { %s5738_s2 = sld [smem:[#allocation25_spill]] }
 0xb3d   : > { %s5739_s25 = sld [smem:[#allocation26_spill]] }
 0xb3e   : > { %s5740_s26 = sld [smem:[#allocation31_spill]] }
 0xb41   : > { %p40_p4 = scmp.ge.s32.totalorder %s5737_s27, 4  }
 0xb43   :  { %42 = sbr.rel (!%p40_p4) target bundleno = 28 (0x1c), region = 248 }
 0xb48   :  { %3387 = vsyncpa [#allocation3], 1 }
 0xb49   :  { %3389 = vsyncpa [#allocation3 + $0x1], 1 }
 0xb4a   :  { %3390 = vsyncpa [#allocation5], 1 }
 0xb4b   :  { %3391 = vsyncpa [#allocation8], 1 }
 0xb4c   :  { %3392 = vsyncpa [#allocation11], 1 }
 0xb4d   :  { %3394 = vsyncpa [#allocation11 + $0x1], 1 }
 0xb4e   :  { %3395 = vsyncpa [#allocation14], 1 }
 0xb4f   :  { %3397 = vsyncpa [#allocation14 + $0x1], 1 }
 0xb50   :  { %3398 = vsyncpa [#allocation17], 1 }
 0xb51   :  { %3400 = vsyncpa [#allocation17 + $0x1], 1 }

</bundles_post_ra>
